<compile_context>
chip_gen: v6e
topology: v6e:2x2x1
jax: 0.10.0
libtpu: 0.0.40
codegen_flags: <defaults>
</compile_context>

<pallas_src>
import functools

import jax
import jax.numpy as jnp
from jax.experimental import pallas as pl
from jax.experimental.pallas import tpu as pltpu

NUM_CLASS = 5
LANE_PAD = 128            # lane-dense padded class axis for the head output
NEG_BIG = -1e30           # padded-class bias -> contributes exp() == 0

# Pillar / grid geometry (matches Net_PILLAR.__init__)
RANGE_XY = (-3.0, -3.0, 3.0, 3.0)
VOXEL_X, VOXEL_Y = 6.0, 6.0
NX = int((RANGE_XY[2] - RANGE_XY[0]) / VOXEL_X)   # 1
NY = int((RANGE_XY[3] - RANGE_XY[1]) / VOXEL_Y)   # 1
SCALE_XY = NX * NY                                # 1
SCALE_Y = NY                                      # 1
BN_EPS = 1e-3


# ----------------------------------------------------------------------------
# Fused Pallas kernel: PFN x2 + BEV scatter + 1x1 conv (both branches) + head
# ----------------------------------------------------------------------------
def _fused_kernel(n_tot, p_tot, nb,
                  feat_ref, pidc_ref, pidr_ref,
                  w0_ref, b0_ref,
                  w1a_ref, w1b_ref, b1_ref,
                  wc_ref, bc_ref,
                  wm1_ref, bm1_ref,
                  wm2_ref, bm2_ref,
                  out_ref):
    f32, bf16 = jnp.float32, jnp.bfloat16

    feat = feat_ref[...]                       # (n_tot, 9) = [xyz, f_center, extra]
    pid = pidc_ref[...]                        # (n_tot, 1) int32, sentinel == p_tot
    pid_row = pidr_ref[...]                    # (1, n_tot) int32 (same ids, row layout)
    xyz = feat[:, 0:3]

    # One-hot point->pillar assignment, built once in bf16 (0/1 exact in bf16).
    # Sentinel id (== p_tot) matches no column/row, so out-of-range points
    # influence nothing (same effect as the reference's masking).
    lane_ids = jax.lax.broadcasted_iota(jnp.int32, (n_tot, p_tot), 1)
    oh = (pid == lane_ids).astype(bf16)                                   # (n_tot, p_tot)
    sub_ids = jax.lax.broadcasted_iota(jnp.int32, (p_tot, n_tot), 0)
    oh_t = (pid_row == sub_ids).astype(bf16)                              # (p_tot, n_tot)

    # scatter_mean(xyz): contract the point axis on the MXU (idle slot).
    #   [sums | cnt] = onehot^T @ [xyz | 1]     -> (p_tot, 4)
    xyz1 = jnp.concatenate([xyz, jnp.ones((n_tot, 1), f32)], axis=1).astype(bf16)
    sc = jnp.dot(oh_t, xyz1, preferred_element_type=f32)                  # (p_tot, 4)
    mean = sc[:, 0:3] / jnp.maximum(sc[:, 3:4], 1.0)                      # (p_tot, 3)
    # Gather means back per point in bf16 (one MXU pass); subtract in f32.
    f_cluster = xyz - jnp.dot(oh, mean.astype(bf16), preferred_element_type=f32)

    # Lane-dense per-pillar segment max (tiny unrolled loop over p_tot pillars).
    # Zero fill is valid ONLY because inputs are post-ReLU (>= 0), and empty
    # pillars legitimately map to 0 in the dense BEV scatter.
    def seg_max(v):
        return jnp.concatenate(
            [jnp.max(jnp.where(pid == j, v, 0.0), axis=0, keepdims=True)
             for j in range(p_tot)], axis=0)                              # (p_tot, C)

    # ---- PFNLayerV2 #0: Linear(12,32,no bias) -> BN1d (folded into w0) -> ReLU
    feat12 = jnp.concatenate([xyz, f_cluster, feat[:, 3:9]], axis=1).astype(bf16)
    x = jnp.maximum(
        jnp.dot(feat12, w0_ref[...], preferred_element_type=f32) + b0_ref[...], 0.0)
    xm = seg_max(x)                                                       # (p_tot, 32)

    # ---- PFNLayerV2 #1 (last): Linear(64,64) on cat([x, x_max[unq_inv]]) ----
    # Re-associated gather:  oh @ (xm @ w1b)   (p_tot < 32, so this is cheaper).
    t = jnp.dot(xm.astype(bf16), w1b_ref[...], preferred_element_type=f32)
    h = (jnp.dot(x.astype(bf16), w1a_ref[...], preferred_element_type=f32)
         + jnp.dot(oh, t.astype(bf16), preferred_element_type=f32))
    h = jnp.maximum(h + b1_ref[...], 0.0)                                 # (n_tot, 64)
    pillars = seg_max(h)                                                  # (p_tot, 64)

    # ---- BEV (B,64,1,1) == pillar rows; Conv2d(64,1024,k=1,no bias, BN folded) -> ReLU
    bev = jnp.maximum(
        jnp.dot(pillars.astype(bf16), wc_ref[...], preferred_element_type=f32)
        + bc_ref[...], 0.0)                                               # (p_tot, 1024)

    # ---- Siamese head: x_out = branch2 - branch1 (f32 subtract, cancellation-safe)
    d = bev[nb:2 * nb, :] - bev[0:nb, :]                                  # (nb, 1024)

    # mlp2 = [Lin(1024,64) -> ReLU -> BN1d(64, folded into wm2)] -> Lin(64, NUM_CLASS)
    h2 = jnp.maximum(
        jnp.dot(d.astype(bf16), wm1_ref[...], preferred_element_type=f32)
        + bm1_ref[...], 0.0)                                              # (nb, 64)
    o = jnp.dot(h2.astype(bf16), wm2_ref[...], preferred_element_type=f32) + bm2_ref[...]
    # Padded class columns carry bias NEG_BIG -> exp() == 0, so the log_softmax
    # over the first NUM_CLASS columns is exact.
    m = jnp.max(o, axis=-1, keepdims=True)
    lse = m + jnp.log(jnp.sum(jnp.exp(o - m), axis=-1, keepdims=True))
    out_ref[...] = o - lse                                                # (nb, LANE_PAD)


def run_fused(feat, pid_col, pid_row, p, nb):
    n_tot = feat.shape[0]
    p_tot = 2 * nb * SCALE_XY                   # SCALE_XY == 1 -> pillars/branch == nb
    kernel = functools.partial(_fused_kernel, n_tot, p_tot, nb * SCALE_XY)
    ins = (feat, pid_col, pid_row,
           p["w0"], p["b0"],
           p["w1a"], p["w1b"], p["b1"],
           p["wc"], p["bc"],
           p["wm1"], p["bm1"],
           p["wm2"], p["bm2"])
    vmem = pl.BlockSpec(memory_space=pltpu.MemorySpace.VMEM)
    out = pl.pallas_call(
        kernel,
        out_shape=jax.ShapeDtypeStruct((nb, LANE_PAD), jnp.float32),
        in_specs=[vmem] * len(ins),
        out_specs=vmem,
    )(*ins)
    return out[:, :NUM_CLASS]                   # (B, NUM_CLASS) log-probabilities


# ----------------------------------------------------------------------------
# Wrapper-side per-point prep (cheap element-wise; one-hot etc. built in-kernel)
# ----------------------------------------------------------------------------
def prep_points(x6, batch, branch_offset, pillars_per_branch):
    """x6: (N, 6) = [x, y, z, f0, f1, f2].  Returns the 9-dim per-point features
    [xyz, f_center, extra] and the per-point pillar id (sentinel for invalid)."""
    xyz = x6[:, 0:3]
    extra = x6[:, 3:6]
    lo = jnp.array([RANGE_XY[0], RANGE_XY[1]], jnp.float32)
    vox = jnp.array([VOXEL_X, VOXEL_Y], jnp.float32)
    coords = jnp.floor((xyz[:, 0:2] - lo) / vox).astype(jnp.int32)            # (N, 2)
    valid = jnp.all((coords >= 0) & (coords < jnp.array([NX, NY], jnp.int32)), axis=1)

    sentinel = 2 * pillars_per_branch            # == p_tot; matches no pillar column
    pid = batch.astype(jnp.int32) * SCALE_XY + coords[:, 0] * SCALE_Y + coords[:, 1]
    pid = jnp.where(valid, pid + branch_offset, sentinel)

    f_center = jnp.stack(
        [xyz[:, 0] - (coords[:, 0].astype(jnp.float32) * VOXEL_X + RANGE_XY[0]),
         xyz[:, 1] - (coords[:, 1].astype(jnp.float32) * VOXEL_Y + RANGE_XY[1]),
         xyz[:, 2] - 0.0],
        axis=1)                                                                # (N, 3)

    feat9 = jnp.concatenate([xyz, f_center, extra], axis=1)                    # (N, 9)
    return feat9, pid


@jax.jit
def net_pillar_forward(params, x, batch, x2, batch2, y):
    num_batches = y.shape[0]
    ppb = num_batches * SCALE_XY                 # pillars per branch (== B here)
    f1, pid1 = prep_points(x, batch, 0, ppb)
    f2, pid2 = prep_points(x2, batch2, ppb, ppb)
    feat = jnp.concatenate([f1, f2], axis=0)                                   # (N1+N2, 9)
    pid = jnp.concatenate([pid1, pid2], axis=0).astype(jnp.int32)              # (N1+N2,)
    pid_col = pid[:, None]                                                     # (N, 1)
    pid_row = pid[None, :]                                                     # (1, N)
    return run_fused(feat, pid_col, pid_row, params, num_batches)


# ----------------------------------------------------------------------------
# Deterministic parameter init (shapes from Net_PILLAR.__init__).
# Eval-mode BatchNorm scales are folded into the adjacent weights in f32
# BEFORE the bf16 cast (exact fold); only the bias adds remain in-kernel.
# ----------------------------------------------------------------------------
def init_params(key):
    ks = jax.random.split(key, 12)

    def bn_fold(k, c):
        kg, kb = jax.random.split(k)
        gamma = 1.0 + 0.1 * jax.random.normal(kg, (1, c), jnp.float32)
        beta = 0.1 * jax.random.normal(kb, (1, c), jnp.float32)
        r_mean = jnp.zeros((1, c), jnp.float32)
        r_var = jnp.ones((1, c), jnp.float32)
        scale = gamma / jnp.sqrt(r_var + BN_EPS)
        return scale, beta - r_mean * scale

    p = {}
    # PFN0 Linear(12,32): rows [0:3]=xyz, [3:6]=f_cluster, [6:9]=f_center, [9:12]=extra
    w0 = 0.1 * jax.random.normal(ks[0], (12, 32), jnp.float32)
    s0, b0 = bn_fold(ks[1], 32)
    p["w0"] = (w0 * s0).astype(jnp.bfloat16)           # BN scale folded (pre-ReLU, exact)
    p["b0"] = b0
    # PFN1 Linear(64,64): rows [0:32] multiply x, [32:64] multiply gathered max
    w1 = 0.1 * jax.random.normal(ks[2], (64, 64), jnp.float32)
    s1, b1 = bn_fold(ks[3], 64)
    w1 = w1 * s1                                         # BN scale folded
    p["w1a"] = w1[0:32].astype(jnp.bfloat16)
    p["w1b"] = w1[32:64].astype(jnp.bfloat16)
    p["b1"] = b1
    # 1x1 Conv2d(64,1024,no bias) + BN2d folded into the conv weight
    wc = 0.1 * jax.random.normal(ks[4], (64, 1024), jnp.float32)
    sc, bc = bn_fold(ks[5], 1024)
    p["wc"] = (wc * sc).astype(jnp.bfloat16)
    p["bc"] = bc
    # MLP([1024, 64]) = Lin(1024,64) -> ReLU -> BN1d(64)   (PyG-example MLP helper)
    p["wm1"] = (0.05 * jax.random.normal(ks[6], (1024, 64), jnp.float32)).astype(jnp.bfloat16)
    p["bm1"] = 0.05 * jax.random.normal(ks[7], (1, 64), jnp.float32)
    sm, bm = bn_fold(ks[8], 64)
    # Lin(64, NUM_CLASS), lane-padded to 128 classes (pad bias = NEG_BIG).
    # Post-ReLU BN folded into it:  (relu*sm + bm) @ wm2 + bm2
    #                            == relu @ (sm^T * wm2) + (bm @ wm2 + bm2)
    wm2 = 0.1 * jax.random.normal(ks[9], (64, NUM_CLASS), jnp.float32)
    bm2 = 0.1 * jax.random.normal(ks[10], (1, NUM_CLASS), jnp.float32)
    wm2_p = jnp.zeros((64, LANE_PAD), jnp.float32).at[:, :NUM_CLASS].set(wm2)
    bm2_p = jnp.full((1, LANE_PAD), NEG_BIG, jnp.float32).at[:, :NUM_CLASS].set(bm2)
    p["wm2"] = (sm.reshape(64, 1) * wm2_p).astype(jnp.bfloat16)
    p["bm2"] = bm2_p + bm @ wm2_p                        # padded cols stay NEG_BIG
    return p


# ----------------------------------------------------------------------------
if __name__ == "__main__":
    key = jax.random.PRNGKey(0)
    k1, k2, k3, k4, k5, k6 = jax.random.split(key, 6)

    B, N1, N2 = 2, 64, 64

    def make_points(kxy, kz, kf, n):
        xy = jax.random.uniform(kxy, (n, 2), jnp.float32, -4.0, 4.0)  # some out of range
        z = jax.random.uniform(kz, (n, 1), jnp.float32, -1.0, 1.0)
        feats = jax.random.normal(kf, (n, 3), jnp.float32)
        return jnp.concatenate([xy, z, feats], axis=1)

    x = make_points(k1, k2, k3, N1)
    x2 = make_points(k4, k5, k6, N2)
    batch = jnp.concatenate(
        [jnp.zeros(N1 // 2, jnp.int32), jnp.ones(N1 - N1 // 2, jnp.int32)])
    batch2 = jnp.concatenate(
        [jnp.zeros(N2 // 2, jnp.int32), jnp.ones(N2 - N2 // 2, jnp.int32)])
    y = jnp.zeros((B,), jnp.int32)

    params = init_params(jax.random.PRNGKey(42))

    out = net_pillar_forward(params, x, batch, x2, batch2, y)
    out = jax.block_until_ready(out)
    assert out.shape == (B, NUM_CLASS)
    assert bool(jnp.all(jnp.isfinite(out)))
    print("KERNEL_OK")
</pallas_src>

<mosaic_0001>
module attributes {stable_mosaic.version = 11 : i64} {
  func.func @_fused_kernel(%arg0: memref<128x9xf32, #tpu.memory_space<vmem>>, %arg1: memref<128x1xi32, #tpu.memory_space<vmem>>, %arg2: memref<1x128xi32, #tpu.memory_space<vmem>>, %arg3: memref<12x32xbf16, #tpu.memory_space<vmem>>, %arg4: memref<1x32xf32, #tpu.memory_space<vmem>>, %arg5: memref<32x64xbf16, #tpu.memory_space<vmem>>, %arg6: memref<32x64xbf16, #tpu.memory_space<vmem>>, %arg7: memref<1x64xf32, #tpu.memory_space<vmem>>, %arg8: memref<64x1024xbf16, #tpu.memory_space<vmem>>, %arg9: memref<1x1024xf32, #tpu.memory_space<vmem>>, %arg10: memref<1024x64xbf16, #tpu.memory_space<vmem>>, %arg11: memref<1x64xf32, #tpu.memory_space<vmem>>, %arg12: memref<64x128xbf16, #tpu.memory_space<vmem>>, %arg13: memref<1x128xf32, #tpu.memory_space<vmem>>, %arg14: memref<2x128xf32, #tpu.memory_space<vmem>>) attributes {dimension_semantics = [], scalar_prefetch = 0 : i64, scratch_operands = 0 : i64, tpu.core_type = #tpu.core_type<tc>} {
    %c0 = arith.constant 0 : index
    %c0_0 = arith.constant 0 : index
    %0 = vector.load %arg0[%c0, %c0_0] : memref<128x9xf32, #tpu.memory_space<vmem>>, vector<128x9xf32>
    %c0_1 = arith.constant 0 : index
    %c0_2 = arith.constant 0 : index
    %1 = vector.load %arg1[%c0_1, %c0_2] : memref<128x1xi32, #tpu.memory_space<vmem>>, vector<128x1xi32>
    %c0_3 = arith.constant 0 : index
    %c0_4 = arith.constant 0 : index
    %2 = vector.load %arg2[%c0_3, %c0_4] : memref<1x128xi32, #tpu.memory_space<vmem>>, vector<1x128xi32>
    %3 = vector.extract_strided_slice %0 {offsets = [0, 0], sizes = [128, 3], strides = [1, 1]} : vector<128x9xf32> to vector<128x3xf32>
    %4 = tpu.iota {dimensions = array<i32: 1>} : vector<128x4xi32>
    %5 = vector.broadcast %1 : vector<128x1xi32> to vector<128x4xi32>
    %6 = arith.cmpi eq, %5, %4 : vector<128x4xi32>
    %7 = arith.extui %6 : vector<128x4xi1> to vector<128x4xi32>
    %8 = arith.sitofp %7 : vector<128x4xi32> to vector<128x4xf32>
    %9 = arith.truncf %8 : vector<128x4xf32> to vector<128x4xbf16>
    %10 = tpu.iota {dimensions = array<i32: 0>} : vector<4x128xi32>
    %11 = vector.broadcast %2 : vector<1x128xi32> to vector<4x128xi32>
    %12 = arith.cmpi eq, %11, %10 : vector<4x128xi32>
    %13 = arith.extui %12 : vector<4x128xi1> to vector<4x128xi32>
    %14 = arith.sitofp %13 : vector<4x128xi32> to vector<4x128xf32>
    %15 = arith.truncf %14 : vector<4x128xf32> to vector<4x128xbf16>
    %cst = arith.constant 1.000000e+00 : f32
    %16 = vector.broadcast %cst : f32 to vector<128x1xf32>
    %17 = tpu.concatenate %3, %16 in 1 : vector<128x3xf32>, vector<128x1xf32> -> vector<128x4xf32>
    %18 = arith.truncf %17 : vector<128x4xf32> to vector<128x4xbf16>
    %cst_5 = arith.constant dense<0.000000e+00> : vector<4x4xf32>
    %19 = tpu.matmul %15, %18, %cst_5 {dimension_numbers = #tpu.dot_dimension_numbers<[1], [0], [0], [1], [0, 0, 1, 1], [], []>} : vector<4x128xbf16>, vector<128x4xbf16>, vector<4x4xf32> -> vector<4x4xf32>
    %20 = vector.extract_strided_slice %19 {offsets = [0, 0], sizes = [4, 3], strides = [1, 1]} : vector<4x4xf32> to vector<4x3xf32>
    %21 = vector.extract_strided_slice %19 {offsets = [0, 3], sizes = [4, 1], strides = [1, 1]} : vector<4x4xf32> to vector<4x1xf32>
    %cst_6 = arith.constant 1.000000e+00 : f32
    %22 = vector.broadcast %cst_6 : f32 to vector<4x1xf32>
    %23 = arith.maximumf %21, %22 : vector<4x1xf32>
    %24 = vector.broadcast %23 : vector<4x1xf32> to vector<4x3xf32>
    %25 = arith.divf %20, %24 : vector<4x3xf32>
    %26 = arith.truncf %25 : vector<4x3xf32> to vector<4x3xbf16>
    %cst_7 = arith.constant dense<0.000000e+00> : vector<128x3xf32>
    %27 = tpu.matmul %9, %26, %cst_7 {dimension_numbers = #tpu.dot_dimension_numbers<[1], [0], [0], [1], [0, 0, 1, 1], [], []>} : vector<128x4xbf16>, vector<4x3xbf16>, vector<128x3xf32> -> vector<128x3xf32>
    %28 = arith.subf %3, %27 : vector<128x3xf32>
    %29 = vector.extract_strided_slice %0 {offsets = [0, 3], sizes = [128, 6], strides = [1, 1]} : vector<128x9xf32> to vector<128x6xf32>
    %30 = tpu.concatenate %3, %28, %29 in 1 : vector<128x3xf32>, vector<128x3xf32>, vector<128x6xf32> -> vector<128x12xf32>
    %31 = arith.truncf %30 : vector<128x12xf32> to vector<128x12xbf16>
    %c0_8 = arith.constant 0 : index
    %c0_9 = arith.constant 0 : index
    %32 = vector.load %arg3[%c0_8, %c0_9] : memref<12x32xbf16, #tpu.memory_space<vmem>>, vector<12x32xbf16>
    %cst_10 = arith.constant dense<0.000000e+00> : vector<128x32xf32>
    %33 = tpu.matmul %31, %32, %cst_10 {dimension_numbers = #tpu.dot_dimension_numbers<[1], [0], [0], [1], [0, 0, 1, 1], [], []>} : vector<128x12xbf16>, vector<12x32xbf16>, vector<128x32xf32> -> vector<128x32xf32>
    %c0_11 = arith.constant 0 : index
    %c0_12 = arith.constant 0 : index
    %34 = vector.load %arg4[%c0_11, %c0_12] : memref<1x32xf32, #tpu.memory_space<vmem>>, vector<1x32xf32>
    %35 = vector.broadcast %34 : vector<1x32xf32> to vector<128x32xf32>
    %36 = arith.addf %33, %35 : vector<128x32xf32>
    %cst_13 = arith.constant 0.000000e+00 : f32
    %37 = vector.broadcast %cst_13 : f32 to vector<128x32xf32>
    %38 = arith.maximumf %36, %37 : vector<128x32xf32>
    %c0_i32 = arith.constant 0 : i32
    %39 = vector.broadcast %c0_i32 : i32 to vector<128x1xi32>
    %40 = arith.cmpi eq, %1, %39 : vector<128x1xi32>
    %cst_14 = arith.constant 0.000000e+00 : f32
    %41 = vector.shape_cast %40 : vector<128x1xi1> to vector<128x1xi1>
    %42 = vector.broadcast %41 : vector<128x1xi1> to vector<128x32xi1>
    %43 = vector.broadcast %cst_14 : f32 to vector<128x32xf32>
    %44 = arith.select %42, %38, %43 : vector<128x32xi1>, vector<128x32xf32>
    %cst_15 = arith.constant dense<0xFF800000> : vector<32xf32>
    %45 = vector.multi_reduction <maximumf>, %44, %cst_15 [0] : vector<128x32xf32> to vector<32xf32>
    %46 = vector.shape_cast %45 : vector<32xf32> to vector<1x32xf32>
    %c1_i32 = arith.constant 1 : i32
    %47 = vector.broadcast %c1_i32 : i32 to vector<128x1xi32>
    %48 = arith.cmpi eq, %1, %47 : vector<128x1xi32>
    %cst_16 = arith.constant 0.000000e+00 : f32
    %49 = vector.shape_cast %48 : vector<128x1xi1> to vector<128x1xi1>
    %50 = vector.broadcast %49 : vector<128x1xi1> to vector<128x32xi1>
    %51 = vector.broadcast %cst_16 : f32 to vector<128x32xf32>
    %52 = arith.select %50, %38, %51 : vector<128x32xi1>, vector<128x32xf32>
    %cst_17 = arith.constant dense<0xFF800000> : vector<32xf32>
    %53 = vector.multi_reduction <maximumf>, %52, %cst_17 [0] : vector<128x32xf32> to vector<32xf32>
    %54 = vector.shape_cast %53 : vector<32xf32> to vector<1x32xf32>
    %c2_i32 = arith.constant 2 : i32
    %55 = vector.broadcast %c2_i32 : i32 to vector<128x1xi32>
    %56 = arith.cmpi eq, %1, %55 : vector<128x1xi32>
    %cst_18 = arith.constant 0.000000e+00 : f32
    %57 = vector.shape_cast %56 : vector<128x1xi1> to vector<128x1xi1>
    %58 = vector.broadcast %57 : vector<128x1xi1> to vector<128x32xi1>
    %59 = vector.broadcast %cst_18 : f32 to vector<128x32xf32>
    %60 = arith.select %58, %38, %59 : vector<128x32xi1>, vector<128x32xf32>
    %cst_19 = arith.constant dense<0xFF800000> : vector<32xf32>
    %61 = vector.multi_reduction <maximumf>, %60, %cst_19 [0] : vector<128x32xf32> to vector<32xf32>
    %62 = vector.shape_cast %61 : vector<32xf32> to vector<1x32xf32>
    %c3_i32 = arith.constant 3 : i32
    %63 = vector.broadcast %c3_i32 : i32 to vector<128x1xi32>
    %64 = arith.cmpi eq, %1, %63 : vector<128x1xi32>
    %cst_20 = arith.constant 0.000000e+00 : f32
    %65 = vector.shape_cast %64 : vector<128x1xi1> to vector<128x1xi1>
    %66 = vector.broadcast %65 : vector<128x1xi1> to vector<128x32xi1>
    %67 = vector.broadcast %cst_20 : f32 to vector<128x32xf32>
    %68 = arith.select %66, %38, %67 : vector<128x32xi1>, vector<128x32xf32>
    %cst_21 = arith.constant dense<0xFF800000> : vector<32xf32>
    %69 = vector.multi_reduction <maximumf>, %68, %cst_21 [0] : vector<128x32xf32> to vector<32xf32>
    %70 = vector.shape_cast %69 : vector<32xf32> to vector<1x32xf32>
    %71 = tpu.concatenate %46, %54, %62, %70 in 0 : vector<1x32xf32>, vector<1x32xf32>, vector<1x32xf32>, vector<1x32xf32> -> vector<4x32xf32>
    %72 = arith.truncf %71 : vector<4x32xf32> to vector<4x32xbf16>
    %c0_22 = arith.constant 0 : index
    %c0_23 = arith.constant 0 : index
    %73 = vector.load %arg6[%c0_22, %c0_23] : memref<32x64xbf16, #tpu.memory_space<vmem>>, vector<32x64xbf16>
    %cst_24 = arith.constant dense<0.000000e+00> : vector<4x64xf32>
    %74 = tpu.matmul %72, %73, %cst_24 {dimension_numbers = #tpu.dot_dimension_numbers<[1], [0], [0], [1], [0, 0, 1, 1], [], []>} : vector<4x32xbf16>, vector<32x64xbf16>, vector<4x64xf32> -> vector<4x64xf32>
    %75 = arith.truncf %38 : vector<128x32xf32> to vector<128x32xbf16>
    %c0_25 = arith.constant 0 : index
    %c0_26 = arith.constant 0 : index
    %76 = vector.load %arg5[%c0_25, %c0_26] : memref<32x64xbf16, #tpu.memory_space<vmem>>, vector<32x64xbf16>
    %cst_27 = arith.constant dense<0.000000e+00> : vector<128x64xf32>
    %77 = tpu.matmul %75, %76, %cst_27 {dimension_numbers = #tpu.dot_dimension_numbers<[1], [0], [0], [1], [0, 0, 1, 1], [], []>} : vector<128x32xbf16>, vector<32x64xbf16>, vector<128x64xf32> -> vector<128x64xf32>
    %78 = arith.truncf %74 : vector<4x64xf32> to vector<4x64xbf16>
    %cst_28 = arith.constant dense<0.000000e+00> : vector<128x64xf32>
    %79 = tpu.matmul %9, %78, %cst_28 {dimension_numbers = #tpu.dot_dimension_numbers<[1], [0], [0], [1], [0, 0, 1, 1], [], []>} : vector<128x4xbf16>, vector<4x64xbf16>, vector<128x64xf32> -> vector<128x64xf32>
    %80 = arith.addf %77, %79 : vector<128x64xf32>
    %c0_29 = arith.constant 0 : index
    %c0_30 = arith.constant 0 : index
    %81 = vector.load %arg7[%c0_29, %c0_30] : memref<1x64xf32, #tpu.memory_space<vmem>>, vector<1x64xf32>
    %82 = vector.broadcast %81 : vector<1x64xf32> to vector<128x64xf32>
    %83 = arith.addf %80, %82 : vector<128x64xf32>
    %cst_31 = arith.constant 0.000000e+00 : f32
    %84 = vector.broadcast %cst_31 : f32 to vector<128x64xf32>
    %85 = arith.maximumf %83, %84 : vector<128x64xf32>
    %c0_i32_32 = arith.constant 0 : i32
    %86 = vector.broadcast %c0_i32_32 : i32 to vector<128x1xi32>
    %87 = arith.cmpi eq, %1, %86 : vector<128x1xi32>
    %cst_33 = arith.constant 0.000000e+00 : f32
    %88 = vector.shape_cast %87 : vector<128x1xi1> to vector<128x1xi1>
    %89 = vector.broadcast %88 : vector<128x1xi1> to vector<128x64xi1>
    %90 = vector.broadcast %cst_33 : f32 to vector<128x64xf32>
    %91 = arith.select %89, %85, %90 : vector<128x64xi1>, vector<128x64xf32>
    %cst_34 = arith.constant dense<0xFF800000> : vector<64xf32>
    %92 = vector.multi_reduction <maximumf>, %91, %cst_34 [0] : vector<128x64xf32> to vector<64xf32>
    %93 = vector.shape_cast %92 : vector<64xf32> to vector<1x64xf32>
    %c1_i32_35 = arith.constant 1 : i32
    %94 = vector.broadcast %c1_i32_35 : i32 to vector<128x1xi32>
    %95 = arith.cmpi eq, %1, %94 : vector<128x1xi32>
    %cst_36 = arith.constant 0.000000e+00 : f32
    %96 = vector.shape_cast %95 : vector<128x1xi1> to vector<128x1xi1>
    %97 = vector.broadcast %96 : vector<128x1xi1> to vector<128x64xi1>
    %98 = vector.broadcast %cst_36 : f32 to vector<128x64xf32>
    %99 = arith.select %97, %85, %98 : vector<128x64xi1>, vector<128x64xf32>
    %cst_37 = arith.constant dense<0xFF800000> : vector<64xf32>
    %100 = vector.multi_reduction <maximumf>, %99, %cst_37 [0] : vector<128x64xf32> to vector<64xf32>
    %101 = vector.shape_cast %100 : vector<64xf32> to vector<1x64xf32>
    %c2_i32_38 = arith.constant 2 : i32
    %102 = vector.broadcast %c2_i32_38 : i32 to vector<128x1xi32>
    %103 = arith.cmpi eq, %1, %102 : vector<128x1xi32>
    %cst_39 = arith.constant 0.000000e+00 : f32
    %104 = vector.shape_cast %103 : vector<128x1xi1> to vector<128x1xi1>
    %105 = vector.broadcast %104 : vector<128x1xi1> to vector<128x64xi1>
    %106 = vector.broadcast %cst_39 : f32 to vector<128x64xf32>
    %107 = arith.select %105, %85, %106 : vector<128x64xi1>, vector<128x64xf32>
    %cst_40 = arith.constant dense<0xFF800000> : vector<64xf32>
    %108 = vector.multi_reduction <maximumf>, %107, %cst_40 [0] : vector<128x64xf32> to vector<64xf32>
    %109 = vector.shape_cast %108 : vector<64xf32> to vector<1x64xf32>
    %c3_i32_41 = arith.constant 3 : i32
    %110 = vector.broadcast %c3_i32_41 : i32 to vector<128x1xi32>
    %111 = arith.cmpi eq, %1, %110 : vector<128x1xi32>
    %cst_42 = arith.constant 0.000000e+00 : f32
    %112 = vector.shape_cast %111 : vector<128x1xi1> to vector<128x1xi1>
    %113 = vector.broadcast %112 : vector<128x1xi1> to vector<128x64xi1>
    %114 = vector.broadcast %cst_42 : f32 to vector<128x64xf32>
    %115 = arith.select %113, %85, %114 : vector<128x64xi1>, vector<128x64xf32>
    %cst_43 = arith.constant dense<0xFF800000> : vector<64xf32>
    %116 = vector.multi_reduction <maximumf>, %115, %cst_43 [0] : vector<128x64xf32> to vector<64xf32>
    %117 = vector.shape_cast %116 : vector<64xf32> to vector<1x64xf32>
    %118 = tpu.concatenate %93, %101, %109, %117 in 0 : vector<1x64xf32>, vector<1x64xf32>, vector<1x64xf32>, vector<1x64xf32> -> vector<4x64xf32>
    %119 = arith.truncf %118 : vector<4x64xf32> to vector<4x64xbf16>
    %c0_44 = arith.constant 0 : index
    %c0_45 = arith.constant 0 : index
    %120 = vector.load %arg8[%c0_44, %c0_45] : memref<64x1024xbf16, #tpu.memory_space<vmem>>, vector<64x1024xbf16>
    %cst_46 = arith.constant dense<0.000000e+00> : vector<4x1024xf32>
    %121 = tpu.matmul %119, %120, %cst_46 {dimension_numbers = #tpu.dot_dimension_numbers<[1], [0], [0], [1], [0, 0, 1, 1], [], []>} : vector<4x64xbf16>, vector<64x1024xbf16>, vector<4x1024xf32> -> vector<4x1024xf32>
    %c0_47 = arith.constant 0 : index
    %c0_48 = arith.constant 0 : index
    %122 = vector.load %arg9[%c0_47, %c0_48] : memref<1x1024xf32, #tpu.memory_space<vmem>>, vector<1x1024xf32>
    %123 = vector.broadcast %122 : vector<1x1024xf32> to vector<4x1024xf32>
    %124 = arith.addf %121, %123 : vector<4x1024xf32>
    %cst_49 = arith.constant 0.000000e+00 : f32
    %125 = vector.broadcast %cst_49 : f32 to vector<4x1024xf32>
    %126 = arith.maximumf %124, %125 : vector<4x1024xf32>
    %127 = vector.extract_strided_slice %126 {offsets = [2, 0], sizes = [2, 1024], strides = [1, 1]} : vector<4x1024xf32> to vector<2x1024xf32>
    %128 = vector.extract_strided_slice %126 {offsets = [0, 0], sizes = [2, 1024], strides = [1, 1]} : vector<4x1024xf32> to vector<2x1024xf32>
    %129 = arith.subf %127, %128 : vector<2x1024xf32>
    %130 = arith.truncf %129 : vector<2x1024xf32> to vector<2x1024xbf16>
    %c0_50 = arith.constant 0 : index
    %c0_51 = arith.constant 0 : index
    %131 = vector.load %arg10[%c0_50, %c0_51] : memref<1024x64xbf16, #tpu.memory_space<vmem>>, vector<1024x64xbf16>
    %cst_52 = arith.constant dense<0.000000e+00> : vector<2x64xf32>
    %132 = tpu.matmul %130, %131, %cst_52 {dimension_numbers = #tpu.dot_dimension_numbers<[1], [0], [0], [1], [0, 0, 1, 1], [], []>} : vector<2x1024xbf16>, vector<1024x64xbf16>, vector<2x64xf32> -> vector<2x64xf32>
    %c0_53 = arith.constant 0 : index
    %c0_54 = arith.constant 0 : index
    %133 = vector.load %arg11[%c0_53, %c0_54] : memref<1x64xf32, #tpu.memory_space<vmem>>, vector<1x64xf32>
    %134 = vector.broadcast %133 : vector<1x64xf32> to vector<2x64xf32>
    %135 = arith.addf %132, %134 : vector<2x64xf32>
    %cst_55 = arith.constant 0.000000e+00 : f32
    %136 = vector.broadcast %cst_55 : f32 to vector<2x64xf32>
    %137 = arith.maximumf %135, %136 : vector<2x64xf32>
    %138 = arith.truncf %137 : vector<2x64xf32> to vector<2x64xbf16>
    %c0_56 = arith.constant 0 : index
    %c0_57 = arith.constant 0 : index
    %139 = vector.load %arg12[%c0_56, %c0_57] : memref<64x128xbf16, #tpu.memory_space<vmem>>, vector<64x128xbf16>
    %cst_58 = arith.constant dense<0.000000e+00> : vector<2x128xf32>
    %140 = tpu.matmul %138, %139, %cst_58 {dimension_numbers = #tpu.dot_dimension_numbers<[1], [0], [0], [1], [0, 0, 1, 1], [], []>} : vector<2x64xbf16>, vector<64x128xbf16>, vector<2x128xf32> -> vector<2x128xf32>
    %c0_59 = arith.constant 0 : index
    %c0_60 = arith.constant 0 : index
    %141 = vector.load %arg13[%c0_59, %c0_60] : memref<1x128xf32, #tpu.memory_space<vmem>>, vector<1x128xf32>
    %142 = vector.broadcast %141 : vector<1x128xf32> to vector<2x128xf32>
    %143 = arith.addf %140, %142 : vector<2x128xf32>
    %cst_61 = arith.constant dense<0xFF800000> : vector<2xf32>
    %144 = vector.multi_reduction <maximumf>, %143, %cst_61 [1] : vector<2x128xf32> to vector<2xf32>
    %145 = vector.shape_cast %144 : vector<2xf32> to vector<2x1xf32>
    %146 = vector.broadcast %145 : vector<2x1xf32> to vector<2x128xf32>
    %147 = arith.subf %143, %146 : vector<2x128xf32>
    %148 = math.exp %147 : vector<2x128xf32>
    %cst_62 = arith.constant dense<0.000000e+00> : vector<2xf32>
    %149 = vector.multi_reduction <add>, %148, %cst_62 [1] : vector<2x128xf32> to vector<2xf32>
    %150 = vector.shape_cast %149 : vector<2xf32> to vector<2x1xf32>
    %151 = math.log %150 : vector<2x1xf32>
    %152 = arith.addf %145, %151 : vector<2x1xf32>
    %153 = vector.broadcast %152 : vector<2x1xf32> to vector<2x128xf32>
    %154 = arith.subf %143, %153 : vector<2x128xf32>
    %c0_63 = arith.constant 0 : index
    %c0_64 = arith.constant 0 : index
    %155 = vector.load %arg14[%c0_63, %c0_64] : memref<2x128xf32, #tpu.memory_space<vmem>>, vector<2x128xf32>
    tpu.vector_store %arg14[%c0_63, %c0_64], %154 {strides = array<i32>} : memref<2x128xf32, #tpu.memory_space<vmem>>, vector<2x128xf32>,
    return
  }
}

</mosaic_0001>

<bundles_post_ra>
// kernel: net_pillar_forward.1
= control target key start
LH: loop header
LB: loop body
LE: loop exit
PB: predicated region body
PF: predicated region fallthrough
CT: control target
= control target key end

     0   :  { %vm198_vm0 = vcmask 23552   ;;  %v5939_v3 = vmov 0.0   ;;  %vm5952_vm1 = vmmov 0   ;;  %v82_v22 = vlaneseq  ;;  %s5924_s0 = inlined_call_operand.vmem [shape: f32[128,9], index: 0, kind: input, shape index: {}]   ;;  %s5925_s1 = inlined_call_operand.vmem [shape: s32[128,1], index: 1, kind: input, shape index: {}]   ;;  %s5926_s2 = inlined_call_operand.vmem [shape: s32[1,128], index: 2, kind: input, shape index: {}]   ;;  %s5927_s3 = inlined_call_operand.vmem [shape: bf16[12,32], index: 3, kind: input, shape index: {}]   ;;  %s5928_s4 = inlined_call_operand.vmem [shape: f32[1,32], index: 4, kind: input, shape index: {}]   ;;  %s5929_s5 = inlined_call_operand.vmem [shape: bf16[32,64], index: 5, kind: input, shape index: {}]   ;;  %s5930_s6 = inlined_call_operand.vmem [shape: bf16[32,64], index: 6, kind: input, shape index: {}]   ;;  %s5931_s7 = inlined_call_operand.vmem [shape: f32[1,64], index: 7, kind: input, shape index: {}]   ;;  %s5932_s8 = inlined_call_operand.vmem [shape: bf16[64,1024], index: 8, kind: input, shape index: {}]   ;;  %s5933_s9 = inlined_call_operand.vmem [shape: f32[1,1024], index: 9, kind: input, shape index: {}]   ;;  %s5934_s10 = inlined_call_operand.vmem [shape: bf16[1024,64], index: 10, kind: input, shape index: {}]   ;;  %s5935_s11 = inlined_call_operand.vmem [shape: f32[1,64], index: 11, kind: input, shape index: {}]   ;;  %s5936_s12 = inlined_call_operand.vmem [shape: bf16[64,128], index: 12, kind: input, shape index: {}]   ;;  %s5937_s13 = inlined_call_operand.vmem [shape: f32[1,128], index: 13, kind: input, shape index: {}]   ;;  %s5938_s14 = inlined_call_operand.hbm [shape: f32[2,128], index: 14, kind: output, shape index: {}]  }
   0x1   :  { %v3885_v0 = vld [vmem:[%s5924_s0 + $0x70] sm:$0xff]  ;;  %v3890_v1 = vld [vmem:[%s5924_s0 + $0x78] sm:$0xff]  ;;  %v3895_v2 = vld [vmem:[%s5924_s0 + $0x60] sm:$0xff]  ;;  %3476 = vmatprep.subr.bf16.mxu0 %v5939_v3  ;;  %3492 = vmatprep.mubr.msk.bf16.mxu0 %vm5952_vm1, %v5939_v3  ;;  %v5941_v39 = vmov 0   ;;  %v3803_v50 = vmov 1.0|1.0  }
   0x2   :  { %v213_v4 = vsel %vm198_vm0, %v3885_v0, 1.0  ;;  %v214_v5 = vsel %vm198_vm0, %v3890_v1, 1.0  ;;  %v3905_v6 = vld [vmem:[%s5924_s0 + $0x68] sm:$0xff]  ;;  %v211_v7 = vsel %vm198_vm0, %v3895_v2, 1.0  ;;  %v3912_v8 = vld [vmem:[%s5924_s0 + $0x50] sm:$0xff]  ;;  %v3917_v9 = vld [vmem:[%s5924_s0 + $0x58] sm:$0xff]  ;;  %3602 = vset.pattern.permute.xlu1 %v5941_v39 }
   0x3   :  { %v222_v10 = vpack.c.bf16 %v214_v5, %v213_v4  ;;  %v212_v11 = vsel %vm198_vm0, %v3905_v6, 1.0  ;;  %v3926_v12 = vld [vmem:[%s5924_s0 + $0x40] sm:$0xff]  ;;  %v3931_v13 = vld [vmem:[%s5924_s0 + $0x48] sm:$0xff]  ;;  %v3936_v14 = vld [vmem:[%s5924_s0 + $0x30] sm:$0xff]  ;;  %v209_v23 = vsel %vm198_vm0, %v3912_v8, 1.0  ;;  %v210_v24 = vsel %vm198_vm0, %v3917_v9, 1.0 }
   0x4   :  { %v3941_v15 = vld [vmem:[%s5924_s0 + $0x38] sm:$0xff]  ;;  %v3946_v16 = vld [vmem:[%s5924_s0 + $0x20] sm:$0xff]  ;;  %v3951_v17 = vld [vmem:[%s5924_s0 + $0x28] sm:$0xff]  ;;  %v221_v18 = vpack.c.bf16 %v212_v11, %v211_v7  ;;  %v207_v25 = vsel %vm198_vm0, %v3926_v12, 1.0  ;;  %v208_v26 = vsel %vm198_vm0, %v3931_v13, 1.0  ;;  %v205_v28 = vsel %vm198_vm0, %v3936_v14, 1.0 }
   0x5   :  { %3477 = vmatpush3.bf16.msra.mxu0 %v222_v10  ;;  %v3956_v19 = vld [vmem:[%s5924_s0 + $0x10] sm:$0xff]  ;;  %v3961_v20 = vld [vmem:[%s5924_s0 + $0x18] sm:$0xff]  ;;  %v3966_v21 = vld [vmem:[%s5924_s0] sm:$0xff]  ;;  %v206_v29 = vsel %vm198_vm0, %v3941_v15, 1.0  ;;  %v203_v30 = vsel %vm198_vm0, %v3946_v16, 1.0  ;;  %v204_v31 = vsel %vm198_vm0, %v3951_v17, 1.0  ;;  %v220_v37 = vpack.c.bf16 %v210_v24, %v209_v23 }
   0x6   :  { %3478 = vmatprep.subr.bf16.mxu0 %v5939_v3  ;;  %v3980_v27 = vld [vmem:[%s5924_s0 + $0x8] sm:$0xff]  ;;  %v201_v32 = vsel %vm198_vm0, %v3956_v19, 1.0  ;;  %v202_v33 = vsel %vm198_vm0, %v3961_v20, 1.0  ;;  %v199_v34 = vsel %vm198_vm0, %v3966_v21, 1.0  ;;  %v4004_v38 = vshrl.u32 %v82_v22, 7  ;;  %v4011_v40 = vld [vmem:[%s5925_s1 + $0x10] sm:$0xff] }
   0x7   :  { %v200_v35 = vsel %vm198_vm0, %v3980_v27, 1.0  ;;  %v4001_v36 = vld [vmem:[%s5925_s1 + $0x8] sm:$0xff]  ;;  %v219_v41 = vpack.c.bf16 %v208_v26, %v207_v25  ;;  %v4018_v42 = vld [vmem:[%s5925_s1 + $0x18] sm:$0xff]  ;;  %v218_v43 = vpack.c.bf16 %v206_v29, %v205_v28  ;;  %v3183_v44 = vld [vmem:[%s5926_s2] ss:$0 sm:$0xff]  ;;  %v217_v46 = vpack.c.bf16 %v204_v31, %v203_v30 }
   0x8   :  { %6085 = vst [vmem:[#allocation5_spill] sm:$0xff] %v4004_v38  ;;  %88 = vperm.xlu1 %3602, %v4001_v36   ;;  %v4028_v45 = vld [vmem:[%s5925_s1 + $0x28] sm:$0xff]  ;;  %vm194_vm2 = vcmp.eq.s32.totalorder %v3183_v44, %v4004_v38  ;;  %v4036_v47 = vld [vmem:[%s5925_s1 + $0x38] sm:$0xff]  ;;  %v216_v48 = vpack.c.bf16 %v202_v33, %v201_v32  ;;  %v215_v49 = vpack.c.bf16 %v200_v35, %v199_v34 }
   0x9   :  { %3479 = vmatpush3.bf16.msra.mxu0 %v221_v18  ;;  %vm3185_vm3 = vmpackc.low %vm194_vm2, %vm194_vm2 }
   0xa   :  { %3480 = vmatprep.subr.bf16.mxu0 %v5939_v3 }
   0xc   :  { %91 = vperm.xlu1 %3602, %v4011_v40  }
   0xd   :  { %3481 = vmatpush3.bf16.msra.mxu0 %v220_v37 }
   0xe   :  { %3482 = vmatprep.subr.bf16.mxu0 %v5939_v3 }
  0x10   :  { %94 = vperm.xlu1 %3602, %v4018_v42  }
  0x11   :  { %3483 = vmatpush3.bf16.msra.mxu0 %v219_v41 }
  0x12   :  { %3484 = vmatprep.subr.bf16.mxu0 %v5939_v3 }
  0x14   :  { %100 = vperm.xlu1 %3602, %v4028_v45  }
  0x15   :  { %3485 = vmatpush3.bf16.msra.mxu0 %v218_v43 }
  0x16   :  { %3486 = vmatprep.subr.bf16.mxu0 %v5939_v3 }
  0x18   :  { %106 = vperm.xlu1 %3602, %v4036_v47  }
  0x19   :  { %3487 = vmatpush3.bf16.msra.mxu0 %v217_v46 }
  0x1a   :  { %3488 = vmatprep.subr.bf16.mxu0 %v5939_v3 }
  0x1d   :  { %3489 = vmatpush3.bf16.msra.mxu0 %v216_v48 }
  0x1e   :  { %3490 = vmatprep.subr.bf16.mxu0 %v5939_v3 }
  0x21   :  { %3491 = vmatpush3.bf16.msra.mxu0 %v215_v49 }
  0x22   :  { %3532 = vmatprep.subr.bf16.mxu0 %v5939_v3 }
  0x24   :  { %3493 = vmatmul.mubr.msk.bf16.vlgmr.msra.gmra.mxu0 %vm3185_vm3, %v3803_v50 }
  0x25   :  { %3536 = vmatprep.mubr.msk.bf16.mxu0 %vm5952_vm1, %v5939_v3 }
  0x26   :  { %19 = vsyncpa [#allocation3], 0  ;;  %v4048_v51 = vld [vmem:[%s5925_s1 + $0x48] sm:$0xff]  ;;  %v3804_v52 = vmov 3   ;;  %v4054_v53 = vld [vmem:[%s5925_s1 + $0x58] sm:$0xff]  ;;  %v4113_v23 = vand.u32 127, %v82_v22 }
  0x27   :  { %112 = vperm.xlu1 %3602, %v4048_v51   ;;  %3600 = vset.pattern.permute.xlu0 %v3804_v52  ;;  %v4060_v54 = vld [vmem:[%s5925_s1 + $0x68] sm:$0xff]  ;;  %v4066_v55 = vld [vmem:[%s5925_s1 + $0x78] sm:$0xff]  ;;  %v4072_v60 = vld [vmem:[%s5925_s1] sm:$0xff]  ;;  %vm5954_vm6 = vcmask 31744   ;;  %vm5955_vm11 = vcmask 1041408  }
  0x28   :  { %v4079_v62 = vld [vmem:[%s5925_s1 + $0x20] sm:$0xff]  ;;  %v4085_v63 = vld [vmem:[%s5925_s1 + $0x30] sm:$0xff] }
  0x29   :  { %v4091_v4 = vld [vmem:[%s5925_s1 + $0x40] sm:$0xff]  ;;  %v4097_v5 = vld [vmem:[%s5925_s1 + $0x50] sm:$0xff] }
  0x2a   :  { %v4103_v7 = vld [vmem:[%s5925_s1 + $0x60] sm:$0xff]  ;;  %v4109_v10 = vld [vmem:[%s5925_s1 + $0x70] sm:$0xff] }
  0x2b   :  { %118 = vperm.xlu1 %3602, %v4054_v53  }
  0x2f   :  { %124 = vperm.xlu1 %3602, %v4060_v54  }
  0x33   :  { %130 = vperm.xlu1 %3602, %v4066_v55  }
  0x83   :  { %v89_v11 = vpop.permute.xlu1 %88 }
  0x84   :  { %vm133_vm4 = vcmp.eq.s32.totalorder %v89_v11, %v4113_v23 }
  0x85   :  { %v3168_v28 = vsel %vm133_vm4, 1.0, %v5939_v3 }
  0x87   :  { %v92_v18 = vpop.permute.xlu1 %91 }
  0x88   :  { %vm134_vm7 = vcmp.eq.s32.totalorder %v92_v18, %v4113_v23 }
  0x89   :  { %v3169_v43 = vsel %vm134_vm7, 1.0, %v5939_v3 }
  0x8b   :  { %v95_v25 = vpop.permute.xlu1 %94 }
  0x8c   :  { %vm135_vm8 = vcmp.eq.s32.totalorder %v95_v25, %v4113_v23 }
  0x8d   :  { %v3170_v44 = vsel %vm135_vm8, 1.0, %v5939_v3 }
  0x8e   :  { %v4133_v52 = vpack.c.bf16 %v3170_v44, %v3169_v43 }
  0x8f   :  { %v101_v30 = vpop.permute.xlu1 %100 }
  0x90   :  { %vm137_vm9 = vcmp.eq.s32.totalorder %v101_v30, %v4113_v23  ;;  %6087 = vst [vmem:[#allocation7_spill] sm:$0xff] %v4133_v52 }
  0x91   :  { %v3172_v46 = vsel %vm137_vm9, 1.0, %v5939_v3  ;;  %vm622_vm9 = vcmask 1045504  }
  0x93   :  { %v107_v34 = vpop.permute.xlu1 %106 }
  0x94   :  { %vm139_vm14 = vcmp.eq.s32.totalorder %v107_v34, %v4113_v23 }
  0x95   :  { %v3174_v11 = vsel %vm139_vm14, 1.0, %v5939_v3  ;;  %vm741_vm14 = vcmp.eq.s32.totalorder %v4011_v40, 0 }
  0xa2   :  { %v113_v50 = vpop.permute.xlu1 %112 }
  0xa3   :  { %vm141_vm15 = vcmp.eq.s32.totalorder %v113_v50, %v4113_v23 }
  0xa4   :  { %v3176_v18 = vsel %vm141_vm15, 1.0, %v5939_v3  ;;  %vm744_vm15 = vcmp.eq.s32.totalorder %v4028_v45, 0 }
  0xe4   :  { %v257_v56 = vpop.f32.mrf.mxu0 }
  0xe5   :  { %v263_v57 = vmax.f32 %v257_v56, 1.0 }
  0xe6   :  { %v3494_v58 = vpop.f32.mrf.mxu0 }
  0xe7   :  { %266 = vperm.xlu0 %3600, %v263_v57   ;;  %v119_v58 = vpop.permute.xlu1 %118 }
  0xe8   :  { %v260_v59 = vpop.f32.mrf.mxu0  ;;  %vm143_vm4 = vcmp.eq.s32.totalorder %v119_v58, %v4113_v23 }
  0xea   :  { %v3495_v61 = vpop.f32.mrf.mxu0 }
  0xeb   :  { %3601 = vset.pattern.permute.xlu0 %v5941_v39 }
  0xec   :  { %85 = vperm.xlu0 %3601, %v4072_v60  }
  0xf0   :  { %97 = vperm.xlu0 %3601, %v4079_v62  }
  0xf4   :  { %103 = vperm.xlu0 %3601, %v4085_v63  }
  0xf8   :  { %109 = vperm.xlu0 %3601, %v4091_v4  }
  0xfc   :  { %115 = vperm.xlu0 %3601, %v4097_v5  }
 0x100   :  { %121 = vperm.xlu0 %3601, %v4103_v7  }
 0x104   :  { %127 = vperm.xlu0 %3601, %v4109_v10  }
 0x162   :  { %v267_v24 = vpop.permute.xlu0 %266 }
 0x163   :  { %3756 = vrcp.f32 %v267_v24 }
 0x167   :  { %v86_v26 = vpop.permute.xlu0 %85 }
 0x168   :  { %vm132_vm5 = vcmp.eq.s32.totalorder %v86_v26, %v4113_v23 }
 0x169   :  { %v3167_v29 = vsel %vm132_vm5, 1.0, %v5939_v3 }
 0x16a   :  { %v4119_v31 = vpack.c.bf16 %v3168_v28, %v3167_v29  ;;  %v125_v28 = vpop.permute.xlu1 %124 }
 0x16b   :  { %v98_v32 = vpop.permute.xlu0 %97  ;;  %vm145_vm5 = vcmp.eq.s32.totalorder %v125_v28, %v4113_v23 }
 0x16c   :  { %6086 = vst [vmem:[#allocation6_spill] sm:$0xff] %v4119_v31  ;;  %3498 = vmatprep.mubr.msk.bf16.mxu1 %vm5954_vm6, %v4119_v31  ;;  %vm136_vm10 = vcmp.eq.s32.totalorder %v98_v32, %v4113_v23  ;;  %v3178_v32 = vsel %vm143_vm4, 1.0, %v5939_v3  ;;  %vm745_vm4 = vcmp.eq.s32.totalorder %v4085_v63, 0 }
 0x16d   :  { %v3171_v48 = vsel %vm136_vm10, 1.0, %v5939_v3  ;;  %vm740_vm10 = vcmp.eq.s32.totalorder %v4001_v36, 0 }
 0x16f   :  { %v104_v22 = vpop.permute.xlu0 %103 }
 0x170   :  { %v3757_v33 = vpop.eup %3756  ;;  %vm138_vm12 = vcmp.eq.s32.totalorder %v104_v22, %v4113_v23 }
 0x171   :  { %v270_v35 = vmul.f32 %v3757_v33, %v257_v56  ;;  %v4135_v56 = vpack.c.bf16 %v3172_v46, %v3171_v48  ;;  %v3173_v59 = vsel %vm138_vm12, 1.0, %v5939_v3  ;;  %v3180_v33 = vsel %vm145_vm5, 1.0, %v5939_v3  ;;  %v3683_v46 = vld [vmem:[%s5927_s3] sm:$0x3f]   ;;  %s3805_s3 = smov 3  }
 0x172   :  { %v4149_v24 = vpack.c.bf16 %v3174_v11, %v3173_v59  ;;  %v624_v48 = vsel %vm622_vm9, %v3683_v46, 0  ;;  %vm739_vm12 = vcmp.eq.s32.totalorder %v4072_v60, 0  ;;  %vm890_vm5 = vcmp.eq.s32.totalorder %v4001_v36, 1 }
 0x173   :  { %v110_v37 = vpop.permute.xlu0 %109  ;;  %v271_v41 = vpack.c.bf16 %v270_v35, %v270_v35  ;;  %6088 = vst [vmem:[#allocation8_spill] sm:$0xff] %v4135_v56  ;;  %v131_v35 = vpop.permute.xlu1 %130 }
 0x174   :  { %vm140_vm13 = vcmp.eq.s32.totalorder %v110_v37, %v4113_v23  ;;  %6089 = vst [vmem:[#allocation9_spill] sm:$0xff] %v4149_v24  ;;  %vm147_vm8 = vcmp.eq.s32.totalorder %v131_v35, %v4113_v23 }
 0x175   :  { %3590 = vmatprep.subr.msk.bf16.mxu1 %vm5955_vm11, %v271_v41  ;;  %v299_v49 = vsel %vm5955_vm11, %v271_v41, 0  ;;  %v3175_v61 = vsel %vm140_vm13, 1.0, %v5939_v3  ;;  %v3182_v43 = vsel %vm147_vm8, 1.0, %v5939_v3  ;;  %vm742_vm13 = vcmp.eq.s32.totalorder %v4018_v42, 0 }
 0x176   :  { %3497 = vmatpush3.bf16.msra.mxu1 %v299_v49  ;;  %v4151_v26 = vpack.c.bf16 %v3176_v18, %v3175_v61  ;;  %vm892_vm8 = vcmp.eq.s32.totalorder %v4018_v42, 1 }
 0x177   :  { %v116_v57 = vpop.permute.xlu0 %115  ;;  %3591 = vmatprep.subr.msk.bf16.mxu1 %vm622_vm9, %v3683_v46  ;;  %vm891_vm9 = vcmp.eq.s32.totalorder %v4011_v40, 1 }
 0x178   :  { %6090 = vst [vmem:[#allocation10_spill] sm:$0xff] %v4151_v26  ;;  %vm142_vm2 = vcmp.eq.s32.totalorder %v116_v57, %v4113_v23 }
 0x179   :  { %3499 = vmatmul.mubr.msk.bf16.vlgmr.msra.gmra.mxu1 %vm5954_vm6, %v4133_v52  ;;  %v3177_v29 = vsel %vm142_vm2, 1.0, %v5939_v3  ;;  %vm743_vm2 = vcmp.eq.s32.totalorder %v4079_v62, 0 }
 0x17a   :  { %3502 = vmatprep.mubr.msk.bf16.mxu1 %vm5954_vm6, %v4135_v56  ;;  %v4165_v34 = vpack.c.bf16 %v3178_v32, %v3177_v29  ;;  %3515 = vmatpush3.bf16.msra.mxu1 %v624_v48  ;;  %v3618_v29 = vpack.i.bf16 %v3961_v20, %v3956_v19  ;;  %v3613_v32 = vpack.i.bf16 %v3980_v27, %v3966_v21 }
 0x17b   :  { %v122_v25 = vpop.permute.xlu0 %121 }
 0x17c   :  { %vm144_vm3 = vcmp.eq.s32.totalorder %v122_v25, %v4113_v23  ;;  %6091 = vst [vmem:[#allocation11_spill] sm:$0xff] %v4165_v34 }
 0x17d   :  { %v3179_v30 = vsel %vm144_vm3, 1.0, %v5939_v3  ;;  %vm746_vm3 = vcmp.eq.s32.totalorder %v4036_v47, 0 }
 0x17e   :  { %v4167_v37 = vpack.c.bf16 %v3180_v33, %v3179_v30 }
 0x17f   :  { %v128_v22 = vpop.permute.xlu0 %127 }
 0x180   :  { %6092 = vst [vmem:[#allocation12_spill] sm:$0xff] %v4167_v37  ;;  %vm146_vm7 = vcmp.eq.s32.totalorder %v128_v22, %v4113_v23 }
 0x181   :  { %3503 = vmatmul.mubr.msk.bf16.gmra.mxu1 %vm5954_vm6, %v4149_v24  ;;  %v3181_v41 = vsel %vm146_vm7, 1.0, %v5939_v3  ;;  %vm889_vm7 = vcmp.eq.s32.totalorder %v4072_v60, 1 }
 0x182   :  { %3506 = vmatprep.mubr.msk.bf16.mxu1 %vm5954_vm6, %v4151_v26  ;;  %v4177_v44 = vpack.c.bf16 %v3182_v43, %v3181_v41 }
 0x184   :  { %6093 = vst [vmem:[#allocation13_spill] sm:$0xff] %v4177_v44 }
 0x189   :  { %3507 = vmatmul.mubr.msk.bf16.gmra.mxu1 %vm5954_vm6, %v4165_v34 }
 0x18a   :  { %3510 = vmatprep.mubr.msk.bf16.mxu1 %vm5954_vm6, %v4167_v37 }
 0x191   :  { %3511 = vmatmul.mubr.msk.bf16.gmra.mxu1 %vm5954_vm6, %v4177_v44 }
 0x239   :  { %v3500_v49 = vpop.f32.mrf.mxu1 }
 0x23a   :  { %v400_v57 = vsub.f32 %v3956_v19, %v3500_v49  ;;  %v3633_v49 = vpack.i.bf16 %v3951_v17, %v3946_v16 }
 0x23b   :  { %v335_v50 = vpop.f32.mrf.mxu1 }
 0x23c   :  { %v398_v61 = vsub.f32 %v3966_v21, %v335_v50  ;;  %v3638_v21 = vpack.i.bf16 %v3941_v15, %v3936_v14 }
 0x23d   :  { %v3501_v23 = vpop.f32.mrf.mxu1 }
 0x23e   :  { %v401_v58 = vsub.f32 %v3961_v20, %v3501_v23 }
 0x23f   :  { %v338_v59 = vpop.f32.mrf.mxu1 }
 0x240   :  { %v3603_v11 = vpack.i.bf16 %v401_v58, %v400_v57  ;;  %v399_v18 = vsub.f32 %v3980_v27, %v338_v59 }
 0x241   :  { %v3504_v25 = vpop.f32.mrf.mxu1 }
 0x242   :  { %v3608_v28 = vpack.i.bf16 %v399_v18, %v398_v61  ;;  %3604 = vrot.lane.b32.xlu1 %v3603_v11, %s3805_s3  ;;  %v404_v33 = vsub.f32 %v3936_v14, %v3504_v25  ;;  %v3653_v18 = vpack.i.bf16 %v3931_v13, %v3926_v12 }
 0x243   :  { %v351_v30 = vpop.f32.mrf.mxu1 }
 0x244   :  { %3609 = vrot.lane.b32.xlu0 %v3608_v28, %s3805_s3  ;;  %v402_v43 = vsub.f32 %v3946_v16, %v351_v30  ;;  %v3658_v16 = vpack.i.bf16 %v3917_v9, %v3912_v8 }
 0x245   :  { %v3505_v22 = vpop.f32.mrf.mxu1 }
 0x246   :  { %v405_v35 = vsub.f32 %v3941_v15, %v3505_v22  ;;  %3619 = vrot.lane.b32.xlu1 %v3618_v29, %s3805_s3 }
 0x247   :  { %v354_v41 = vpop.f32.mrf.mxu1 }
 0x248   :  { %v3623_v46 = vpack.i.bf16 %v405_v35, %v404_v33  ;;  %v403_v48 = vsub.f32 %v3951_v17, %v354_v41  ;;  %3614 = vrot.lane.b32.xlu0 %v3613_v32, %s3805_s3  ;;  %v755_v35 = vsel %vm739_vm12, 1, %v5941_v39  ;;  %v762_v41 = vsel %vm746_vm3, 1, %v5941_v39 }
 0x249   :  { %v3508_v19 = vpop.f32.mrf.mxu1  ;;  %vm893_vm12 = vcmp.eq.s32.totalorder %v4079_v62, 1  ;;  %vm1041_vm3 = vcmp.eq.s32.totalorder %v4018_v42, 2 }
 0x24a   :  { %v3628_v20 = vpack.i.bf16 %v403_v48, %v402_v43  ;;  %3624 = vrot.lane.b32.xlu1 %v3623_v46, %s3805_s3  ;;  %v408_v23 = vsub.f32 %v3912_v8, %v3508_v19  ;;  %v761_v43 = vsel %vm745_vm4, 1, %v5941_v39  ;;  %v906_v46 = vsel %vm890_vm5, 1, %v5941_v39 }
 0x24b   :  { %v367_v27 = vpop.f32.mrf.mxu1  ;;  %v905_v48 = vsel %vm889_vm7, 1, %v5941_v39  ;;  %v908_v19 = vsel %vm892_vm8, 1, %v5941_v39  ;;  %vm1040_vm4 = vcmp.eq.s32.totalorder %v4011_v40, 2  ;;  %vm1043_vm5 = vcmp.eq.s32.totalorder %v4028_v45, 2 }
 0x24c   :  { %3629 = vrot.lane.b32.xlu0 %v3628_v20, %s3805_s3  ;;  %v406_v59 = vsub.f32 %v3926_v12, %v367_v27  ;;  %v3673_v12 = vpack.i.bf16 %v3905_v6, %v3895_v2  ;;  %v907_v20 = vsel %vm891_vm9, 1, %v5941_v39  ;;  %v909_v27 = vsel %vm893_vm12, 1, %v5941_v39 }
 0x24d   :  { %v3509_v50 = vpop.f32.mrf.mxu1  ;;  %vm1042_vm7 = vcmp.eq.s32.totalorder %v4079_v62, 2  ;;  %vm1045_vm8 = vcmp.eq.s32.totalorder %v4036_v47, 2  ;;  %vm1044_vm9 = vcmp.eq.s32.totalorder %v4085_v63, 2  ;;  %vm747_vm12 = vcmp.eq.s32.totalorder %v4091_v4, 0 }
 0x24e   :  { %v409_v57 = vsub.f32 %v3917_v9, %v3509_v50  ;;  %3639 = vrot.lane.b32.xlu1 %v3638_v21, %s3805_s3  ;;  %v3678_v9 = vpack.i.bf16 %v3890_v1, %v3885_v0 }
 0x24f   :  { %v370_v58 = vpop.f32.mrf.mxu1 }
 0x250   :  { %v3643_v61 = vpack.i.bf16 %v409_v57, %v408_v23  ;;  %v407_v11 = vsub.f32 %v3931_v13, %v370_v58  ;;  %3634 = vrot.lane.b32.xlu0 %v3633_v49, %s3805_s3  ;;  %v756_v13 = vsel %vm740_vm10, 1, %v5941_v39  ;;  %vm894_vm10 = vcmp.eq.s32.totalorder %v4028_v45, 1 }
 0x251   :  { %v3512_v14 = vpop.f32.mrf.mxu1  ;;  %v910_v21 = vsel %vm894_vm10, 1, %v5941_v39  ;;  %v1057_v58 = vsel %vm1041_vm3, 1, %v5941_v39  ;;  %vm748_vm10 = vcmp.eq.s32.totalorder %v4048_v51, 0  ;;  %vm900_vm3 = vcmp.eq.s32.totalorder %v4054_v53, 1 }
 0x252   :  { %v3648_v15 = vpack.i.bf16 %v407_v11, %v406_v59  ;;  %3644 = vrot.lane.b32.xlu1 %v3643_v61, %s3805_s3  ;;  %v412_v28 = vsub.f32 %v3885_v0, %v3512_v14  ;;  %v758_v0 = vsel %vm742_vm13, 1, %v5941_v39  ;;  %vm896_vm13 = vcmp.eq.s32.totalorder %v4036_v47, 1 }
 0x253   :  { %v383_v17 = vpop.f32.mrf.mxu1  ;;  %v912_v49 = vsel %vm896_vm13, 1, %v5941_v39  ;;  %v1056_v59 = vsel %vm1040_vm4, 1, %v5941_v39  ;;  %v1059_v61 = vsel %vm1043_vm5, 1, %v5941_v39  ;;  %v1058_v11 = vsel %vm1042_vm7, 1, %v5941_v39 }
 0x254   :  { %3649 = vrot.lane.b32.xlu0 %v3648_v15, %s3805_s3  ;;  %v410_v32 = vsub.f32 %v3895_v2, %v383_v17  ;;  %v760_v2 = vsel %vm744_vm15, 1, %v5941_v39  ;;  %vm1039_vm15 = vcmp.eq.s32.totalorder %v4001_v36, 2  ;;  %v1061_v14 = vsel %vm1045_vm8, 1, %v5941_v39 }
 0x255   :  { %v3513_v25 = vpop.f32.mrf.mxu1  ;;  %v1055_v23 = vsel %vm1039_vm15, 1, %v5941_v39  ;;  %v1060_v15 = vsel %vm1044_vm9, 1, %v5941_v39  ;;  %vm750_vm13 = vcmp.eq.s32.totalorder %v4054_v53, 0  ;;  %v763_v17 = vsel %vm747_vm12, 1, %v5941_v39 }
 0x256   :  { %v413_v29 = vsub.f32 %v3890_v1, %v3513_v25  ;;  %3659 = vrot.lane.b32.xlu1 %v3658_v16, %s3805_s3  ;;  %v757_v1 = vsel %vm741_vm14, 1, %v5941_v39  ;;  %vm895_vm14 = vcmp.eq.s32.totalorder %v4085_v63, 1  ;;  %v764_v16 = vsel %vm748_vm10, 1, %v5941_v39 }
 0x257   :  { %v386_v30 = vpop.f32.mrf.mxu1  ;;  %v911_v50 = vsel %vm895_vm14, 1, %v5941_v39  ;;  %vm749_vm14 = vcmp.eq.s32.totalorder %v4097_v5, 0  ;;  %vm898_vm15 = vcmp.eq.s32.totalorder %v4048_v51, 1  ;;  %vm899_vm4 = vcmp.eq.s32.totalorder %v4097_v5, 1 }
 0x258   :  { %v3663_v22 = vpack.i.bf16 %v413_v29, %v412_v28  ;;  %v411_v33 = vsub.f32 %v3905_v6, %v386_v30  ;;  %3654 = vrot.lane.b32.xlu0 %v3653_v18, %s3805_s3  ;;  %v759_v6 = vsel %vm743_vm2, 1, %v5941_v39  ;;  %vm1038_vm2 = vcmp.eq.s32.totalorder %v4072_v60, 2 }
 0x259   :  { %v1054_v57 = vsel %vm1038_vm2, 1, %v5941_v39  ;;  %v766_v18 = vsel %vm750_vm13, 1, %v5941_v39  ;;  %v765_v25 = vsel %vm749_vm14, 1, %v5941_v39  ;;  %vm897_vm2 = vcmp.eq.s32.totalorder %v4091_v4, 1 }
 0x25a   :  { %v3668_v8 = vpack.i.bf16 %v411_v33, %v410_v32  ;;  %3664 = vrot.lane.b32.xlu1 %v3663_v22, %s3805_s3  ;;  %v914_v28 = vsel %vm898_vm15, 1, %v5941_v39  ;;  %v913_v29 = vsel %vm897_vm2, 1, %v5941_v39  ;;  %v916_v30 = vsel %vm900_vm3, 1, %v5941_v39 }
 0x25b   :  { %vm1188_vm5 = vcmp.eq.s32.totalorder %v4001_v36, 3  ;;  %v915_v32 = vsel %vm899_vm4, 1, %v5941_v39  ;;  %vm1187_vm7 = vcmp.eq.s32.totalorder %v4072_v60, 3  ;;  %vm1190_vm8 = vcmp.eq.s32.totalorder %v4018_v42, 3 }
 0x25c   :  { %3669 = vrot.lane.b32.xlu0 %v3668_v8, %s3805_s3  ;;  %v1204_v22 = vsel %vm1188_vm5, 1, %v5941_v39  ;;  %v1203_v33 = vsel %vm1187_vm7, 1, %v5941_v39  ;;  %vm1189_vm9 = vcmp.eq.s32.totalorder %v4011_v40, 3  ;;  %v1206_v8 = vsel %vm1190_vm8, 1, %v5941_v39 }
 0x25d   :  { %vm1192_vm10 = vcmp.eq.s32.totalorder %v4028_v45, 3  ;;  %v1205_v36 = vsel %vm1189_vm9, 1, %v5941_v39  ;;  %vm1191_vm12 = vcmp.eq.s32.totalorder %v4079_v62, 3  ;;  %vm1194_vm13 = vcmp.eq.s32.totalorder %v4036_v47, 3 }
 0x25e   :  { %3679 = vrot.lane.b32.xlu1 %v3678_v9, %s3805_s3  ;;  %v1208_v60 = vsel %vm1192_vm10, 1, %v5941_v39  ;;  %v1207_v42 = vsel %vm1191_vm12, 1, %v5941_v39  ;;  %vm1193_vm14 = vcmp.eq.s32.totalorder %v4085_v63, 3  ;;  %v1210_v40 = vsel %vm1194_vm13, 1, %v5941_v39 }
 0x25f   :  { %vm1047_vm15 = vcmp.eq.s32.totalorder %v4048_v51, 2  ;;  %v1209_v45 = vsel %vm1193_vm14, 1, %v5941_v39  ;;  %vm1046_vm2 = vcmp.eq.s32.totalorder %v4091_v4, 2  ;;  %vm1049_vm3 = vcmp.eq.s32.totalorder %v4054_v53, 2 }
 0x260   :  { %3674 = vrot.lane.b32.xlu0 %v3673_v12, %s3805_s3  ;;  %v1063_v62 = vsel %vm1047_vm15, 1, %v5941_v39  ;;  %v1062_v47 = vsel %vm1046_vm2, 1, %v5941_v39  ;;  %vm1048_vm4 = vcmp.eq.s32.totalorder %v4097_v5, 2  ;;  %v1065_v63 = vsel %vm1049_vm3, 1, %v5941_v39 }
 0x261   :  { %vm752_vm5 = vcmp.eq.s32.totalorder %v4060_v54, 0  ;;  %v1064_v12 = vsel %vm1048_vm4, 1, %v5941_v39  ;;  %vm751_vm7 = vcmp.eq.s32.totalorder %v4103_v7, 0  ;;  %vm754_vm8 = vcmp.eq.s32.totalorder %v4066_v55, 0 }
 0x262   :  { %775 = vperm.xlu1 %3602, %v756_v13   ;;  %vm558_vm9 = vcmask 48128   ;;  %vm753_vm10 = vcmp.eq.s32.totalorder %v4109_v10, 0  ;;  %vm902_vm12 = vcmp.eq.s32.totalorder %v4060_v54, 1  ;;  %vm597_vm13 = vcmask 97280  }
 0x263   :  { %vm901_vm14 = vcmp.eq.s32.totalorder %v4103_v7, 1  ;;  %vm904_vm15 = vcmp.eq.s32.totalorder %v4066_v55, 1  ;;  %vm903_vm2 = vcmp.eq.s32.totalorder %v4109_v10, 1  ;;  %vm1196_vm3 = vcmp.eq.s32.totalorder %v4048_v51, 3 }
 0x264   :  { %772 = vperm.xlu0 %3601, %v755_v35   ;;  %vm1195_vm4 = vcmp.eq.s32.totalorder %v4091_v4, 3 }
 0x265   :  { %v1211_v51 = vsel %vm1195_vm4, 1, %v5941_v39 }
 0x266   :  { %781 = vperm.xlu1 %3602, %v758_v0  }
 0x268   :  { %778 = vperm.xlu0 %3601, %v757_v1   ;;  %v768_v1 = vsel %vm752_vm5, 1, %v5941_v39  ;;  %vm1198_vm5 = vcmp.eq.s32.totalorder %v4054_v53, 3  ;;  %v3770_v53 = vld [vmem:[%s5924_s0 + $0x58] sm:$0xff] }
 0x269   :  { %v1214_v4 = vsel %vm1198_vm5, 1, %v5941_v39 }
 0x26a   :  { %787 = vperm.xlu1 %3602, %v760_v2  }
 0x26c   :  { %784 = vperm.xlu0 %3601, %v759_v6  }
 0x26e   :  { %793 = vperm.xlu1 %3602, %v762_v41  }
 0x270   :  { %790 = vperm.xlu0 %3601, %v761_v43  }
 0x272   :  { %925 = vperm.xlu1 %3602, %v906_v46  }
 0x274   :  { %922 = vperm.xlu0 %3601, %v905_v48   ;;  %v767_v48 = vsel %vm751_vm7, 1, %v5941_v39  ;;  %vm1197_vm7 = vcmp.eq.s32.totalorder %v4097_v5, 3 }
 0x276   :  { %931 = vperm.xlu1 %3602, %v908_v19  }
 0x278   :  { %928 = vperm.xlu0 %3601, %v907_v20   ;;  %v770_v20 = vsel %vm754_vm8, 1, %v5941_v39  ;;  %vm1051_vm8 = vcmp.eq.s32.totalorder %v4060_v54, 2 }
 0x27a   :  { %937 = vperm.xlu1 %3602, %v910_v21   ;;  %v3762_v21 = vld [vmem:[%s5924_s0 + $0x18] sm:$0xff] }
 0x27c   :  { %934 = vperm.xlu0 %3601, %v909_v27  }
 0x27e   :  { %943 = vperm.xlu1 %3602, %v912_v49   ;;  %v3763_v49 = vld [vmem:[%s5924_s0 + $0x10] sm:$0xff] }
 0x280   :  { %940 = vperm.xlu0 %3601, %v911_v50  }
 0x282   :  { %1074 = vperm.xlu1 %3602, %v1055_v23  }
 0x284   :  { %1071 = vperm.xlu0 %3601, %v1054_v57  }
 0x286   :  { %1080 = vperm.xlu1 %3602, %v1057_v58   ;;  %v3764_v58 = vld [vmem:[%s5924_s0 + $0x8] sm:$0xff] }
 0x288   :  { %1077 = vperm.xlu0 %3601, %v1056_v59  }
 0x28a   :  { %1086 = vperm.xlu1 %3602, %v1059_v61   ;;  %v3765_v61 = vld [vmem:[%s5924_s0] sm:$0xff] }
 0x28c   :  { %1083 = vperm.xlu0 %3601, %v1058_v11  }
 0x28e   :  { %1092 = vperm.xlu1 %3602, %v1061_v14  }
 0x290   :  { %1089 = vperm.xlu0 %3601, %v1060_v15  }
 0x292   :  { %799 = vperm.xlu1 %3602, %v764_v16  }
 0x294   :  { %796 = vperm.xlu0 %3601, %v763_v17  }
 0x296   :  { %805 = vperm.xlu1 %3602, %v766_v18  }
 0x298   :  { %802 = vperm.xlu0 %3601, %v765_v25   ;;  %v769_v25 = vsel %vm753_vm10, 1, %v5941_v39  ;;  %vm1050_vm10 = vcmp.eq.s32.totalorder %v4103_v7, 2 }
 0x29a   :  { %949 = vperm.xlu1 %3602, %v914_v28  }
 0x29c   :  { %946 = vperm.xlu0 %3601, %v913_v29  }
 0x29e   :  { %955 = vperm.xlu1 %3602, %v916_v30   ;;  %v918_v30 = vsel %vm902_vm12, 1, %v5941_v39  ;;  %vm1053_vm12 = vcmp.eq.s32.totalorder %v4066_v55, 2 }
 0x2a0   :  { %952 = vperm.xlu0 %3601, %v915_v32  }
 0x2a2   :  { %1223 = vperm.xlu1 %3602, %v1204_v22  }
 0x2a4   :  { %1220 = vperm.xlu0 %3601, %v1203_v33  }
 0x2a6   :  { %1229 = vperm.xlu1 %3602, %v1206_v8  }
 0x2a8   :  { %1226 = vperm.xlu0 %3601, %v1205_v36  }
 0x2aa   :  { %1235 = vperm.xlu1 %3602, %v1208_v60  }
 0x2ac   :  { %1232 = vperm.xlu0 %3601, %v1207_v42  }
 0x2ae   :  { %1241 = vperm.xlu1 %3602, %v1210_v40  }
 0x2b0   :  { %1238 = vperm.xlu0 %3601, %v1209_v45   ;;  %v917_v45 = vsel %vm901_vm14, 1, %v5941_v39  ;;  %vm1052_vm14 = vcmp.eq.s32.totalorder %v4109_v10, 2 }
 0x2b2   :  { %1098 = vperm.xlu1 %3602, %v1063_v62  }
 0x2b4   :  { %v3605_v9 = vpop.permute.xlu1 %3604  ;;  %1095 = vperm.xlu0 %3601, %v1062_v47   ;;  %v920_v47 = vsel %vm904_vm15, 1, %v5941_v39  ;;  %vm1200_vm15 = vcmp.eq.s32.totalorder %v4060_v54, 3 }
 0x2b5   :  { %v3607_v35 = vunpack.i.h.bf16 %v3605_v9  ;;  %v3606_v0 = vunpack.i.l.bf16 %v3605_v9 }
 0x2b6   :  { %1104 = vperm.xlu1 %3602, %v1065_v63   ;;  %v3610_v13 = vpop.permute.xlu0 %3609  ;;  %v3766_v63 = vld [vmem:[%s5924_s0 + $0x38] sm:$0xff] }
 0x2b7   :  { %v3612_v2 = vunpack.i.h.bf16 %v3610_v13  ;;  %v3611_v6 = vunpack.i.l.bf16 %v3610_v13  ;;  %v545_v27 = vsel %vm198_vm0, %v3762_v21, %v3607_v35  ;;  %v544_v50 = vsel %vm198_vm0, %v3763_v49, %v3606_v0 }
 0x2b8   :  { %v3620_v41 = vpop.permute.xlu1 %3619  ;;  %1101 = vperm.xlu0 %3601, %v1064_v12   ;;  %v3767_v12 = vld [vmem:[%s5924_s0 + $0x30] sm:$0xff]  ;;  %v919_v21 = vsel %vm903_vm2, 1, %v5941_v39  ;;  %vm1199_vm2 = vcmp.eq.s32.totalorder %v4103_v7, 3 }
 0x2b9   :  { %v3622_v43 = vunpack.i.h.bf16 %v3620_v41  ;;  %v3621_v46 = vunpack.i.l.bf16 %v3620_v41  ;;  %v543_v59 = vsel %vm198_vm0, %v3764_v58, %v3612_v2  ;;  %v542_v11 = vsel %vm198_vm0, %v3765_v61, %v3611_v6  ;;  %v3769_v6 = vld [vmem:[%s5924_s0 + $0x20] sm:$0xff] }
 0x2ba   :  { %811 = vperm.xlu1 %3602, %v768_v1   ;;  %v3615_v19 = vpop.permute.xlu0 %3614  ;;  %v3768_v1 = vld [vmem:[%s5924_s0 + $0x28] sm:$0xff] }
 0x2bb   :  { %v3617_v23 = vunpack.i.h.bf16 %v3615_v19  ;;  %v3616_v57 = vunpack.i.l.bf16 %v3615_v19  ;;  %v561_v14 = vsel %vm558_vm9, %v544_v50, %v3621_v46  ;;  %v562_v15 = vsel %vm558_vm9, %v545_v27, %v3622_v43 }
 0x2bc   :  { %v3625_v16 = vpop.permute.xlu1 %3624  ;;  %808 = vperm.xlu0 %3601, %v767_v48   ;;  %v576_v32 = vpack.c.bf16 %v562_v15, %v561_v14  ;;  %v1212_v50 = vsel %vm1196_vm3, 1, %v5941_v39 }
 0x2bd   :  { %v559_v17 = vsel %vm558_vm9, %v542_v11, %v3616_v57  ;;  %v560_v18 = vsel %vm558_vm9, %v543_v59, %v3617_v23  ;;  %v3627_v22 = vunpack.i.h.bf16 %v3625_v16  ;;  %v3626_v33 = vunpack.i.l.bf16 %v3625_v16 }
 0x2be   :  { %v575_v28 = vpack.c.bf16 %v560_v18, %v559_v17  ;;  %817 = vperm.xlu1 %3602, %v770_v20   ;;  %v3630_v29 = vpop.permute.xlu0 %3629  ;;  %v3771_v18 = vld [vmem:[%s5924_s0 + $0x50] sm:$0xff] }
 0x2bf   :  { %v3632_v8 = vunpack.i.h.bf16 %v3630_v29  ;;  %v3631_v36 = vunpack.i.l.bf16 %v3630_v29  ;;  %v549_v9 = vsel %vm198_vm0, %v3766_v63, %v3627_v22  ;;  %v548_v13 = vsel %vm198_vm0, %v3767_v12, %v3626_v33  ;;  %v3773_v22 = vld [vmem:[%s5924_s0 + $0x40] sm:$0xff] }
 0x2c0   :  { %v3640_v60 = vpop.permute.xlu1 %3639  ;;  %814 = vperm.xlu0 %3601, %v769_v25   ;;  %3516 = vmatprep.mubr.msk.bf16.mxu1 %vm597_vm13, %v575_v28  ;;  %v1067_v63 = vsel %vm1051_vm8, 1, %v5941_v39 }
 0x2c1   :  { %v3642_v42 = vunpack.i.h.bf16 %v3640_v60  ;;  %v3641_v40 = vunpack.i.l.bf16 %v3640_v60  ;;  %3517 = vmatmul.mubr.msk.bf16.vlgmr.msra.gmra.mxu1 %vm597_vm13, %v576_v32  ;;  %v547_v2 = vsel %vm198_vm0, %v3768_v1, %v3632_v8  ;;  %v546_v41 = vsel %vm198_vm0, %v3769_v6, %v3631_v36 }
 0x2c2   :  { %961 = vperm.xlu1 %3602, %v918_v30   ;;  %v3635_v62 = vpop.permute.xlu0 %3634  ;;  %v3772_v30 = vld [vmem:[%s5924_s0 + $0x48] sm:$0xff]  ;;  %v1066_v6 = vsel %vm1050_vm10, 1, %v5941_v39 }
 0x2c3   :  { %v3637_v35 = vunpack.i.h.bf16 %v3635_v62  ;;  %v3636_v0 = vunpack.i.l.bf16 %v3635_v62  ;;  %v565_v43 = vsel %vm558_vm9, %v548_v13, %v3641_v40  ;;  %v566_v46 = vsel %vm558_vm9, %v549_v9, %v3642_v42 }
 0x2c4   :  { %v3645_v48 = vpop.permute.xlu1 %3644  ;;  %958 = vperm.xlu0 %3601, %v917_v45   ;;  %v578_v23 = vpack.c.bf16 %v566_v46, %v565_v43  ;;  %v1213_v45 = vsel %vm1197_vm7, 1, %v5941_v39  ;;  %v1069_v43 = vsel %vm1053_vm12, 1, %v5941_v39  ;;  %v3774_v46 = vld [vmem:[%s5924_s0 + $0x78] sm:$0xff]  ;;  %vm851_vm12 = vcmask 261120  }
 0x2c5   :  { %v563_v19 = vsel %vm558_vm9, %v546_v41, %v3636_v0  ;;  %v564_v20 = vsel %vm558_vm9, %v547_v2, %v3637_v35  ;;  %v3647_v57 = vunpack.i.h.bf16 %v3645_v48  ;;  %v3646_v58 = vunpack.i.l.bf16 %v3645_v48 }
 0x2c6   :  { %v577_v27 = vpack.c.bf16 %v564_v20, %v563_v19  ;;  %967 = vperm.xlu1 %3602, %v920_v47   ;;  %v3650_v49 = vpop.permute.xlu0 %3649  ;;  %v3775_v19 = vld [vmem:[%s5924_s0 + $0x70] sm:$0xff] }
 0x2c7   :  { %v3652_v59 = vunpack.i.h.bf16 %v3650_v49  ;;  %v3651_v61 = vunpack.i.l.bf16 %v3650_v49  ;;  %v553_v17 = vsel %vm198_vm0, %v3770_v53, %v3647_v57  ;;  %v552_v25 = vsel %vm198_vm0, %v3771_v18, %v3646_v58  ;;  %v3776_v49 = vld [vmem:[%s5924_s0 + $0x68] sm:$0xff] }
 0x2c8   :  { %v3660_v11 = vpop.permute.xlu1 %3659  ;;  %964 = vperm.xlu0 %3601, %v919_v21   ;;  %3520 = vmatprep.mubr.msk.bf16.mxu1 %vm597_vm13, %v577_v27 }
 0x2c9   :  { %v3662_v14 = vunpack.i.h.bf16 %v3660_v11  ;;  %v3661_v15 = vunpack.i.l.bf16 %v3660_v11  ;;  %3521 = vmatmul.mubr.msk.bf16.gmra.mxu1 %vm597_vm13, %v578_v23  ;;  %v551_v32 = vsel %vm198_vm0, %v3772_v30, %v3652_v59  ;;  %v550_v33 = vsel %vm198_vm0, %v3773_v22, %v3651_v61  ;;  %v3777_v23 = vld [vmem:[%s5924_s0 + $0x60] sm:$0xff] }
 0x2ca   :  { %1247 = vperm.xlu1 %3602, %v1212_v50   ;;  %v3655_v16 = vpop.permute.xlu0 %3654 }
 0x2cb   :  { %v3657_v28 = vunpack.i.h.bf16 %v3655_v16  ;;  %v3656_v29 = vunpack.i.l.bf16 %v3655_v16  ;;  %v569_v8 = vsel %vm558_vm9, %v552_v25, %v3661_v15  ;;  %v570_v36 = vsel %vm558_vm9, %v553_v17, %v3662_v14 }
 0x2cc   :  { %v3665_v60 = vpop.permute.xlu1 %3664  ;;  %1244 = vperm.xlu0 %3601, %v1211_v51   ;;  %v580_v9 = vpack.c.bf16 %v570_v36, %v569_v8  ;;  %v1068_v14 = vsel %vm1052_vm14, 1, %v5941_v39  ;;  %v1216_v16 = vsel %vm1200_vm15, 1, %v5941_v39 }
 0x2cd   :  { %v567_v42 = vsel %vm558_vm9, %v550_v33, %v3656_v29  ;;  %v568_v40 = vsel %vm558_vm9, %v551_v32, %v3657_v28  ;;  %v3667_v12 = vunpack.i.h.bf16 %v3665_v60  ;;  %v3666_v13 = vunpack.i.l.bf16 %v3665_v60  ;;  %v3684_v33 = vld [vmem:[%s5929_s5 + $0x8] sm:$0xff]   ;;  %v3685_v60 = vld [vmem:[%s5929_s5] sm:$0xff]  }
 0x2ce   :  { %v579_v62 = vpack.c.bf16 %v568_v40, %v567_v42  ;;  %1253 = vperm.xlu1 %3602, %v1214_v4   ;;  %v3670_v47 = vpop.permute.xlu0 %3669  ;;  %v1215_v4 = vsel %vm1199_vm2, 1, %v5941_v39  ;;  %3558 = vmatprep.subr.bf16.mxu1 %v3684_v33 }
 0x2cf   :  { %v3672_v35 = vunpack.i.h.bf16 %v3670_v47  ;;  %v3671_v0 = vunpack.i.l.bf16 %v3670_v47  ;;  %v557_v48 = vsel %vm198_vm0, %v3774_v46, %v3667_v12  ;;  %v556_v20 = vsel %vm198_vm0, %v3775_v19, %v3666_v13  ;;  %3559 = vmatpush3.bf16.msra.mxu1 %v3684_v33  ;;  %v4578_v33 = vld [vmem:[%s5928_s4] ss:$0 sm:$0xff] }
 0x2d0   :  { %v3680_v1 = vpop.permute.xlu1 %3679  ;;  %1250 = vperm.xlu0 %3601, %v1213_v45   ;;  %3524 = vmatprep.mubr.msk.bf16.mxu1 %vm597_vm13, %v579_v62 }
 0x2d1   :  { %v3682_v5 = vunpack.i.h.bf16 %v3680_v1  ;;  %v3681_v2 = vunpack.i.l.bf16 %v3680_v1  ;;  %3525 = vmatmul.mubr.msk.bf16.gmra.mxu1 %vm597_vm13, %v580_v9  ;;  %v555_v50 = vsel %vm198_vm0, %v3776_v49, %v3672_v35  ;;  %v554_v57 = vsel %vm198_vm0, %v3777_v23, %v3671_v0  ;;  %3560 = vmatprep.subr.bf16.mxu1 %v3685_v60 }
 0x2d2   :  { %1110 = vperm.xlu1 %3602, %v1067_v63   ;;  %v3675_v41 = vpop.permute.xlu0 %3674  ;;  %vm1202_vm0 = vcmp.eq.s32.totalorder %v4066_v55, 3 }
 0x2d3   :  { %v3677_v21 = vunpack.i.h.bf16 %v3675_v41  ;;  %v3676_v27 = vunpack.i.l.bf16 %v3675_v41  ;;  %v573_v58 = vsel %vm558_vm9, %v556_v20, %v3681_v2  ;;  %v574_v59 = vsel %vm558_vm9, %v557_v48, %v3682_v5  ;;  %3561 = vmatpush3.bf16.msra.mxu1 %v3685_v60  ;;  %v3686_v48 = vld [vmem:[%s5930_s6 + $0x8] sm:$0xff]   ;;  %v3687_v20 = vld [vmem:[%s5930_s6] sm:$0xff]  }
 0x2d4   :  { %1107 = vperm.xlu0 %3601, %v1066_v6   ;;  %v582_v51 = vpack.c.bf16 %v574_v59, %v573_v58  ;;  %v1218_v53 = vsel %vm1202_vm0, 1, %v5941_v39  ;;  %3533 = vmatpush3.bf16.msra.mxu0 %v3686_v48 }
 0x2d5   :  { %v571_v61 = vsel %vm558_vm9, %v554_v57, %v3676_v27  ;;  %v572_v11 = vsel %vm558_vm9, %v555_v50, %v3677_v21  ;;  %vm1201_vm9 = vcmp.eq.s32.totalorder %v4109_v10, 3  ;;  %3534 = vmatprep.subr.bf16.mxu0 %v5939_v3 }
 0x2d6   :  { %v581_v15 = vpack.c.bf16 %v572_v11, %v571_v61  ;;  %1116 = vperm.xlu1 %3602, %v1069_v43   ;;  %v1217_v7 = vsel %vm1201_vm9, 1, %v5941_v39 }
 0x2d8   :  { %1113 = vperm.xlu0 %3601, %v1068_v14   ;;  %3528 = vmatprep.mubr.msk.bf16.mxu1 %vm597_vm13, %v581_v15 }
 0x2d9   :  { %3529 = vmatmul.mubr.msk.bf16.gmra.mxu1 %vm597_vm13, %v582_v51  ;;  %3535 = vmatpush3.bf16.msra.mxu0 %v3687_v20 }
 0x2da   :  { %1259 = vperm.xlu1 %3602, %v1216_v16  }
 0x2dc   :  { %1256 = vperm.xlu0 %3601, %v1215_v4  }
 0x2dd   :  { %v4468_v18 = vpop.permute.xlu1 %775 }
 0x2de   :  { %1265 = vperm.xlu1 %3602, %v1218_v53   ;;  %6096 = vst [vmem:[#allocation16_spill] sm:$0xff] %v4468_v18 }
 0x2df   :  { %v4464_v54 = vpop.permute.xlu0 %772 }
 0x2e0   :  { %1262 = vperm.xlu0 %3601, %v1217_v7   ;;  %6094 = vst [vmem:[#allocation14_spill] sm:$0xff] %v4464_v54  ;;  %vm6041_vm13 = vcmp.eq.s32.totalorder %v4464_v54, 1 }
 0x2e1   :  { %v4472_v25 = vpop.permute.xlu1 %781 }
 0x2e2   :  { %6098 = vst [vmem:[#allocation18_spill] sm:$0xff] %v4472_v25  ;;  %vm5983_vm3 = vcmp.eq.s32.totalorder %v4472_v25, 1 }
 0x2e3   :  { %v4466_v17 = vpop.permute.xlu0 %778 }
 0x2e4   :  { %6095 = vst [vmem:[#allocation15_spill] sm:$0xff] %v4466_v17  ;;  %vm5953_vm5 = vcmp.eq.s32.totalorder %v4466_v17, 1 }
 0x2e5   :  { %v4476_v10 = vpop.permute.xlu1 %787 }
 0x2e6   :  { %6100 = vst [vmem:[#allocation20_spill] sm:$0xff] %v4476_v10 }
 0x2e7   :  { %v4470_v55 = vpop.permute.xlu0 %784 }
 0x2e8   :  { %6097 = vst [vmem:[#allocation17_spill] sm:$0xff] %v4470_v55 }
 0x2e9   :  { %v4480_v30 = vpop.permute.xlu1 %793 }
 0x2ea   :  { %6102 = vst [vmem:[#allocation22_spill] sm:$0xff] %v4480_v30 }
 0x2eb   :  { %v4474_v28 = vpop.permute.xlu0 %790 }
 0x2ec   :  { %6099 = vst [vmem:[#allocation19_spill] sm:$0xff] %v4474_v28  ;;  %vm5991_vm0 = vcmp.eq.s32.totalorder %v4474_v28, 1 }
 0x2ed   :  { %v4484_v22 = vpop.permute.xlu1 %925 }
 0x2ee   :  { %6104 = vst [vmem:[#allocation24_spill] sm:$0xff] %v4484_v22 }
 0x2ef   :  { %v4478_v29 = vpop.permute.xlu0 %922 }
 0x2f0   :  { %6101 = vst [vmem:[#allocation21_spill] sm:$0xff] %v4478_v29  ;;  %vm5971_vm7 = vcmp.eq.s32.totalorder %v4478_v29, 1 }
 0x2f1   :  { %v4491_v36 = vpop.permute.xlu1 %931 }
 0x2f2   :  { %6106 = vst [vmem:[#allocation26_spill] sm:$0xff] %v4491_v36  ;;  %vm5982_vm14 = vcmp.eq.s32.totalorder %v4491_v36, 1 }
 0x2f3   :  { %v4482_v32 = vpop.permute.xlu0 %928 }
 0x2f4   :  { %6103 = vst [vmem:[#allocation23_spill] sm:$0xff] %v4482_v32  ;;  %vm5956_vm8 = vcmp.eq.s32.totalorder %v4482_v32, 1 }
 0x2f5   :  { %v4498_v40 = vpop.permute.xlu1 %937 }
 0x2f6   :  { %6108 = vst [vmem:[#allocation28_spill] sm:$0xff] %v4498_v40 }
 0x2f7   :  { %v4489_v8 = vpop.permute.xlu0 %934 }
 0x2f8   :  { %6105 = vst [vmem:[#allocation25_spill] sm:$0xff] %v4489_v8 }
 0x2f9   :  { %v4502_v62 = vpop.permute.xlu1 %943 }
 0x2fa   :  { %6110 = vst [vmem:[#allocation30_spill] sm:$0xff] %v4502_v62 }
 0x2fb   :  { %v4496_v42 = vpop.permute.xlu0 %940 }
 0x2fc   :  { %6107 = vst [vmem:[#allocation27_spill] sm:$0xff] %v4496_v42  ;;  %vm5992_vm9 = vcmp.eq.s32.totalorder %v4496_v42, 1 }
 0x2fd   :  { %v4506_v63 = vpop.permute.xlu1 %1074 }
 0x2fe   :  { %6112 = vst [vmem:[#allocation32_spill] sm:$0xff] %v4506_v63  ;;  %vm5988_vm1 = vcmp.eq.s32.totalorder %v4506_v63, 1 }
 0x2ff   :  { %v4500_v45 = vpop.permute.xlu0 %1071 }
 0x300   :  { %6109 = vst [vmem:[#allocation29_spill] sm:$0xff] %v4500_v45  ;;  %vm6040_vm15 = vcmp.eq.s32.totalorder %v4500_v45, 1 }
 0x301   :  { %v4510_v12 = vpop.permute.xlu1 %1080 }
 0x302   :  { %6114 = vst [vmem:[#allocation34_spill] sm:$0xff] %v4510_v12 }
 0x303   :  { %v4504_v47 = vpop.permute.xlu0 %1077 }
 0x304   :  { %6111 = vst [vmem:[#allocation31_spill] sm:$0xff] %v4504_v47 }
 0x305   :  { %v4514_v35 = vpop.permute.xlu1 %1086 }
 0x306   :  { %6116 = vst [vmem:[#allocation36_spill] sm:$0xff] %v4514_v35 }
 0x307   :  { %v4508_v9 = vpop.permute.xlu0 %1083 }
 0x308   :  { %6113 = vst [vmem:[#allocation33_spill] sm:$0xff] %v4508_v9 }
 0x309   :  { %v4518_v1 = vpop.permute.xlu1 %1092 }
 0x30a   :  { %6117 = vst [vmem:[#allocation37_spill] sm:$0xff] %v4518_v1 }
 0x30b   :  { %v4512_v13 = vpop.permute.xlu0 %1089 }
 0x30c   :  { %6115 = vst [vmem:[#allocation35_spill] sm:$0xff] %v4512_v13 }
 0x30d   :  { %v4522_v2 = vpop.permute.xlu1 %799 }
 0x30f   :  { %v4516_v0 = vpop.permute.xlu0 %796 }
 0x311   :  { %v4526_v41 = vpop.permute.xlu1 %805 }
 0x313   :  { %v4520_v5 = vpop.permute.xlu0 %802 }
 0x314   :  { %6118 = vst [vmem:[#allocation38_spill] sm:$0xff] %v4520_v5 }
 0x315   :  { %v4530_v46 = vpop.permute.xlu1 %949 }
 0x317   :  { %v4524_v6 = vpop.permute.xlu0 %946 }
 0x319   :  { %v4540_v21 = vpop.permute.xlu1 %955 }
 0x31a   :  { %6121 = vst [vmem:[#allocation41_spill] sm:$0xff] %v4540_v21 }
 0x31b   :  { %v4528_v43 = vpop.permute.xlu0 %952 }
 0x31c   :  { %6119 = vst [vmem:[#allocation39_spill] sm:$0xff] %v4528_v43 }
 0x31d   :  { %v4545_v49 = vpop.permute.xlu1 %1223 }
 0x31e   :  { %6123 = vst [vmem:[#allocation43_spill] sm:$0xff] %v4545_v49  ;;  %vm6009_vm2 = vcmp.eq.s32.totalorder %v4545_v49, 1 }
 0x31f   :  { %v4535_v19 = vpop.permute.xlu0 %1220 }
 0x320   :  { %6120 = vst [vmem:[#allocation40_spill] sm:$0xff] %v4535_v19  ;;  %vm5987_vm6 = vcmp.eq.s32.totalorder %v4535_v19, 1 }
 0x321   :  { %v4549_v23 = vpop.permute.xlu1 %1229 }
 0x322   :  { %6125 = vst [vmem:[#allocation45_spill] sm:$0xff] %v4549_v23  ;;  %vm5980_vm11 = vcmp.eq.s32.totalorder %v4549_v23, 1 }
 0x323   :  { %v4543_v27 = vpop.permute.xlu0 %1226 }
 0x324   :  { %6122 = vst [vmem:[#allocation42_spill] sm:$0xff] %v4543_v27  ;;  %vm5966_vm10 = vcmp.eq.s32.totalorder %v4543_v27, 1 }
 0x325   :  { %v4553_v58 = vpop.permute.xlu1 %1235 }
 0x326   :  { %6127 = vst [vmem:[#allocation47_spill] sm:$0xff] %v4553_v58 }
 0x327   :  { %v4547_v50 = vpop.permute.xlu0 %1232 }
 0x328   :  { %6124 = vst [vmem:[#allocation44_spill] sm:$0xff] %v4547_v50  ;;  %vm6001_vm4 = vcmp.eq.s32.totalorder %v4547_v50, 1 }
 0x329   :  { %v4557_v61 = vpop.permute.xlu1 %1241 }
 0x32a   :  { %6129 = vst [vmem:[#allocation49_spill] sm:$0xff] %v4557_v61 }
 0x32b   :  { %v4551_v57 = vpop.permute.xlu0 %1238 }
 0x32c   :  { %6126 = vst [vmem:[#allocation46_spill] sm:$0xff] %v4551_v57 }
 0x32d   :  { %v4561_v14 = vpop.permute.xlu1 %1098 }
 0x32f   :  { %v4555_v59 = vpop.permute.xlu0 %1095 }
 0x330   :  { %6128 = vst [vmem:[#allocation48_spill] sm:$0xff] %v4555_v59 }
 0x331   :  { %v4565_v51 = vpop.permute.xlu1 %1104 }
 0x332   :  { %6132 = vst [vmem:[#allocation52_spill] sm:$0xff] %v4565_v51 }
 0x333   :  { %v4559_v11 = vpop.permute.xlu0 %1101 }
 0x334   :  { %6130 = vst [vmem:[#allocation50_spill] sm:$0xff] %v4559_v11 }
 0x335   :  { %v4569_v4 = vpop.permute.xlu1 %811 }
 0x336   :  { %6134 = vst [vmem:[#allocation54_spill] sm:$0xff] %v4569_v4 }
 0x337   :  { %v4563_v15 = vpop.permute.xlu0 %808 }
 0x338   :  { %6131 = vst [vmem:[#allocation51_spill] sm:$0xff] %v4563_v15 }
 0x339   :  { %v4573_v7 = vpop.permute.xlu1 %817 }
 0x33a   :  { %6136 = vst [vmem:[#allocation56_spill] sm:$0xff] %v4573_v7 }
 0x33b   :  { %v4567_v16 = vpop.permute.xlu0 %814 }
 0x33c   :  { %6133 = vst [vmem:[#allocation53_spill] sm:$0xff] %v4567_v16 }
 0x33d   :  { %v4582_v20 = vpop.permute.xlu1 %961 }
 0x33e   :  { %6138 = vst [vmem:[#allocation58_spill] sm:$0xff] %v4582_v20 }
 0x33f   :  { %v4571_v53 = vpop.permute.xlu0 %958 }
 0x340   :  { %6135 = vst [vmem:[#allocation55_spill] sm:$0xff] %v4571_v53 }
 0x343   :  { %v4580_v60 = vpop.permute.xlu0 %964 }
 0x344   :  { %6137 = vst [vmem:[#allocation57_spill] sm:$0xff] %v4580_v60 }
 0x347   :  { %v4590_v34 = vpop.permute.xlu0 %1244 }
 0x34b   :  { %v4631_v20 = vpop.permute.xlu0 %1250 }
 0x34c   :  { %6140 = vst [vmem:[#allocation60_spill] sm:$0xff] %v4631_v20 }
 0x381   :  { %v3518_v48 = vpop.f32.mrf.mxu1 }
 0x382   :  { %v669_v3 = vadd.f32 %v3518_v48, %v4578_v33 }
 0x383   :  { %v660_v39 = vpop.f32.mrf.mxu1 }
 0x384   :  { %v4585_v38 = vmax.f32 %v669_v3, 0.0  ;;  %v661_v44 = vadd.f32 %v4578_v33, %v660_v39  ;;  %v4596_v3 = vpop.permute.xlu1 %967 }
 0x385   :  { %v3519_v37 = vpop.f32.mrf.mxu1  ;;  %6139 = vst [vmem:[#allocation59_spill] sm:$0xff] %v4596_v3 }
 0x386   :  { %v672_v39 = vadd.f32 %v3519_v37, %v4578_v33  ;;  %v837_v48 = vsel %vm5953_vm5, %v4585_v38, 0.0  ;;  %v4603_v24 = vmax.f32 %v661_v44, 0.0  ;;  %v987_v37 = vsel %vm5956_vm8, %v4585_v38, 0.0 }
 0x387   :  { %v663_v26 = vpop.f32.mrf.mxu1  ;;  %vm5965_vm5 = vcmp.eq.s32.totalorder %v4504_v47, 1  ;;  %v4623_v44 = vsel %vm851_vm12, %v837_v48, -inf  ;;  %v1285_v17 = vsel %vm5966_vm10, %v4585_v38, 0.0  ;;  %v4634_v4 = vsel %vm851_vm12, %v987_v37, -inf }
 0x388   :  { %v664_v56 = vadd.f32 %v4578_v33, %v663_v26  ;;  %v1136_v32 = vsel %vm5965_vm5, %v4585_v38, 0.0  ;;  %v726_v31 = vmax.f32 %v672_v39, 0.0  ;;  %v835_v3 = vsel %vm6041_vm13, %v4603_v24, 0.0  ;;  %v4646_v39 = vpop.permute.xlu1 %1247 }
 0x389   :  { %v3522_v52 = vpop.f32.mrf.mxu1  ;;  %v985_v48 = vsel %vm5971_vm7, %v4603_v24, 0.0  ;;  %vm6000_vm5 = vcmp.eq.s32.totalorder %v4470_v55, 1  ;;  %vm5998_vm10 = vcmp.eq.s32.totalorder %v4489_v8, 1  ;;  %vm5999_vm8 = vcmp.eq.s32.totalorder %v4508_v9, 1  ;;  %6141 = vst [vmem:[#allocation61_spill] sm:$0xff] %v4646_v39 }
 0x38a   :  { %v724_v47 = vmax.f32 %v664_v56, 0.0  ;;  %v1134_v37 = vsel %vm6040_vm15, %v4603_v24, 0.0  ;;  %v1283_v29 = vsel %vm5987_vm6, %v4603_v24, 0.0  ;;  %v838_v56 = vsel %vm5983_vm3, %v726_v31, 0.0 }
 0x38b   :  { %v676_v26 = vpop.f32.mrf.mxu1  ;;  %v685_v54 = vadd.f32 %v3522_v52, %v4578_v33  ;;  %v4658_v27 = vsel %vm851_vm12, %v1136_v32, -inf  ;;  %v988_v53 = vsel %vm5982_vm14, %v726_v31, 0.0  ;;  %vm6142_vm7 = vcmp.eq.s32.totalorder %v4510_v12, 1 }
 0x38c   :  { %v1137_v15 = vsel %vm6142_vm7, %v726_v31, 0.0  ;;  %v677_v45 = vadd.f32 %v4578_v33, %v676_v26  ;;  %v4666_v19 = vsel %vm851_vm12, %v1285_v17, -inf  ;;  %v4669_v25 = vsel %vm851_vm12, %v835_v3, -inf }
 0x38d   :  { %v3523_v7 = vpop.f32.mrf.mxu1  ;;  %v4672_v52 = vsel %vm851_vm12, %v985_v48, -inf  ;;  %v1286_v32 = vsel %vm5980_vm11, %v726_v31, 0.0  ;;  %v4677_v36 = vsel %vm851_vm12, %v1134_v37, -inf  ;;  %v4680_v12 = vsel %vm851_vm12, %v1283_v29, -inf  ;;  %v4699_v29 = vpop.permute.xlu0 %1107 }
 0x38e   :  { %v4683_v26 = vsel %vm851_vm12, %v838_v56, -inf  ;;  %vm6143_vm7 = vcmp.eq.s32.totalorder %v4468_v18, 1  ;;  %v4688_v16 = vsel %vm851_vm12, %v988_v53, -inf  ;;  %v4691_v48 = vsel %vm851_vm12, %v1137_v15, -inf  ;;  %6145 = vst [vmem:[#allocation62_spill] sm:$0xff] %v4699_v29 }
 0x38f   :  { %v679_v60 = vpop.f32.mrf.mxu1  ;;  %v836_v17 = vsel %vm6143_vm7, %v724_v47, 0.0  ;;  %vm6144_vm11 = vcmp.eq.s32.totalorder %v4484_v22, 1  ;;  %v4695_v23 = vmax.f32 %v685_v54, 0.0  ;;  %vm6008_vm14 = vcmp.eq.s32.totalorder %v4480_v30, 1  ;;  %v4712_v54 = vpop.permute.xlu1 %1253 }
 0x390   :  { %v986_v37 = vsel %vm6144_vm11, %v724_v47, 0.0  ;;  %vm6010_vm3 = vcmp.eq.s32.totalorder %v4502_v62, 1  ;;  %v4702_v56 = vsel %vm851_vm12, %v1286_v32, -inf  ;;  %v1402_v53 = vpack.c.bf16 %v726_v31, %v4585_v38  ;;  %6147 = vst [vmem:[#allocation64_spill] sm:$0xff] %v4712_v54 }
 0x391   :  { %v3526_v3 = vpop.f32.mrf.mxu1  ;;  %6146 = vst [vmem:[#allocation63_spill] sm:$0xff] %v4702_v56  ;;  %v4705_v18 = vmax.f32 %v677_v45, 0.0  ;;  %v1401_v15 = vpack.c.bf16 %v724_v47, %v4603_v24  ;;  %vm6039_vm11 = vcmp.eq.s32.totalorder %v4518_v1, 1  ;;  %vm6013_vm7 = vcmp.eq.s32.totalorder %v4557_v61, 1 }
 0x392   :  { %v4715_v22 = vsel %vm851_vm12, %v836_v17, -inf  ;;  %v1135_v32 = vsel %vm5988_vm1, %v724_v47, 0.0  ;;  %v841_v38 = vsel %vm5991_vm0, %v4695_v23, 0.0  ;;  %v991_v31 = vsel %vm5992_vm9, %v4695_v23, 0.0 }
 0x393   :  { %v4708_v39 = vpop.f32.mrf.mxu1  ;;  %v4726_v24 = vsel %vm851_vm12, %v986_v37, -inf  ;;  %v1284_v45 = vsel %vm6009_vm2, %v724_v47, 0.0  ;;  %vm6148_vm6 = vcmp.eq.s32.totalorder %v4512_v13, 1  ;;  %vm6149_vm1 = vcmp.eq.s32.totalorder %v4551_v57, 1  ;;  %3562 = vmatprep.mubr.msk.bf16.mxu1 %vm851_vm12, %v1401_v15  ;;  %v4790_v9 = vpop.permute.xlu1 %1110 }
 0x394   :  { %v1140_v17 = vsel %vm6148_vm6, %v4695_v23, 0.0  ;;  %v1289_v63 = vsel %vm6149_vm1, %v4695_v23, 0.0  ;;  %vm6020_vm0 = vcmp.eq.s32.totalorder %v4476_v10, 1  ;;  %vm6019_vm9 = vcmp.eq.s32.totalorder %v4498_v40, 1  ;;  %3563 = vmatmul.mubr.msk.bf16.vlgmr.msra.gmra.mxu1 %vm851_vm12, %v1402_v53  ;;  %6151 = vst [vmem:[#allocation66_spill] sm:$0xff] %v4790_v9 }
 0x395   :  { %v3527_v28 = vpop.f32.mrf.mxu1  ;;  %v4740_v37 = vsel %vm851_vm12, %v841_v38, -inf  ;;  %v4743_v47 = vsel %vm851_vm12, %v991_v31, -inf  ;;  %v688_v49 = vadd.f32 %v3523_v7, %v4578_v33  ;;  %v680_v13 = vadd.f32 %v4578_v33, %v679_v60 }
 0x396   :  { %vm6021_vm1 = vcmp.eq.s32.totalorder %v4514_v35, 1  ;;  %vm6022_vm6 = vcmp.eq.s32.totalorder %v4553_v58, 1  ;;  %v839_v15 = vsel %vm6000_vm5, %v4705_v18, 0.0  ;;  %v989_v38 = vsel %vm5998_vm10, %v4705_v18, 0.0 }
 0x397   :  { %v1138_v7 = vsel %vm5999_vm8, %v4705_v18, 0.0  ;;  %v1287_v60 = vsel %vm6001_vm4, %v4705_v18, 0.0  ;;  %v4763_v53 = vsel %vm851_vm12, %v1135_v32, -inf  ;;  %v4766_v31 = vsel %vm851_vm12, %v1140_v17, -inf  ;;  %v695_v57 = vpop.f32.mrf.mxu1  ;;  %v4778_v32 = vpop.permute.xlu0 %1113 }
 0x398   :  { %v4769_v55 = vsel %vm851_vm12, %v1289_v63, -inf  ;;  %v4772_v8 = vsel %vm851_vm12, %v839_v15, -inf  ;;  %vm6029_vm10 = vcmp.eq.s32.totalorder %v4520_v5, 1  ;;  %vm6027_vm8 = vcmp.eq.s32.totalorder %v4528_v43, 1  ;;  %6150 = vst [vmem:[#allocation65_spill] sm:$0xff] %v4778_v32 }
 0x399   :  { %vm6028_vm5 = vcmp.eq.s32.totalorder %v4559_v11, 1  ;;  %vm6033_vm4 = vcmp.eq.s32.totalorder %v4631_v20, 1  ;;  %v4781_v17 = vsel %vm851_vm12, %v1284_v45, -inf  ;;  %v4784_v63 = vsel %vm851_vm12, %v989_v38, -inf }
 0x39a   :  { %v4787_v15 = vsel %vm851_vm12, %v1138_v7, -inf  ;;  %v701_v50 = vadd.f32 %v3526_v3, %v4578_v33  ;;  %v4797_v32 = vsel %vm851_vm12, %v1287_v60, -inf  ;;  %v4799_v45 = vmax.f32 %v688_v49, 0.0  ;;  %v3530_v7 = vpop.f32.mrf.mxu1 }
 0x39b   :  { %6152 = vst [vmem:[#allocation67_spill] sm:$0xff] %v4797_v32  ;;  %v4807_v9 = vmax.f32 %v680_v13, 0.0  ;;  %vm977_vm2 = vcmp.eq.s32.totalorder %v4524_v6, 1  ;;  %v693_v1 = vadd.f32 %v4578_v33, %v4708_v39  ;;  %v704_v61 = vadd.f32 %v3527_v28, %v4578_v33  ;;  %v4852_v32 = vpop.permute.xlu1 %1116 }
 0x39c   :  { %v842_v49 = vsel %vm6008_vm14, %v4799_v45, 0.0  ;;  %v992_v38 = vsel %vm6010_vm3, %v4799_v45, 0.0  ;;  %v1141_v13 = vsel %vm6039_vm11, %v4799_v45, 0.0  ;;  %v1290_v60 = vsel %vm6013_vm7, %v4799_v45, 0.0  ;;  %6155 = vst [vmem:[#allocation70_spill] sm:$0xff] %v4852_v32  ;;  %v708_v11 = vpop.f32.mrf.mxu1 }
 0x39d   :  { %v4827_v42 = vmax.f32 %v701_v50, 0.0  ;;  %vm827_vm14 = vcmp.eq.s32.totalorder %v4516_v0, 1  ;;  %vm6046_vm3 = vcmp.eq.s32.totalorder %v4555_v59, 1  ;;  %v4833_v29 = vsel %vm851_vm12, %v842_v49, -inf  ;;  %v4842_v50 = vpop.permute.xlu0 %1256 }
 0x39e   :  { %v4836_v3 = vsel %vm851_vm12, %v992_v38, -inf  ;;  %vm6045_vm7 = vcmp.eq.s32.totalorder %v4590_v34, 1  ;;  %6154 = vst [vmem:[#allocation69_spill] sm:$0xff] %v4842_v50  ;;  %v840_v62 = vsel %vm6020_vm0, %v4807_v9, 0.0  ;;  %v990_v49 = vsel %vm6019_vm9, %v4807_v9, 0.0  ;;  %v3531_v59 = vpop.f32.mrf.mxu1 }
 0x39f   :  { %6153 = vst [vmem:[#allocation68_spill] sm:$0xff] %v4827_v42  ;;  %v696_v38 = vadd.f32 %v4578_v33, %v695_v57  ;;  %v717_v30 = vadd.f32 %v3530_v7, %v4578_v33  ;;  %v4855_v28 = vsel %vm851_vm12, %v1141_v13, -inf  ;;  %v4858_v39 = vsel %vm851_vm12, %v1290_v60, -inf }
 0x3a0   :  { %6156 = vst [vmem:[#allocation71_spill] sm:$0xff] %v4855_v28  ;;  %6157 = vst [vmem:[#allocation72_spill] sm:$0xff] %v4858_v39  ;;  %v1139_v10 = vsel %vm6021_vm1, %v4807_v9, 0.0  ;;  %v1288_v40 = vsel %vm6022_vm6, %v4807_v9, 0.0  ;;  %vm6043_vm9 = vcmp.eq.s32.totalorder %v4526_v41, 1  ;;  %vm6044_vm0 = vcmp.eq.s32.totalorder %v4540_v21, 1 }
 0x3a1   :  { %v4873_v60 = vsel %vm851_vm12, %v840_v62, -inf  ;;  %v4876_v13 = vsel %vm851_vm12, %v990_v49, -inf  ;;  %vm1129_vm1 = vcmp.eq.s32.totalorder %v4565_v51, 1  ;;  %vm6052_vm6 = vcmp.eq.s32.totalorder %v4712_v54, 1 }
 0x3a2   :  { %6158 = vst [vmem:[#allocation73_spill] sm:$0xff] %v4873_v60  ;;  %6159 = vst [vmem:[#allocation74_spill] sm:$0xff] %v4876_v13  ;;  %v845_v58 = vsel %vm6029_vm10, %v4827_v42, 0.0  ;;  %v995_v57 = vsel %vm6027_vm8, %v4827_v42, 0.0  ;;  %v1144_v62 = vsel %vm6028_vm5, %v4827_v42, 0.0  ;;  %v1293_v49 = vsel %vm6033_vm4, %v4827_v42, 0.0  ;;  %v4920_v60 = vpop.permute.xlu1 %1259 }
 0x3a3   :  { %v4897_v5 = vsel %vm851_vm12, %v1139_v10, -inf  ;;  %v4900_v43 = vsel %vm851_vm12, %v1288_v40, -inf  ;;  %vm6050_vm8 = vcmp.eq.s32.totalorder %v4522_v2, 1  ;;  %vm6051_vm5 = vcmp.eq.s32.totalorder %v4530_v46, 1  ;;  %v6160_v42 = vld [vmem:[#allocation61_spill] sm:$0xff]  ;;  %v4912_v40 = vpop.permute.xlu0 %1262  ;;  %6162 = vst [vmem:[#allocation75_spill] sm:$0xff] %v4920_v60 }
 0x3a4   :  { %vm6053_vm10 = vcmp.eq.s32.totalorder %v4561_v14, 1  ;;  %v868_v35 = vsel %vm851_vm12, %v845_v58, -inf  ;;  %v1017_v10 = vsel %vm851_vm12, %v995_v57, -inf  ;;  %vm6054_vm4 = vcmp.eq.s32.totalorder %v6160_v42, 1  ;;  %6161 = vst [vmem:[#allocation61_spill] sm:$0xff] %v4912_v40  ;;  %v6163_v13 = vld [vmem:[#allocation53_spill] sm:$0xff] }
 0x3a5   :  { %v1166_v39 = vsel %vm851_vm12, %v1144_v62, -inf  ;;  %v1315_v56 = vsel %vm851_vm12, %v1293_v49, -inf  ;;  %v4916_v28 = vmax.f32 %v693_v1, 0.0  ;;  %v1403_v20 = vpack.c.bf16 %v4807_v9, %v4705_v18  ;;  %v6164_v1 = vld [vmem:[#allocation57_spill] sm:$0xff] }
 0x3a6   :  { %v4926_v7 = vmax.f32 %v704_v61, 0.0  ;;  %v1404_v62 = vpack.c.bf16 %v4799_v45, %v4695_v23  ;;  %vm6059_vm11 = vcmp.eq.s32.totalorder %v6163_v13, 1  ;;  %vm6058_vm15 = vcmp.eq.s32.totalorder %v6164_v1, 1  ;;  %v6165_v49 = vld [vmem:[#allocation65_spill] sm:$0xff] }
 0x3a7   :  { %v6166_v18 = vmax.f32 %v4623_v44, %v4740_v37  ;;  %v843_v57 = vsel %vm827_vm14, %v4916_v28, 0.0  ;;  %v993_v61 = vsel %vm977_vm2, %v4916_v28, 0.0  ;;  %v1142_v23 = vsel %vm6046_vm3, %v4916_v28, 0.0  ;;  %3566 = vmatprep.mubr.msk.bf16.mxu1 %vm851_vm12, %v1403_v20 }
 0x3a8   :  { %vm6057_vm13 = vcmp.eq.s32.totalorder %v4912_v40, 1  ;;  %v6168_v37 = vmax.f32 %v4658_v27, %v4766_v31  ;;  %v1291_v20 = vsel %vm6045_vm7, %v4916_v28, 0.0  ;;  %3567 = vmatmul.mubr.msk.bf16.gmra.mxu1 %vm851_vm12, %v1404_v62  ;;  %v1162_v27 = vsel %vm851_vm12, %v1142_v23, -inf  ;;  %v6171_v23 = vld [vmem:[#allocation55_spill] sm:$0xff] }
 0x3a9   :  { %v4936_v9 = vmax.f32 %v6166_v18, %v868_v35  ;;  %v6167_v35 = vmax.f32 %v4634_v4, %v4743_v47  ;;  %v6169_v18 = vmax.f32 %v4666_v19, %v4769_v55  ;;  %v864_v4 = vsel %vm851_vm12, %v843_v57, -inf }
 0x3aa   :  { %v4957_v45 = vmax.f32 %v6168_v37, %v1166_v39  ;;  %v1013_v47 = vsel %vm851_vm12, %v993_v61, -inf  ;;  %v4971_v31 = vmax.f32 %v696_v38, 0.0  ;;  %v846_v55 = vsel %vm6043_vm9, %v4926_v7, 0.0  ;;  %v6170_v61 = vld [vmem:[#allocation51_spill] sm:$0xff] }
 0x3ab   :  { %v4952_v44 = vmax.f32 %v6167_v35, %v1017_v10  ;;  %v4962_v58 = vmax.f32 %v6169_v18, %v1315_v56  ;;  %v996_v19 = vsel %vm6044_vm0, %v4926_v7, 0.0  ;;  %v4979_v56 = vmax.f32 %v717_v30, 0.0  ;;  %v6172_v30 = vld [vmem:[#allocation62_spill] sm:$0xff] }
 0x3ac   :  { %v709_v39 = vadd.f32 %v4578_v33, %v708_v11  ;;  %v1311_v10 = vsel %vm851_vm12, %v1291_v20, -inf  ;;  %v1145_v57 = vsel %vm1129_vm1, %v4926_v7, 0.0  ;;  %v1294_v38 = vsel %vm6052_vm6, %v4926_v7, 0.0  ;;  %v4994_v11 = vpop.permute.xlu1 %1265 }
 0x3ad   :  { %v720_v62 = vadd.f32 %v3531_v59, %v4578_v33  ;;  %vm831_vm9 = vcmp.eq.s32.totalorder %v6170_v61, 1  ;;  %vm981_vm0 = vcmp.eq.s32.totalorder %v6171_v23, 1  ;;  %vm1130_vm7 = vcmp.eq.s32.totalorder %v6172_v30, 1  ;;  %6173 = vst [vmem:[#allocation53_spill] sm:$0xff] %v4994_v11 }
 0x3ae   :  { %vm1279_vm3 = vcmp.eq.s32.totalorder %v4842_v50, 1  ;;  %v6174_v35 = vmax.f32 %v4669_v25, %v4772_v8  ;;  %v6175_v18 = vmax.f32 %v4672_v52, %v4784_v63  ;;  %v6176_v59 = vmax.f32 %v4677_v36, %v4787_v15  ;;  %v6177_v36 = vld [vmem:[#allocation67_spill] sm:$0xff] }
 0x3af   :  { %v870_v51 = vsel %vm851_vm12, %v846_v55, -inf  ;;  %v1019_v21 = vsel %vm851_vm12, %v996_v19, -inf  ;;  %v844_v25 = vsel %vm6050_vm8, %v4971_v31, 0.0  ;;  %v994_v8 = vsel %vm6051_vm5, %v4971_v31, 0.0  ;;  %v6179_v55 = vld [vmem:[#allocation56_spill] sm:$0xff]  ;;  %v6180_v19 = vld [vmem:[#allocation59_spill] sm:$0xff] }
 0x3b0   :  { %v4999_v37 = vmax.f32 %v6174_v35, %v864_v4  ;;  %v5004_v20 = vmax.f32 %v6175_v18, %v1013_v47  ;;  %v5009_v54 = vmax.f32 %v6176_v59, %v1162_v27  ;;  %v1143_v52 = vsel %vm6053_vm10, %v4971_v31, 0.0 }
 0x3b1   :  { %v6178_v63 = vmax.f32 %v4680_v12, %v6177_v36  ;;  %v1168_v4 = vsel %vm851_vm12, %v1145_v57, -inf  ;;  %v1317_v47 = vsel %vm851_vm12, %v1294_v38, -inf  ;;  %v1292_v27 = vsel %vm6054_vm4, %v4971_v31, 0.0 }
 0x3b2   :  { %vm834_vm8 = vcmp.eq.s32.totalorder %v6179_v55, 1  ;;  %vm6075_vm5 = vcmp.eq.s32.totalorder %v6180_v19, 1  ;;  %vm6065_vm6 = vcmp.eq.s32.totalorder %v4852_v32, 1  ;;  %vm6064_vm10 = vcmp.eq.s32.totalorder %v4994_v11, 1  ;;  %v6284_v19 = vld [vmem:[#allocation38_spill] sm:$0xff]  ;;  %v6286_v55 = vld [vmem:[#allocation39_spill] sm:$0xff] }
 0x3b3   :  { %v5025_v15 = vmax.f32 %v6178_v63, %v1311_v10  ;;  %v6181_v12 = vmax.f32 %v4683_v26, %v4833_v29  ;;  %v866_v57 = vsel %vm851_vm12, %v844_v25, -inf  ;;  %v1015_v38 = vsel %vm851_vm12, %v994_v8, -inf  ;;  %v6184_v29 = vld [vmem:[#allocation71_spill] sm:$0xff] }
 0x3b4   :  { %v1164_v35 = vsel %vm851_vm12, %v1143_v52, -inf  ;;  %v6182_v18 = vmax.f32 %v4688_v16, %v4836_v3  ;;  %v849_v36 = vsel %vm6059_vm11, %v4979_v56, 0.0  ;;  %v999_v26 = vsel %vm6058_vm15, %v4979_v56, 0.0  ;;  %v6186_v16 = vld [vmem:[#allocation63_spill] sm:$0xff] }
 0x3b5   :  { %v871_v10 = vmax.f32 %v6181_v12, %v870_v51  ;;  %vm6183_vm4 = vcmp.eq.s32.totalorder %v6165_v49, 1  ;;  %v6185_v25 = vmax.f32 %v4691_v48, %v6184_v29  ;;  %v1313_v63 = vsel %vm851_vm12, %v1292_v27, -inf  ;;  %v6191_v48 = vld [vmem:[#allocation74_spill] sm:$0xff] }
 0x3b6   :  { %v5045_v59 = vmax.f32 %v6182_v18, %v1019_v21  ;;  %v1148_v51 = vsel %vm6183_vm4, %v4979_v56, 0.0  ;;  %v6187_v21 = vld [vmem:[#allocation72_spill] sm:$0xff]  ;;  %v1297_v12 = vsel %vm6057_vm13, %v4979_v56, 0.0  ;;  %v6189_v18 = vld [vmem:[#allocation73_spill] sm:$0xff]  ;;  %v876_v27 = vsel %vm851_vm12, %v849_v36, -inf }
 0x3b7   :  { %v5059_v8 = vmax.f32 %v6185_v25, %v1168_v4  ;;  %v6188_v3 = vmax.f32 %v6186_v16, %v6187_v21  ;;  %v6190_v49 = vmax.f32 %v4715_v22, %v6189_v18  ;;  %v6192_v4 = vmax.f32 %v4726_v24, %v6191_v48  ;;  %v6194_v24 = vld [vmem:[#allocation54_spill] sm:$0xff]  ;;  %v6198_v36 = vld [vmem:[#allocation68_spill] sm:$0xff] }
 0x3b8   :  { %v1025_v16 = vsel %vm851_vm12, %v999_v26, -inf  ;;  %v1174_v21 = vsel %vm851_vm12, %v1148_v51, -inf  ;;  %v1405_v22 = vpack.c.bf16 %v4971_v31, %v4916_v28  ;;  %vm6063_vm4 = vcmp.eq.s32.totalorder %v6194_v24, 1  ;;  %v6274_v24 = vld [vmem:[#allocation49_spill] sm:$0xff] }
 0x3b9   :  { %v5064_v52 = vmax.f32 %v6188_v3, %v1317_v47  ;;  %v5073_v1 = vmax.f32 %v6190_v49, %v866_v57  ;;  %v5078_v29 = vmax.f32 %v6192_v4, %v1015_v38  ;;  %v6193_v47 = vmax.f32 %v4763_v53, %v4897_v5  ;;  %v711_v49 = vpop.f32.mrf.mxu1  ;;  %v6195_v57 = vld [vmem:[#allocation58_spill] sm:$0xff] }
 0x3ba   :  { %v5088_v3 = vmax.f32 %v709_v39, 0.0  ;;  %vm6062_vm13 = vcmp.eq.s32.totalorder %v6195_v57, 1  ;;  %v6196_v38 = vld [vmem:[#allocation66_spill] sm:$0xff]  ;;  %vm6060_vm11 = vcmp.eq.s32.totalorder %v4920_v60, 1  ;;  %v6197_v5 = vmax.f32 %v4781_v17, %v4900_v43  ;;  %3570 = vmatprep.mubr.msk.bf16.mxu1 %vm851_vm12, %v1405_v22  ;;  %v6272_v57 = vld [vmem:[#allocation37_spill] sm:$0xff] }
 0x3bb   :  { %v5083_v25 = vmax.f32 %v6193_v47, %v1164_v35  ;;  %vm6061_vm15 = vcmp.eq.s32.totalorder %v6196_v38, 1  ;;  %v1323_v35 = vsel %vm851_vm12, %v1297_v12, -inf  ;;  %v738_v39 = vmax.f32 %v720_v62, 0.0  ;;  %v6268_v60 = vld [vmem:[#allocation22_spill] sm:$0xff] }
 0x3bc   :  { %v1314_v53 = vmax.f32 %v6197_v5, %v1313_v63  ;;  %v1406_v26 = vpack.c.bf16 %v4926_v7, %v6198_v36  ;;  %v847_v28 = vsel %vm831_vm9, %v5088_v3, 0.0  ;;  %v997_v31 = vsel %vm981_vm0, %v5088_v3, 0.0  ;;  %v6270_v38 = vld [vmem:[#allocation30_spill] sm:$0xff] }
 0x3bd   :  { %v1146_v51 = vsel %vm1130_vm7, %v5088_v3, 0.0  ;;  %v1295_v43 = vsel %vm1279_vm3, %v5088_v3, 0.0  ;;  %v877_v17 = vmax.f32 %v4936_v9, %v876_v27  ;;  %v1026_v7 = vmax.f32 %v4952_v44, %v1025_v16 }
 0x3be   :  { %v1175_v62 = vmax.f32 %v4957_v45, %v1174_v21  ;;  %v712_v63 = vadd.f32 %v4578_v33, %v711_v49  ;;  %3571 = vmatmul.mubr.msk.bf16.gmra.mxu1 %vm851_vm12, %v1406_v26  ;;  %v872_v12 = vsel %vm851_vm12, %v847_v28, -inf  ;;  %v1021_v18 = vsel %vm851_vm12, %v997_v31, -inf }
 0x3bf   :  { %v1170_v48 = vsel %vm851_vm12, %v1146_v51, -inf  ;;  %v1319_v4 = vsel %vm851_vm12, %v1295_v43, -inf  ;;  %v850_v47 = vsel %vm834_vm8, %v738_v39, 0.0  ;;  %v1000_v9 = vsel %vm6075_vm5, %v738_v39, 0.0 }
 0x3c0   :  { %v1149_v44 = vsel %vm6065_vm6, %v738_v39, 0.0  ;;  %v1298_v33 = vsel %vm6064_vm10, %v738_v39, 0.0  ;;  %v878_v45 = vsel %vm851_vm12, %v850_v47, -inf  ;;  %v1027_v27 = vsel %vm851_vm12, %v1000_v9, -inf }
 0x3c1   :  { %v1176_v16 = vsel %vm851_vm12, %v1149_v44, -inf  ;;  %v1325_v21 = vsel %vm851_vm12, %v1298_v33, -inf  ;;  %v1324_v22 = vmax.f32 %v4962_v58, %v1323_v35  ;;  %v873_v49 = vmax.f32 %v4999_v37, %v872_v12 }
 0x3c2   :  { %v1022_v5 = vmax.f32 %v5004_v20, %v1021_v18  ;;  %v879_v36 = vmax.f32 %v871_v10, %v878_v45  ;;  %v1171_v26 = vmax.f32 %v5009_v54, %v1170_v48  ;;  %v1320_v28 = vmax.f32 %v5025_v15, %v1319_v4 }
 0x3c3   :  { %v1028_v31 = vmax.f32 %v5045_v59, %v1027_v27  ;;  %v736_v51 = vmax.f32 %v712_v63, 0.0  ;;  %v1177_v47 = vmax.f32 %v5059_v8, %v1176_v16  ;;  %v1326_v9 = vmax.f32 %v5064_v52, %v1325_v21 }
 0x3c4   :  { %v881_v43 = vmax.f32 %v877_v17, %v879_v36  ;;  %v1408_v44 = vpack.c.bf16 %v738_v39, %v4979_v56  ;;  %vm6275_vm5 = vcmp.eq.s32.totalorder %v6274_v24, 1 }
 0x3c5   :  { %v848_v58 = vsel %vm6063_vm4, %v736_v51, 0.0  ;;  %v998_v37 = vsel %vm6062_vm13, %v736_v51, 0.0  ;;  %v1147_v54 = vsel %vm6061_vm15, %v736_v51, 0.0  ;;  %v1296_v20 = vsel %vm6060_vm11, %v736_v51, 0.0 }
 0x3c6   :  { %v874_v15 = vsel %vm851_vm12, %v848_v58, -inf  ;;  %v1023_v10 = vsel %vm851_vm12, %v998_v37, -inf  ;;  %v1172_v59 = vsel %vm851_vm12, %v1147_v54, -inf  ;;  %v1321_v56 = vsel %vm851_vm12, %v1296_v20, -inf }
 0x3c7   :  { %v875_v8 = vmax.f32 %v5073_v1, %v874_v15  ;;  %v1024_v52 = vmax.f32 %v5078_v29, %v1023_v10  ;;  %v1173_v35 = vmax.f32 %v5083_v25, %v1172_v59  ;;  %v1322_v39 = vmax.f32 %v1314_v53, %v1321_v56 }
 0x3c8   :  { %v1030_v17 = vmax.f32 %v1026_v7, %v1028_v31  ;;  %v1179_v63 = vmax.f32 %v1175_v62, %v1177_v47  ;;  %v1328_v12 = vmax.f32 %v1324_v22, %v1326_v9  ;;  %v1407_v18 = vpack.c.bf16 %v736_v51, %v5088_v3 }
 0x3c9   :  { %v880_v48 = vmax.f32 %v873_v49, %v875_v8  ;;  %v1029_v4 = vmax.f32 %v1022_v5, %v1024_v52  ;;  %v1178_v33 = vmax.f32 %v1171_v26, %v1173_v35  ;;  %v1327_v45 = vmax.f32 %v1320_v28, %v1322_v39  ;;  %v6201_v39 = vld [vmem:[#allocation6_spill] sm:$0xff] }
 0x3ca   :  { %3574 = vmatprep.mubr.msk.bf16.mxu1 %vm851_vm12, %v1407_v18  ;;  %v6199_v29 = vmov 0   ;;  %vm6067_vm11 = vcmask 1040384   ;;  %vm6066_vm15 = vcmask 1042432   ;;  %vm6200_vm13 = vcmask 1041408  }
 0x3cb   :  { %v882_v27 = vmax.f32 %v880_v48, %v881_v43  ;;  %v1031_v16 = vmax.f32 %v1029_v4, %v1030_v17  ;;  %v1180_v21 = vmax.f32 %v1178_v33, %v1179_v63  ;;  %v1329_v1 = vmax.f32 %v1327_v45, %v1328_v12  ;;  %3575 = vmatmul.mubr.msk.bf16.gmra.mxu1 %vm851_vm12, %v1408_v44  ;;  %vm6203_vm10 = vmmov %vm6200_vm13  ;;  %v6205_v33 = vld [vmem:[#allocation7_spill] sm:$0xff]  ;;  %v6207_v45 = vld [vmem:[#allocation8_spill] sm:$0xff] }
 0x3cc   :  { %2254 = vmatprep.mubr.bf16.mxu1 %v6199_v29  ;;  %vm6202_vm4 = vcmask 31744   ;;  %vm6204_vm6 = vmmov %vm6203_vm10 }
 0x3cd   :  { %v883_v25 = vrot.slane %v882_v27, 4  ;;  %v1032_v53 = vrot.slane %v1031_v16, 4  ;;  %v1181_v7 = vrot.slane %v1180_v21, 4  ;;  %v1330_v62 = vrot.slane %v1329_v1, 4 }
 0x3cf   :  { %v884_v22 = vmax.f32 %v882_v27, %v883_v25  ;;  %v1033_v3 = vmax.f32 %v1031_v16, %v1032_v53  ;;  %v1182_v49 = vmax.f32 %v1180_v21, %v1181_v7  ;;  %v1331_v5 = vmax.f32 %v1329_v1, %v1330_v62  ;;  %v6209_v27 = vld [vmem:[#allocation9_spill] sm:$0xff]  ;;  %v6211_v16 = vld [vmem:[#allocation10_spill] sm:$0xff]  ;;  %v6212_v21 = vld [vmem:[#allocation11_spill] sm:$0xff] }
 0x3d0   :  { %v6214_v1 = vld [vmem:[#allocation12_spill] sm:$0xff]  ;;  %v6216_v25 = vld [vmem:[#allocation13_spill] sm:$0xff] }
 0x3d1   :  { %v885_v36 = vrot.slane %v884_v22, 2  ;;  %v1034_v26 = vrot.slane %v1033_v3, 2  ;;  %v1183_v28 = vrot.slane %v1182_v49, 2  ;;  %v1332_v31 = vrot.slane %v1331_v5, 2  ;;  %v1927_v53 = vld [vmem:[%s5932_s8 + $0xc0] sm:$0xff] }
 0x3d2   :  { %v1931_v7 = vld [vmem:[%s5932_s8 + $0xe0] sm:$0xff] }
 0x3d3   :  { %v886_v51 = vmax.f32 %v884_v22, %v885_v36  ;;  %v1035_v43 = vmax.f32 %v1033_v3, %v1034_v26  ;;  %v1184_v47 = vmax.f32 %v1182_v49, %v1183_v28  ;;  %v1333_v9 = vmax.f32 %v1331_v5, %v1332_v31  ;;  %v1929_v22 = vld [vmem:[%s5932_s8 + $0xd0] sm:$0xff]  ;;  %v1919_v26 = vld [vmem:[%s5932_s8 + $0x80] sm:$0xff] }
 0x3d4   :  { %v3252_v62 = vcombine.high %v1927_v53, %v1931_v7  ;;  %v1933_v3 = vld [vmem:[%s5932_s8 + $0xf0] sm:$0xff]  ;;  %v3251_v49 = vcombine.low %v1927_v53, %v1931_v7  ;;  %v1923_v28 = vld [vmem:[%s5932_s8 + $0xa0] sm:$0xff] }
 0x3d5   :  { %v887_v58 = vrot.slane %v886_v51, 1  ;;  %v1036_v44 = vrot.slane %v1035_v43, 1  ;;  %v1185_v37 = vrot.slane %v1184_v47, 1  ;;  %v1334_v54 = vrot.slane %v1333_v9, 1 }
 0x3d6   :  { %v3256_v5 = vcombine.high %v1929_v22, %v1933_v3  ;;  %v3255_v36 = vcombine.low %v1929_v22, %v1933_v3  ;;  %v3244_v31 = vcombine.high %v1919_v26, %v1923_v28  ;;  %v5255_v22 = vld [vmem:[%s5931_s7] ss:$0 sm:$0xff] }
 0x3d7   :  { %v888_v20 = vmax.f32 %v886_v51, %v887_v58  ;;  %v1037_v15 = vmax.f32 %v1035_v43, %v1036_v44  ;;  %v1186_v10 = vmax.f32 %v1184_v47, %v1185_v37  ;;  %v1335_v59 = vmax.f32 %v1333_v9, %v1334_v54  ;;  %v1921_v51 = vld [vmem:[%s5932_s8 + $0x90] sm:$0xff]  ;;  %v1911_v44 = vld [vmem:[%s5932_s8 + $0x40] sm:$0xff] }
 0x3d8   :  { %2230 = vmatprep.subr.bf16.mxu1 %v3256_v5  ;;  %v1925_v43 = vld [vmem:[%s5932_s8 + $0xb0] sm:$0xff]  ;;  %v3243_v47 = vcombine.low %v1919_v26, %v1923_v28  ;;  %v1915_v37 = vld [vmem:[%s5932_s8 + $0x60] sm:$0xff] }
 0x3d9   :  { %v1337_v56 = vsel %vm6067_vm11, %v888_v20, %v1037_v15  ;;  %vm6213_vm11 = vmmov %vm6202_vm4  ;;  %2231 = vmatpush1.bf16.msra.mxu1 %v3255_v36  ;;  %v3248_v9 = vcombine.high %v1921_v51, %v1925_v43  ;;  %v3247_v58 = vcombine.low %v1921_v51, %v1925_v43  ;;  %v3236_v54 = vcombine.high %v1911_v44, %v1915_v37  ;;  %v1913_v20 = vld [vmem:[%s5932_s8 + $0x50] sm:$0xff] }
 0x3da   :  { %v1338_v8 = vsel %vm6200_vm13, %v1337_v56, %v1186_v10  ;;  %vm6206_vm13 = vmmov %vm6202_vm4  ;;  %v1917_v15 = vld [vmem:[%s5932_s8 + $0x70] sm:$0xff]  ;;  %v3235_v10 = vcombine.low %v1911_v44, %v1915_v37 }
 0x3db   :  { %v1340_v52 = vsel %vm6066_vm15, %v1338_v8, %v1335_v59  ;;  %vm6208_vm15 = vmmov %vm6202_vm4  ;;  %2232 = vmatprep.subr.bf16.mxu1 %v3248_v9  ;;  %v3240_v59 = vcombine.high %v1913_v20, %v1917_v15  ;;  %v3239_v56 = vcombine.low %v1913_v20, %v1917_v15  ;;  %v1903_v8 = vld [vmem:[%s5932_s8] sm:$0xff] }
 0x3dc   :  { %v1341_v35 = vpack.c.bf16 %v1340_v52, %v1340_v52  ;;  %v1907_v52 = vld [vmem:[%s5932_s8 + $0x20] sm:$0xff] }
 0x3dd   :  { %2233 = vmatpush1.bf16.msra.mxu1 %v3247_v58 }
 0x3de   :  { %3537 = vmatmul.mubr.msk.bf16.vlgmr.msra.gmra.mxu0 %vm851_vm12, %v1341_v35  ;;  %vm6210_vm12 = vmmov %vm6202_vm4  ;;  %2234 = vmatprep.subr.bf16.mxu1 %v3240_v59  ;;  %v3227_v35 = vcombine.low %v1903_v8, %v1907_v52 }
 0x3df   :  { %3542 = vmatprep.mubr.msk.bf16.mxu0 %vm6202_vm4, %v6201_v39  ;;  %v3228_v39 = vcombine.high %v1903_v8, %v1907_v52 }
 0x3e1   :  { %2235 = vmatpush1.bf16.msra.mxu1 %v3239_v56  ;;  %v6222_v56 = vld [vmem:[#allocation23_spill] sm:$0xff] }
 0x49e   :  { %v1395_v17 = vpop.f32.mrf.mxu0 }
 0x49f   :  { %v1413_v63 = vpack.c.bf16 %v1395_v17, %v1395_v17  ;;  %v1905_v17 = vld [vmem:[%s5932_s8 + $0x10] sm:$0xff] }
 0x4a0   :  { %v3538_v12 = vpop.f32.mrf.mxu0 }
 0x4a1   :  { %v1415_v18 = vsel %vm6203_vm10, %v1413_v63, 0  ;;  %3592 = vmatprep.subr.msk.bf16.mxu0 %vm6204_vm6, %v1413_v63  ;;  %vm6215_vm10 = vmmov %vm6202_vm4  ;;  %v1909_v63 = vld [vmem:[%s5932_s8 + $0x30] sm:$0xff]  ;;  %v5238_v12 = vld [vmem:[%s5932_s8 + $0xc8] sm:$0xff] }
 0x4a2   :  { %v1398_v48 = vpop.f32.mrf.mxu0  ;;  %3541 = vmatpush3.bf16.msra.mxu0 %v1415_v18  ;;  %vm6217_vm6 = vmmov %vm6202_vm4  ;;  %6218 = vst [vmem:[#allocation67_spill] sm:$0xff] %v5238_v12  ;;  %v3231_v18 = vcombine.low %v1905_v17, %v1909_v63 }
 0x4a3   :  { %2148 = vmatprep.subr.bf16.mxu0 %v3252_v62  ;;  %v3232_v48 = vcombine.high %v1905_v17, %v1909_v63  ;;  %v6224_v17 = vld [vmem:[#allocation31_spill] sm:$0xff] }
 0x4a4   :  { %v3539_v4 = vpop.f32.mrf.mxu0 }
 0x4a5   :  { %3543 = vmatmul.mubr.msk.bf16.vlgmr.msra.gmra.mxu0 %vm6206_vm13, %v6205_v33  ;;  %v5243_v4 = vld [vmem:[%s5932_s8 + $0xe8] sm:$0xff]  ;;  %2236 = vmatprep.subr.bf16.mxu1 %v3232_v48  ;;  %vm6223_vm13 = vcmp.eq.s32.totalorder %v6222_v56, 1 }
 0x4a6   :  { %3546 = vmatprep.mubr.msk.bf16.mxu0 %vm6208_vm15, %v6207_v45  ;;  %2149 = vmatpush1.bf16.msra.mxu0 %v3251_v49  ;;  %6219 = vst [vmem:[#allocation71_spill] sm:$0xff] %v5243_v4  ;;  %v3254_v45 = vcombine.high %v5238_v12, %v5243_v4  ;;  %v6266_v4 = vld [vmem:[#allocation44_spill] sm:$0xff] }
 0x4a7   :  { %2150 = vmatprep.subr.bf16.mxu0 %v3244_v31  ;;  %2237 = vmatpush1.bf16.msra.mxu1 %v3231_v18 }
 0x4aa   :  { %2151 = vmatpush1.bf16.msra.mxu0 %v3243_v47 }
 0x4ab   :  { %2152 = vmatprep.subr.bf16.mxu0 %v3236_v54 }
 0x4ad   :  { %3547 = vmatmul.mubr.msk.bf16.gmra.mxu0 %vm6210_vm12, %v6209_v27  ;;  %v3564_v27 = vpop.f32.mrf.mxu1  ;;  %vm6225_vm12 = vcmp.eq.s32.totalorder %v6224_v17, 1 }
 0x4ae   :  { %3550 = vmatprep.mubr.msk.bf16.mxu0 %vm6202_vm4, %v6211_v16  ;;  %2153 = vmatpush1.bf16.msra.mxu0 %v3235_v10  ;;  %v6220_v10 = vld [vmem:[#allocation15_spill] sm:$0xff] }
 0x4af   :  { %2154 = vmatprep.subr.bf16.mxu0 %v3228_v39  ;;  %v1584_v16 = vpop.f32.mrf.mxu1  ;;  %vm6221_vm15 = vcmp.eq.s32.totalorder %v6220_v10, 1 }
 0x4b2   :  { %2155 = vmatpush1.bf16.msra.mxu0 %v3227_v35 }
 0x4b3   :  { %2189 = vmatprep.subr.bf16.mxu0 %v3254_v45 }
 0x4b5   :  { %3551 = vmatmul.mubr.msk.bf16.gmra.mxu0 %vm6213_vm11, %v6212_v21  ;;  %v3565_v21 = vpop.f32.mrf.mxu1  ;;  %vm1702_vm11 = vcmask 523264  }
 0x4b6   :  { %3554 = vmatprep.mubr.msk.bf16.mxu0 %vm6215_vm10, %v6214_v1  ;;  %v3688_v1 = vld [vmem:[%s5934_s10 + $0x78] sm:$0xff]  }
 0x4b7   :  { %3383 = vmatprep.subr.bf16.mxu1 %v3688_v1  ;;  %v6228_v1 = vld [vmem:[#allocation14_spill] sm:$0xff] }
 0x4b8   :  { %vm6229_vm10 = vcmp.eq.s32.totalorder %v6228_v1, 1 }
 0x4bd   :  { %3555 = vmatmul.mubr.msk.bf16.gmra.mxu0 %vm6217_vm6, %v6216_v25  ;;  %v1587_v25 = vpop.f32.mrf.mxu1 }
 0x4be   :  { %2172 = vmatprep.mubr.bf16.mxu0 %v6199_v29 }
 0x4bf   :  { %v3568_v53 = vpop.f32.mrf.mxu1 }
 0x4c1   :  { %v1600_v5 = vpop.f32.mrf.mxu1 }
 0x4c3   :  { %v3569_v43 = vpop.f32.mrf.mxu1 }
 0x4c5   :  { %v1603_v15 = vpop.f32.mrf.mxu1 }
 0x565   :  { %v3544_v7 = vpop.f32.mrf.mxu0 }
 0x566   :  { %v1593_v62 = vadd.f32 %v3564_v27, %v3544_v7  ;;  %v6230_v7 = vld [vmem:[#allocation21_spill] sm:$0xff] }
 0x567   :  { %v1451_v3 = vpop.f32.mrf.mxu0  ;;  %vm6231_vm6 = vcmp.eq.s32.totalorder %v6230_v7, 1 }
 0x568   :  { %v1585_v49 = vadd.f32 %v1584_v16, %v1451_v3  ;;  %v1656_v36 = vadd.f32 %v5255_v22, %v1593_v62  ;;  %v6226_v16 = vld [vmem:[#allocation42_spill] sm:$0xff]  ;;  %v6232_v3 = vld [vmem:[#allocation29_spill] sm:$0xff] }
 0x569   :  { %v3545_v26 = vpop.f32.mrf.mxu0  ;;  %vm6227_vm4 = vcmp.eq.s32.totalorder %v6226_v16, 1 }
 0x56a   :  { %v1596_v28 = vadd.f32 %v3565_v21, %v3545_v26  ;;  %v1654_v51 = vadd.f32 %v5255_v22, %v1585_v49  ;;  %v1672_v47 = vmax.f32 %v1656_v36, 0.0  ;;  %v6234_v36 = vld [vmem:[#allocation40_spill] sm:$0xff] }
 0x56b   :  { %v1454_v31 = vpop.f32.mrf.mxu0 }
 0x56c   :  { %v1657_v58 = vadd.f32 %v5255_v22, %v1596_v28  ;;  %v1588_v37 = vadd.f32 %v1587_v25, %v1454_v31  ;;  %v1670_v20 = vmax.f32 %v1654_v51, 0.0  ;;  %v1688_v59 = vsel %vm6221_vm15, %v1672_v47, 0.0  ;;  %v6236_v51 = vld [vmem:[#allocation18_spill] sm:$0xff] }
 0x56d   :  { %v3548_v9 = vpop.f32.mrf.mxu0  ;;  %v1742_v8 = vsel %vm6223_vm13, %v1672_v47, 0.0  ;;  %v1795_v63 = vsel %vm6225_vm12, %v1672_v47, 0.0  ;;  %v5269_v45 = vsel %vm1702_vm11, %v1688_v59, -inf  ;;  %v1848_v21 = vsel %vm6227_vm4, %v1672_v47, 0.0 }
 0x56e   :  { %v1609_v44 = vadd.f32 %v3568_v53, %v3548_v9  ;;  %v1673_v35 = vmax.f32 %v1657_v58, 0.0  ;;  %v1655_v18 = vadd.f32 %v5255_v22, %v1588_v37  ;;  %v5272_v27 = vsel %vm1702_vm11, %v1742_v8, -inf  ;;  %v3572_v53 = vpop.f32.mrf.mxu1  ;;  %v6238_v58 = vld [vmem:[#allocation26_spill] sm:$0xff] }
 0x56f   :  { %v1467_v54 = vpop.f32.mrf.mxu0  ;;  %v1686_v25 = vsel %vm6229_vm10, %v1670_v20, 0.0  ;;  %v1740_v62 = vsel %vm6231_vm6, %v1670_v20, 0.0  ;;  %vm6233_vm15 = vcmp.eq.s32.totalorder %v6232_v3, 1  ;;  %vm6235_vm13 = vcmp.eq.s32.totalorder %v6234_v36, 1 }
 0x570   :  { %v1660_v39 = vadd.f32 %v5255_v22, %v1609_v44  ;;  %v1793_v49 = vsel %vm6233_vm15, %v1670_v20, 0.0  ;;  %v1846_v26 = vsel %vm6235_vm13, %v1670_v20, 0.0  ;;  %v1601_v28 = vadd.f32 %v1600_v5, %v1467_v54  ;;  %v1616_v17 = vpop.f32.mrf.mxu1 }
 0x571   :  { %v3549_v52 = vpop.f32.mrf.mxu0  ;;  %vm6237_vm12 = vcmp.eq.s32.totalorder %v6236_v51, 1  ;;  %vm6239_vm4 = vcmp.eq.s32.totalorder %v6238_v58, 1  ;;  %v5289_v10 = vsel %vm1702_vm11, %v1795_v63, -inf  ;;  %v5292_v59 = vsel %vm1702_vm11, %v1848_v21, -inf }
 0x572   :  { %v1689_v9 = vsel %vm6237_vm12, %v1673_v35, 0.0  ;;  %v1743_v47 = vsel %vm6239_vm4, %v1673_v35, 0.0  ;;  %v1676_v44 = vmax.f32 %v1660_v39, 0.0  ;;  %v1612_v37 = vadd.f32 %v3569_v43, %v3549_v52  ;;  %v6240_v43 = vld [vmem:[#allocation34_spill] sm:$0xff]  ;;  %v3573_v29 = vpop.f32.mrf.mxu1 }
 0x573   :  { %v1470_v48 = vpop.f32.mrf.mxu0  ;;  %v5295_v56 = vsel %vm1702_vm11, %v1686_v25, -inf  ;;  %v1671_v20 = vmax.f32 %v1655_v18, 0.0  ;;  %v5298_v54 = vsel %vm1702_vm11, %v1740_v62, -inf  ;;  %v5301_v8 = vsel %vm1702_vm11, %v1793_v49, -inf  ;;  %v6242_v18 = vld [vmem:[#allocation45_spill] sm:$0xff]  ;;  %v6244_v25 = vld [vmem:[#allocation19_spill] sm:$0xff] }
 0x574   :  { %v5304_v39 = vsel %vm1702_vm11, %v1846_v26, -inf  ;;  %vm6241_vm10 = vcmp.eq.s32.totalorder %v6240_v43, 1  ;;  %v5309_v63 = vsel %vm1702_vm11, %v1689_v9, -inf  ;;  %v5312_v16 = vsel %vm1702_vm11, %v1743_v47, -inf  ;;  %v6246_v62 = vld [vmem:[#allocation27_spill] sm:$0xff]  ;;  %v6250_v9 = vld [vmem:[#allocation16_spill] sm:$0xff] }
 0x575   :  { %v3552_v31 = vpop.f32.mrf.mxu0  ;;  %v1796_v52 = vsel %vm6241_vm10, %v1673_v35, 0.0  ;;  %vm6243_vm6 = vcmp.eq.s32.totalorder %v6242_v18, 1  ;;  %v1658_v1 = vadd.f32 %v5255_v22, %v1601_v28  ;;  %vm6245_vm15 = vcmp.eq.s32.totalorder %v6244_v25, 1  ;;  %v6248_v49 = vld [vmem:[#allocation35_spill] sm:$0xff]  ;;  %v6254_v18 = vld [vmem:[#allocation32_spill] sm:$0xff] }
 0x576   :  { %v1849_v21 = vsel %vm6243_vm6, %v1673_v35, 0.0  ;;  %v1692_v7 = vsel %vm6245_vm15, %v1676_v44, 0.0  ;;  %vm6247_vm13 = vcmp.eq.s32.totalorder %v6246_v62, 1  ;;  %vm6249_vm12 = vcmp.eq.s32.totalorder %v6248_v49, 1  ;;  %v6252_v35 = vld [vmem:[#allocation24_spill] sm:$0xff]  ;;  %v6256_v62 = vld [vmem:[#allocation43_spill] sm:$0xff] }
 0x577   :  { %v1483_v5 = vpop.f32.mrf.mxu0  ;;  %v1746_v3 = vsel %vm6247_vm13, %v1676_v44, 0.0  ;;  %v1799_v36 = vsel %vm6249_vm12, %v1676_v44, 0.0  ;;  %v1661_v26 = vadd.f32 %v5255_v22, %v1612_v37  ;;  %v5325_v51 = vsel %vm1702_vm11, %v1796_v52, -inf  ;;  %v6258_v37 = vld [vmem:[#allocation46_spill] sm:$0xff] }
 0x578   :  { %vm6251_vm4 = vcmp.eq.s32.totalorder %v6250_v9, 1  ;;  %vm6253_vm10 = vcmp.eq.s32.totalorder %v6252_v35, 1  ;;  %v1604_v47 = vadd.f32 %v1603_v15, %v1470_v48  ;;  %vm6255_vm6 = vcmp.eq.s32.totalorder %v6254_v18, 1 }
 0x579   :  { %v1687_v58 = vsel %vm6251_vm4, %v1671_v20, 0.0  ;;  %v1741_v28 = vsel %vm6253_vm10, %v1671_v20, 0.0  ;;  %v3553_v43 = vpop.f32.mrf.mxu0  ;;  %v1794_v25 = vsel %vm6255_vm6, %v1671_v20, 0.0  ;;  %vm6257_vm15 = vcmp.eq.s32.totalorder %v6256_v62, 1 }
 0x57a   :  { %v1847_v49 = vsel %vm6257_vm15, %v1671_v20, 0.0  ;;  %v5336_v33 = vsel %vm1702_vm11, %v1692_v7, -inf  ;;  %vm6259_vm13 = vcmp.eq.s32.totalorder %v6258_v37, 1  ;;  %v5341_v9 = vsel %vm1702_vm11, %v1746_v3, -inf }
 0x57b   :  { %v1852_v52 = vsel %vm6259_vm13, %v1676_v44, 0.0  ;;  %v5344_v35 = vsel %vm1702_vm11, %v1799_v36, -inf  ;;  %v1674_v15 = vmax.f32 %v1658_v1, 0.0  ;;  %v1625_v48 = vadd.f32 %v3572_v53, %v3552_v31  ;;  %v1486_v31 = vpop.f32.mrf.mxu0  ;;  %v6264_v1 = vld [vmem:[#allocation33_spill] sm:$0xff] }
 0x57c   :  { %v5347_v18 = vsel %vm1702_vm11, %v1849_v21, -inf  ;;  %v5350_v20 = vsel %vm1702_vm11, %v1687_v58, -inf  ;;  %v5353_v7 = vsel %vm1702_vm11, %v1741_v28, -inf  ;;  %v1677_v62 = vmax.f32 %v1661_v26, 0.0  ;;  %v6260_v26 = vld [vmem:[#allocation17_spill] sm:$0xff] }
 0x57d   :  { %v5356_v44 = vsel %vm1702_vm11, %v1794_v25, -inf  ;;  %v5359_v3 = vsel %vm1702_vm11, %v1847_v49, -inf  ;;  %v5364_v53 = vsel %vm1702_vm11, %v1852_v52, -inf  ;;  %vm6261_vm12 = vcmp.eq.s32.totalorder %v6260_v26, 1  ;;  %v1619_v25 = vpop.f32.mrf.mxu1  ;;  %v6262_v49 = vld [vmem:[#allocation25_spill] sm:$0xff]  ;;  %v3556_v11 = vpop.f32.mrf.mxu0 }
 0x57e   :  { %v1690_v58 = vsel %vm6261_vm12, %v1674_v15, 0.0  ;;  %v1659_v28 = vadd.f32 %v5255_v22, %v1604_v47  ;;  %vm6263_vm4 = vcmp.eq.s32.totalorder %v6262_v49, 1  ;;  %vm6265_vm10 = vcmp.eq.s32.totalorder %v6264_v1, 1 }
 0x57f   :  { %v1744_v37 = vsel %vm6263_vm4, %v1674_v15, 0.0  ;;  %v1797_v52 = vsel %vm6265_vm10, %v1674_v15, 0.0  ;;  %vm6267_vm6 = vcmp.eq.s32.totalorder %v6266_v4, 1  ;;  %v1664_v21 = vadd.f32 %v5255_v22, %v1625_v48 }
 0x580   :  { %v1850_v12 = vsel %vm6267_vm6, %v1674_v15, 0.0  ;;  %vm6269_vm15 = vcmp.eq.s32.totalorder %v6268_v60, 1  ;;  %vm6271_vm13 = vcmp.eq.s32.totalorder %v6270_v38, 1  ;;  %vm6273_vm12 = vcmp.eq.s32.totalorder %v6272_v57, 1 }
 0x581   :  { %v1693_v36 = vsel %vm6269_vm15, %v1677_v62, 0.0  ;;  %v1747_v26 = vsel %vm6271_vm13, %v1677_v62, 0.0  ;;  %v1800_v47 = vsel %vm6273_vm12, %v1677_v62, 0.0  ;;  %v1853_v49 = vsel %vm6275_vm5, %v1677_v62, 0.0  ;;  %v3576_v62 = vpop.f32.mrf.mxu1 }
 0x582   :  { %v5391_v4 = vsel %vm1702_vm11, %v1690_v58, -inf  ;;  %v1617_v15 = vadd.f32 %v1616_v17, %v1483_v5  ;;  %v1628_v48 = vadd.f32 %v3573_v29, %v3553_v43  ;;  %v5394_v60 = vsel %vm1702_vm11, %v1744_v37, -inf  ;;  %v6282_v43 = vld [vmem:[#allocation47_spill] sm:$0xff] }
 0x583   :  { %v5397_v38 = vsel %vm1702_vm11, %v1797_v52, -inf  ;;  %v5400_v57 = vsel %vm1702_vm11, %v1850_v12, -inf  ;;  %v5403_v24 = vsel %vm1702_vm11, %v1693_v36, -inf  ;;  %v5406_v1 = vsel %vm1702_vm11, %v1747_v26, -inf  ;;  %v6278_v52 = vld [vmem:[#allocation28_spill] sm:$0xff] }
 0x584   :  { %v5409_v5 = vsel %vm1702_vm11, %v1800_v47, -inf  ;;  %v5412_v29 = vsel %vm1702_vm11, %v1853_v49, -inf  ;;  %v1675_v17 = vmax.f32 %v1659_v28, 0.0  ;;  %v1680_v58 = vmax.f32 %v1664_v21, 0.0  ;;  %v1499_v49 = vpop.f32.mrf.mxu0  ;;  %v6276_v21 = vld [vmem:[#allocation20_spill] sm:$0xff] }
 0x585   :  { %v1620_v12 = vadd.f32 %v1619_v25, %v1486_v31  ;;  %v1641_v37 = vadd.f32 %v3576_v62, %v3556_v11  ;;  %vm6277_vm5 = vcmp.eq.s32.totalorder %v6276_v21, 1  ;;  %v1632_v62 = vpop.f32.mrf.mxu1  ;;  %vm6279_vm4 = vcmp.eq.s32.totalorder %v6278_v52, 1  ;;  %v6280_v36 = vld [vmem:[#allocation36_spill] sm:$0xff]  ;;  %v6288_v21 = vld [vmem:[#allocation50_spill] sm:$0xff] }
 0x586   :  { %v1691_v25 = vsel %vm6277_vm5, %v1675_v17, 0.0  ;;  %v1745_v26 = vsel %vm6279_vm4, %v1675_v17, 0.0  ;;  %vm6281_vm10 = vcmp.eq.s32.totalorder %v6280_v36, 1  ;;  %vm6283_vm6 = vcmp.eq.s32.totalorder %v6282_v43, 1  ;;  %v6290_v36 = vld [vmem:[#allocation60_spill] sm:$0xff] }
 0x587   :  { %v1798_v47 = vsel %vm6281_vm10, %v1675_v17, 0.0  ;;  %v1851_v32 = vsel %vm6283_vm6, %v1675_v17, 0.0  ;;  %v1662_v28 = vadd.f32 %v5255_v22, %v1617_v15  ;;  %vm6285_vm15 = vcmp.eq.s32.totalorder %v6284_v19, 1  ;;  %v3557_v19 = vpop.f32.mrf.mxu0 }
 0x588   :  { %v1696_v31 = vsel %vm6285_vm15, %v1680_v58, 0.0  ;;  %vm6287_vm13 = vcmp.eq.s32.totalorder %v6286_v55, 1  ;;  %vm6289_vm12 = vcmp.eq.s32.totalorder %v6288_v21, 1  ;;  %v1665_v52 = vadd.f32 %v5255_v22, %v1628_v48 }
 0x589   :  { %v1750_v11 = vsel %vm6287_vm13, %v1680_v58, 0.0  ;;  %v1803_v50 = vsel %vm6289_vm12, %v1680_v58, 0.0  ;;  %v5447_v30 = vsel %vm1702_vm11, %v1691_v25, -inf  ;;  %vm6291_vm5 = vcmp.eq.s32.totalorder %v6290_v36, 1  ;;  %v3577_v25 = vpop.f32.mrf.mxu1  ;;  %v1502_v0 = vpop.f32.mrf.mxu0 }
 0x58a   :  { %v1856_v43 = vsel %vm6291_vm5, %v1680_v58, 0.0  ;;  %v1663_v17 = vadd.f32 %v5255_v22, %v1620_v12  ;;  %v1668_v15 = vadd.f32 %v5255_v22, %v1641_v37  ;;  %v5454_v23 = vsel %vm1702_vm11, %v1745_v26, -inf }
 0x58b   :  { %v5457_v55 = vsel %vm1702_vm11, %v1798_v47, -inf  ;;  %v5460_v21 = vsel %vm1702_vm11, %v1851_v32, -inf  ;;  %v1633_v48 = vadd.f32 %v1632_v62, %v1499_v49  ;;  %v1719_v61 = vsel %vm1702_vm11, %v1696_v31, -inf  ;;  %v1635_v62 = vpop.f32.mrf.mxu1 }
 0x58c   :  { %v1772_v58 = vsel %vm1702_vm11, %v1750_v11, -inf  ;;  %v1825_v12 = vsel %vm1702_vm11, %v1803_v50, -inf  ;;  %v1678_v36 = vmax.f32 %v1662_v28, 0.0  ;;  %v1710_v37 = vmax.f32 %v5350_v20, %v5447_v30 }
 0x58d   :  { %v1878_v26 = vsel %vm1702_vm11, %v1856_v43, -inf  ;;  %v1681_v40 = vmax.f32 %v1665_v52, 0.0  ;;  %v1644_v47 = vadd.f32 %v3577_v25, %v3557_v19  ;;  %v1763_v32 = vmax.f32 %v5353_v7, %v5454_v23 }
 0x58e   :  { %v1816_v49 = vmax.f32 %v5356_v44, %v5457_v55  ;;  %v1869_v31 = vmax.f32 %v5359_v3, %v5460_v21  ;;  %v1694_v50 = vsel %vm827_vm14, %v1678_v36, 0.0  ;;  %v6292_v28 = vmax.f32 %v5269_v45, %v5336_v33 }
 0x58f   :  { %v6293_v20 = vmax.f32 %v5272_v27, %v5341_v9  ;;  %v6294_v23 = vmax.f32 %v5289_v10, %v5344_v35  ;;  %v1748_v44 = vsel %vm977_vm2, %v1678_v36, 0.0  ;;  %v6295_v3 = vmax.f32 %v5292_v59, %v5364_v53  ;;  %v6300_v53 = vld [vmem:[#allocation41_spill] sm:$0xff] }
 0x590   :  { %v5479_v30 = vmax.f32 %v6292_v28, %v1719_v61  ;;  %v6296_v61 = vld [vmem:[#allocation48_spill] sm:$0xff]  ;;  %vm6298_vm4 = vcmp.eq.s32.totalorder %v4590_v34, 1  ;;  %v1679_v9 = vmax.f32 %v1663_v17, 0.0  ;;  %v1715_v10 = vsel %vm1702_vm11, %v1694_v50, -inf }
 0x591   :  { %v5484_v11 = vmax.f32 %v6293_v20, %v1772_v58  ;;  %v5489_v7 = vmax.f32 %v6294_v23, %v1825_v12  ;;  %v5496_v33 = vmax.f32 %v6295_v3, %v1878_v26  ;;  %vm6297_vm14 = vcmp.eq.s32.totalorder %v6296_v61, 1 }
 0x592   :  { %v1801_v45 = vsel %vm6297_vm14, %v1678_v36, 0.0  ;;  %v1854_v27 = vsel %vm6298_vm4, %v1678_v36, 0.0  ;;  %vm6299_vm10 = vcmp.eq.s32.totalorder %v4526_v41, 1  ;;  %v1684_v35 = vmax.f32 %v1668_v15, 0.0  ;;  %v6303_v41 = vld [vmem:[#allocation64_spill] sm:$0xff] }
 0x593   :  { %v1697_v6 = vsel %vm6299_vm10, %v1681_v40, 0.0  ;;  %v1666_v52 = vadd.f32 %v5255_v22, %v1633_v48  ;;  %v1768_v59 = vsel %vm1702_vm11, %v1748_v44, -inf  ;;  %vm6301_vm2 = vcmp.eq.s32.totalorder %v6300_v53, 1 }
 0x594   :  { %v1751_v43 = vsel %vm6301_vm2, %v1681_v40, 0.0  ;;  %v1669_v19 = vadd.f32 %v5255_v22, %v1644_v47  ;;  %v1636_v55 = vadd.f32 %v1635_v62, %v1502_v0  ;;  %v1821_v34 = vsel %vm1702_vm11, %v1801_v45, -inf  ;;  %v6316_v45 = vld [vmem:[#allocation57_spill] sm:$0xff] }
 0x595   :  { %v1874_v17 = vsel %vm1702_vm11, %v1854_v27, -inf  ;;  %v1804_v25 = vsel %vm1129_vm1, %v1681_v40, 0.0  ;;  %vm6304_vm6 = vcmp.eq.s32.totalorder %v6303_v41, 1  ;;  %v6305_v48 = vmax.f32 %v5295_v56, %v5391_v4 }
 0x596   :  { %v1857_v15 = vsel %vm6304_vm6, %v1681_v40, 0.0  ;;  %v1721_v12 = vsel %vm1702_vm11, %v1697_v6, -inf  ;;  %vm6306_vm15 = vcmp.eq.s32.totalorder %v4522_v2, 1  ;;  %vm6307_vm13 = vcmp.eq.s32.totalorder %v4530_v46, 1 }
 0x597   :  { %v5519_v58 = vmax.f32 %v6305_v48, %v1715_v10  ;;  %v1695_v36 = vsel %vm6306_vm15, %v1679_v9, 0.0  ;;  %v1749_v26 = vsel %vm6307_vm13, %v1679_v9, 0.0  ;;  %v6308_v47 = vmax.f32 %v5298_v54, %v5394_v60  ;;  %v6322_v10 = vld [vmem:[#allocation61_spill] sm:$0xff] }
 0x598   :  { %v1774_v40 = vsel %vm1702_vm11, %v1751_v43, -inf  ;;  %vm6309_vm1 = vcmp.eq.s32.totalorder %v4561_v14, 1  ;;  %vm6310_vm12 = vcmp.eq.s32.totalorder %v6160_v42, 1  ;;  %v1827_v28 = vsel %vm1702_vm11, %v1804_v25, -inf }
 0x599   :  { %v5529_v50 = vmax.f32 %v6308_v47, %v1768_v59  ;;  %v1802_v56 = vsel %vm6309_vm1, %v1679_v9, 0.0  ;;  %v1855_v4 = vsel %vm6310_vm12, %v1679_v9, 0.0  ;;  %v1880_v2 = vsel %vm1702_vm11, %v1857_v15, -inf  ;;  %v6331_v47 = vld [vmem:[#allocation70_spill] sm:$0xff] }
 0x59a   :  { %v1717_v46 = vsel %vm1702_vm11, %v1695_v36, -inf  ;;  %v1770_v20 = vsel %vm1702_vm11, %v1749_v26, -inf  ;;  %v6311_v54 = vmax.f32 %v5301_v8, %v5397_v38  ;;  %v6312_v14 = vmax.f32 %v5304_v39, %v5400_v57  ;;  %v6329_v26 = vld [vmem:[#allocation59_spill] sm:$0xff] }
 0x59b   :  { %v6313_v42 = vmax.f32 %v5309_v63, %v5403_v24  ;;  %vm6314_vm5 = vcmp.eq.s32.totalorder %v6163_v13, 1  ;;  %v6315_v3 = vmax.f32 %v5312_v16, %v5406_v1  ;;  %v1823_v8 = vsel %vm1702_vm11, %v1802_v56, -inf  ;;  %v6320_v1 = vld [vmem:[#allocation65_spill] sm:$0xff] }
 0x59c   :  { %v5543_v60 = vmax.f32 %v6311_v54, %v1821_v34  ;;  %v5548_v23 = vmax.f32 %v6312_v14, %v1874_v17  ;;  %v1700_v0 = vsel %vm6314_vm5, %v1684_v35, 0.0  ;;  %v1876_v38 = vsel %vm1702_vm11, %v1855_v4, -inf  ;;  %v6333_v56 = vld [vmem:[#allocation53_spill] sm:$0xff] }
 0x59d   :  { %v5553_v44 = vmax.f32 %v6313_v42, %v1721_v12  ;;  %v1775_v61 = vmax.f32 %v6315_v3, %v1774_v40  ;;  %vm6317_vm14 = vcmp.eq.s32.totalorder %v6316_v45, 1  ;;  %v6318_v57 = vmax.f32 %v5325_v51, %v5409_v5 }
 0x59e   :  { %v1754_v39 = vsel %vm6317_vm14, %v1684_v35, 0.0  ;;  %v6319_v24 = vmax.f32 %v5347_v18, %v5412_v29  ;;  %v1718_v27 = vmax.f32 %v1710_v37, %v1717_v46  ;;  %v1771_v9 = vmax.f32 %v1763_v32, %v1770_v20 }
 0x59f   :  { %v1828_v63 = vmax.f32 %v6318_v57, %v1827_v28  ;;  %v1727_v16 = vsel %vm1702_vm11, %v1700_v0, -inf  ;;  %vm6321_vm4 = vcmp.eq.s32.totalorder %v6320_v1, 1  ;;  %vm6323_vm10 = vcmp.eq.s32.totalorder %v6322_v10, 1 }
 0x5a0   :  { %v1881_v13 = vmax.f32 %v6319_v24, %v1880_v2  ;;  %v1807_v62 = vsel %vm6321_vm4, %v1684_v35, 0.0  ;;  %v1860_v6 = vsel %vm6323_vm10, %v1684_v35, 0.0  ;;  %v1682_v59 = vmax.f32 %v1666_v52, 0.0  ;;  %v6335_v24 = vld [vmem:[#allocation54_spill] sm:$0xff] }
 0x5a1   :  { %v1824_v53 = vmax.f32 %v1816_v49, %v1823_v8  ;;  %v1877_v43 = vmax.f32 %v1869_v31, %v1876_v38  ;;  %v1780_v51 = vsel %vm1702_vm11, %v1754_v39, -inf  ;;  %v1685_v5 = vmax.f32 %v1669_v19, 0.0 }
 0x5a2   :  { %v1698_v18 = vsel %vm831_vm9, %v1682_v59, 0.0  ;;  %v1752_v37 = vsel %vm981_vm0, %v1682_v59, 0.0  ;;  %v1805_v17 = vsel %vm1130_vm7, %v1682_v59, 0.0  ;;  %v1858_v25 = vsel %vm1279_vm3, %v1682_v59, 0.0 }
 0x5a3   :  { %v1728_v35 = vmax.f32 %v5479_v30, %v1727_v16  ;;  %v1833_v49 = vsel %vm1702_vm11, %v1807_v62, -inf  ;;  %v1886_v31 = vsel %vm1702_vm11, %v1860_v6, -inf  ;;  %v1667_v52 = vadd.f32 %v5255_v22, %v1636_v55  ;;  %v6339_v16 = vld [vmem:[#allocation66_spill] sm:$0xff] }
 0x5a4   :  { %v1723_v19 = vsel %vm1702_vm11, %v1698_v18, -inf  ;;  %v1776_v41 = vsel %vm1702_vm11, %v1752_v37, -inf  ;;  %v1829_v15 = vsel %vm1702_vm11, %v1805_v17, -inf  ;;  %v1882_v48 = vsel %vm1702_vm11, %v1858_v25, -inf }
 0x5a5   :  { %v1701_v36 = vsel %vm834_vm8, %v1685_v5, 0.0  ;;  %vm6330_vm3 = vcmp.eq.s32.totalorder %v6329_v26, 1  ;;  %vm6332_vm0 = vcmp.eq.s32.totalorder %v6331_v47, 1  ;;  %vm6334_vm9 = vcmp.eq.s32.totalorder %v6333_v56, 1 }
 0x5a6   :  { %v1755_v30 = vsel %vm6330_vm3, %v1685_v5, 0.0  ;;  %v1808_v40 = vsel %vm6332_vm0, %v1685_v5, 0.0  ;;  %v1861_v22 = vsel %vm6334_vm9, %v1685_v5, 0.0  ;;  %v1729_v55 = vsel %vm1702_vm11, %v1701_v36, -inf }
 0x5a7   :  { %v1782_v4 = vsel %vm1702_vm11, %v1755_v30, -inf  ;;  %v1835_v28 = vsel %vm1702_vm11, %v1808_v40, -inf  ;;  %v1888_v2 = vsel %vm1702_vm11, %v1861_v22, -inf  ;;  %v1781_v46 = vmax.f32 %v5484_v11, %v1780_v51 }
 0x5a8   :  { %v1834_v20 = vmax.f32 %v5489_v7, %v1833_v49  ;;  %v1887_v54 = vmax.f32 %v5496_v33, %v1886_v31  ;;  %v1724_v14 = vmax.f32 %v5519_v58, %v1723_v19  ;;  %v1777_v42 = vmax.f32 %v5529_v50, %v1776_v41  ;;  %v6337_v7 = vld [vmem:[#allocation58_spill] sm:$0xff]  ;;  %v6341_v50 = vld [vmem:[#allocation75_spill] sm:$0xff] }
 0x5a9   :  { %v1830_v0 = vmax.f32 %v5543_v60, %v1829_v15  ;;  %v1883_v3 = vmax.f32 %v5548_v23, %v1882_v48  ;;  %v1683_v8 = vmax.f32 %v1667_v52, 0.0  ;;  %v1730_v38 = vmax.f32 %v5553_v44, %v1729_v55 }
 0x5aa   :  { %v1783_v45 = vmax.f32 %v1775_v61, %v1782_v4  ;;  %v1836_v39 = vmax.f32 %v1828_v63, %v1835_v28  ;;  %v1889_v57 = vmax.f32 %v1881_v13, %v1888_v2  ;;  %vm6336_vm8 = vcmp.eq.s32.totalorder %v6335_v24, 1  ;;  %v6347_v24 = vld [vmem:[#allocation71_spill] sm:$0xff] }
 0x5ab   :  { %v1699_v11 = vsel %vm6336_vm8, %v1683_v8, 0.0  ;;  %vm6338_vm7 = vcmp.eq.s32.totalorder %v6337_v7, 1  ;;  %vm6340_vm2 = vcmp.eq.s32.totalorder %v6339_v16, 1  ;;  %vm6342_vm6 = vcmp.eq.s32.totalorder %v6341_v50, 1  ;;  %v1904_v50 = vld [vmem:[%s5932_s8 + $0x8] sm:$0xff] }
 0x5ac   :  { %v1753_v33 = vsel %vm6338_vm7, %v1683_v8, 0.0  ;;  %v1806_v58 = vsel %vm6340_vm2, %v1683_v8, 0.0  ;;  %v1859_v60 = vsel %vm6342_vm6, %v1683_v8, 0.0  ;;  %v1725_v23 = vsel %vm1702_vm11, %v1699_v11, -inf  ;;  %v3689_v8 = vld [vmem:[%s5934_s10 + $0x38] sm:$0xff]  }
 0x5ad   :  { %v1778_v1 = vsel %vm1702_vm11, %v1753_v33, -inf  ;;  %v1831_v44 = vsel %vm1702_vm11, %v1806_v58, -inf  ;;  %v1884_v61 = vsel %vm1702_vm11, %v1859_v60, -inf  ;;  %v1726_v63 = vmax.f32 %v1718_v27, %v1725_v23  ;;  %v3691_v58 = vld [vmem:[%s5934_s10 + $0x30] sm:$0xff]   ;;  %v1908_v60 = vld [vmem:[%s5932_s8 + $0x28] sm:$0xff] }
 0x5ae   :  { %v1779_v13 = vmax.f32 %v1771_v9, %v1778_v1  ;;  %v1832_v62 = vmax.f32 %v1824_v53, %v1831_v44  ;;  %v1885_v10 = vmax.f32 %v1877_v43, %v1884_v61  ;;  %v1732_v6 = vmax.f32 %v1728_v35, %v1730_v38  ;;  %v1912_v38 = vld [vmem:[%s5932_s8 + $0x48] sm:$0xff] }
 0x5af   :  { %v1785_v59 = vmax.f32 %v1781_v46, %v1783_v45  ;;  %v1838_v51 = vmax.f32 %v1834_v20, %v1836_v39  ;;  %v1891_v5 = vmax.f32 %v1887_v54, %v1889_v57  ;;  %v1731_v34 = vmax.f32 %v1724_v14, %v1726_v63  ;;  %v1920_v20 = vld [vmem:[%s5932_s8 + $0x88] sm:$0xff]  ;;  %v3690_v39 = vld [vmem:[%s5934_s10 + $0x70] sm:$0xff]   ;;  %v1930_v63 = vld [vmem:[%s5932_s8 + $0xd8] sm:$0xff] }
 0x5b0   :  { %v1784_v18 = vmax.f32 %v1777_v42, %v1779_v13  ;;  %v1837_v29 = vmax.f32 %v1830_v0, %v1832_v62  ;;  %v1890_v37 = vmax.f32 %v1883_v3, %v1885_v10  ;;  %vm6343_vm15 = vcmask 1040384   ;;  %v1924_v54 = vld [vmem:[%s5932_s8 + $0xa8] sm:$0xff]  ;;  %v6346_v57 = vld [vmem:[#allocation67_spill] sm:$0xff]  ;;  %v3694_v62 = vld [vmem:[%s5934_s10 + $0x60] sm:$0xff]  }
 0x5b1   :  { %v1733_v32 = vmax.f32 %v1731_v34, %v1732_v6  ;;  %vm6344_vm13 = vcmask 1041408   ;;  %vm6345_vm1 = vcmask 1042432   ;;  %v3246_v3 = vcombine.high %v1920_v20, %v1924_v54  ;;  %v1916_v45 = vld [vmem:[%s5932_s8 + $0x68] sm:$0xff]  ;;  %v1934_v13 = vld [vmem:[%s5932_s8 + $0xf8] sm:$0xff] }
 0x5b2   :  { %v1786_v17 = vmax.f32 %v1784_v18, %v1785_v59  ;;  %v1839_v21 = vmax.f32 %v1837_v29, %v1838_v51  ;;  %v1892_v25 = vmax.f32 %v1890_v37, %v1891_v5  ;;  %v6348_v11 = vcombine.low %v6346_v57, %v6347_v24  ;;  %v3692_v23 = vld [vmem:[%s5934_s10 + $0x68] sm:$0xff]   ;;  %v3695_v59 = vld [vmem:[%s5934_s10 + $0x20] sm:$0xff]   ;;  %v1922_v51 = vld [vmem:[%s5932_s8 + $0x98] sm:$0xff] }
 0x5b3   :  { %v1734_v49 = vrot.slane %v1733_v32, 4  ;;  %v3245_v7 = vcombine.low %v1920_v20, %v1924_v54  ;;  %v6349_v33 = vmov 0   ;;  %v3238_v16 = vcombine.high %v1912_v38, %v1916_v45  ;;  %v3693_v61 = vld [vmem:[%s5934_s10 + $0x28] sm:$0xff]   ;;  %v1926_v5 = vld [vmem:[%s5932_s8 + $0xb8] sm:$0xff]  ;;  %v3724_v54 = vld [vmem:[%s5934_s10 + $0xc0] sm:$0xff]  }
 0x5b4   :  { %v1787_v31 = vrot.slane %v1786_v17, 4  ;;  %v1840_v52 = vrot.slane %v1839_v21, 4  ;;  %v1893_v19 = vrot.slane %v1892_v25, 4  ;;  %v3237_v1 = vcombine.low %v1912_v38, %v1916_v45  ;;  %v3697_v34 = vld [vmem:[%s5934_s10 + $0x58] sm:$0xff]   ;;  %v3721_v20 = vld [vmem:[%s5934_s10 + $0x88] sm:$0xff]   ;;  %vm6353_vm5 = vmmov %vm6344_vm13 }
 0x5b5   :  { %v1735_v27 = vmax.f32 %v1733_v32, %v1734_v49  ;;  %v3230_v44 = vcombine.high %v1904_v50, %v1908_v60  ;;  %v3229_v10 = vcombine.low %v1904_v50, %v1908_v60  ;;  %v3258_v6 = vcombine.high %v1930_v63, %v1934_v13  ;;  %v1914_v37 = vld [vmem:[%s5932_s8 + $0x58] sm:$0xff]  ;;  %vm6354_vm14 = vmmov %vm6353_vm5 }
 0x5b6   :  { %v1788_v9 = vmax.f32 %v1786_v17, %v1787_v31  ;;  %v1841_v53 = vmax.f32 %v1839_v21, %v1840_v52  ;;  %v1894_v43 = vmax.f32 %v1892_v25, %v1893_v19  ;;  %v3257_v18 = vcombine.low %v1930_v63, %v1934_v13  ;;  %v1918_v32 = vld [vmem:[%s5932_s8 + $0x78] sm:$0xff] }
 0x5b7   :  { %v1736_v35 = vrot.slane %v1735_v27, 2  ;;  %v3250_v29 = vcombine.high %v1922_v51, %v1926_v5  ;;  %v3249_v17 = vcombine.low %v1922_v51, %v1926_v5  ;;  %v3242_v21 = vcombine.high %v1914_v37, %v1918_v32  ;;  %v1906_v25 = vld [vmem:[%s5932_s8 + $0x18] sm:$0xff] }
 0x5b8   :  { %v1789_v41 = vrot.slane %v1788_v9, 2  ;;  %v1842_v15 = vrot.slane %v1841_v53, 2  ;;  %v1895_v48 = vrot.slane %v1894_v43, 2  ;;  %v1910_v49 = vld [vmem:[%s5932_s8 + $0x38] sm:$0xff]  ;;  %v3241_v31 = vcombine.low %v1914_v37, %v1918_v32 }
 0x5b9   :  { %v1737_v12 = vmax.f32 %v1735_v27, %v1736_v35  ;;  %v3234_v52 = vcombine.high %v1906_v25, %v1910_v49  ;;  %v3233_v19 = vcombine.low %v1906_v25, %v1910_v49  ;;  %v3696_v27 = vld [vmem:[%s5934_s10 + $0xf8] sm:$0xff]   ;;  %v3701_v35 = vld [vmem:[%s5934_s10 + $0x50] sm:$0xff]   ;;  %vm6352_vm12 = vmmov 0  }
 0x5ba   :  { %v1790_v36 = vmax.f32 %v1788_v9, %v1789_v41  ;;  %v1843_v26 = vmax.f32 %v1841_v53, %v1842_v15  ;;  %v1896_v30 = vmax.f32 %v1894_v43, %v1895_v48  ;;  %v3698_v9 = vld [vmem:[%s5934_s10 + $0xb8] sm:$0xff]   ;;  %v3700_v43 = vld [vmem:[%s5934_s10 + $0xf0] sm:$0xff]   ;;  %v3704_v48 = vld [vmem:[%s5934_s10 + $0xe8] sm:$0xff]  }
 0x5bb   :  { %v1738_v47 = vrot.slane %v1737_v12, 1  ;;  %v3699_v53 = vld [vmem:[%s5934_s10 + $0x18] sm:$0xff]   ;;  %v3702_v41 = vld [vmem:[%s5934_s10 + $0xb0] sm:$0xff]  }
 0x5bc   :  { %v1791_v40 = vrot.slane %v1790_v36, 1  ;;  %v1844_v56 = vrot.slane %v1843_v26, 1  ;;  %v1897_v22 = vrot.slane %v1896_v30, 1  ;;  %v3703_v15 = vld [vmem:[%s5934_s10 + $0x10] sm:$0xff]   ;;  %v3715_v49 = vld [vmem:[%s5934_s10 + $0x138] sm:$0xff]  }
 0x5bd   :  { %v1739_v55 = vmax.f32 %v1737_v12, %v1738_v47  ;;  %v3705_v12 = vld [vmem:[%s5934_s10 + $0x48] sm:$0xff]   ;;  %v3709_v47 = vld [vmem:[%s5934_s10 + $0x40] sm:$0xff]  }
 0x5be   :  { %v1792_v4 = vmax.f32 %v1790_v36, %v1791_v40  ;;  %v1845_v28 = vmax.f32 %v1843_v26, %v1844_v56  ;;  %v1898_v2 = vmax.f32 %v1896_v30, %v1897_v22  ;;  %v3706_v36 = vld [vmem:[%s5934_s10 + $0xa8] sm:$0xff]   ;;  %v3708_v30 = vld [vmem:[%s5934_s10 + $0xe0] sm:$0xff]   ;;  %v3712_v22 = vld [vmem:[%s5934_s10 + $0xd8] sm:$0xff]  }
 0x5bf   :  { %v3707_v26 = vld [vmem:[%s5934_s10 + $0x8] sm:$0xff]   ;;  %v3710_v40 = vld [vmem:[%s5934_s10 + $0xa0] sm:$0xff]  }
 0x5c0   :  { %v1899_v46 = vsel %vm6343_vm15, %v1739_v55, %v1792_v4  ;;  %v3711_v56 = vld [vmem:[%s5934_s10] sm:$0xff]   ;;  %v3713_v55 = vld [vmem:[%s5934_s10 + $0x98] sm:$0xff]  }
 0x5c1   :  { %v1900_v14 = vsel %vm6344_vm13, %v1899_v46, %v1845_v28  ;;  %v3714_v4 = vld [vmem:[%s5934_s10 + $0x178] sm:$0xff]   ;;  %v3716_v28 = vld [vmem:[%s5934_s10 + $0xd0] sm:$0xff]   ;;  %v3720_v46 = vld [vmem:[%s5934_s10 + $0xc8] sm:$0xff]  }
 0x5c2   :  { %v1901_v42 = vsel %vm6345_vm1, %v1900_v14, %v1898_v2  ;;  %v3717_v2 = vld [vmem:[%s5934_s10 + $0x90] sm:$0xff]   ;;  %v3725_v14 = vld [vmem:[%s5934_s10 + $0x80] sm:$0xff]  }
 0x5c3   :  { %v5633_v0 = vpack.c.bf16 %v1901_v42, %v1901_v42  ;;  %v3728_v42 = vld [vmem:[%s5934_s10 + $0x1f8] sm:$0xff]  }
 0x5c5   :  { %3259 = vmatmul.mubr.msk.bf16.vlgmr.msra.gmra.mxu0 %vm1702_vm11, %v5633_v0  ;;  %3261 = vmatmul.mubr.msk.bf16.vlgmr.msra.gmra.mxu1 %vm1702_vm11, %v5633_v0 }
 0x5c6   :  { %2190 = vmatpush1.bf16.msra.mxu0 %v6348_v11  ;;  %2213 = vmatprep.mubr.bf16.mxu0 %v6349_v33 }
 0x5c7   :  { %2191 = vmatprep.subr.bf16.mxu0 %v3246_v3  ;;  %3384 = vmatpush3.bf16.msra.mxu1 %v3689_v8  ;;  %v5787_v8 = vld [vmem:[%s5933_s9] sm:$0xff] }
 0x5c8   :  { %3385 = vmatprep.subr.bf16.mxu1 %v3690_v39 }
 0x5ca   :  { %2192 = vmatpush1.bf16.msra.mxu0 %v3245_v7 }
 0x5cb   :  { %2193 = vmatprep.subr.bf16.mxu0 %v3238_v16  ;;  %3386 = vmatpush3.bf16.msra.mxu1 %v3691_v58 }
 0x5cc   :  { %3387 = vmatprep.subr.bf16.mxu1 %v3692_v23 }
 0x5ce   :  { %2194 = vmatpush1.bf16.msra.mxu0 %v3237_v1 }
 0x5cf   :  { %2195 = vmatprep.subr.bf16.mxu0 %v3230_v44  ;;  %3388 = vmatpush3.bf16.msra.mxu1 %v3693_v61 }
 0x5d0   :  { %3389 = vmatprep.subr.bf16.mxu1 %v3694_v62 }
 0x5d2   :  { %2196 = vmatpush1.bf16.msra.mxu0 %v3229_v10 }
 0x5d3   :  { %2271 = vmatprep.subr.bf16.mxu0 %v3258_v6  ;;  %3390 = vmatpush3.bf16.msra.mxu1 %v3695_v59 }
 0x5d4   :  { %3391 = vmatprep.subr.bf16.mxu1 %v3697_v34 }
 0x5d5   :  { %3260 = vmatmul.mubr.msk.bf16.vlgmr.msra.gmra.mxu0 %vm1702_vm11, %v5633_v0 }
 0x5d6   :  { %2272 = vmatpush1.bf16.msra.mxu0 %v3257_v18  ;;  %2295 = vmatprep.mubr.bf16.mxu0 %v6349_v33 }
 0x5d7   :  { %2273 = vmatprep.subr.bf16.mxu0 %v3250_v29  ;;  %3392 = vmatpush3.bf16.msra.mxu1 %v3699_v53 }
 0x5d8   :  { %3393 = vmatprep.subr.bf16.mxu1 %v3701_v35 }
 0x5da   :  { %2274 = vmatpush1.bf16.msra.mxu0 %v3249_v17 }
 0x5db   :  { %2275 = vmatprep.subr.bf16.mxu0 %v3242_v21  ;;  %3394 = vmatpush3.bf16.msra.mxu1 %v3703_v15  ;;  %v3722_v15 = vld [vmem:[%s5934_s10 + $0x168] sm:$0xff]  }
 0x5dc   :  { %3395 = vmatprep.subr.bf16.mxu1 %v3705_v12 }
 0x5de   :  { %2276 = vmatpush1.bf16.msra.mxu0 %v3241_v31 }
 0x5df   :  { %2277 = vmatprep.subr.bf16.mxu0 %v3234_v52  ;;  %3396 = vmatpush3.bf16.msra.mxu1 %v3707_v26  ;;  %v3718_v52 = vld [vmem:[%s5934_s10 + $0x170] sm:$0xff]  }
 0x5e0   :  { %3397 = vmatprep.subr.bf16.mxu1 %v3709_v47  ;;  %v3723_v47 = vld [vmem:[%s5934_s10 + $0x128] sm:$0xff]  }
 0x5e2   :  { %2278 = vmatpush1.bf16.msra.mxu0 %v3233_v19 }
 0x5e3   :  { %3405 = vmatprep.subr.bf16.mxu0 %v3696_v27  ;;  %3398 = vmatpush3.bf16.msra.mxu1 %v3711_v56 }
 0x5e4   :  { %3427 = vmatprep.subr.bf16.mxu1 %v3714_v4 }
 0x5e5   :  { %3262 = vmatmul.mubr.msk.bf16.vlgmr.msra.gmra.mxu0 %vm1702_vm11, %v5633_v0  ;;  %v6350_v0 = vld [vmem:[#allocation5_spill] sm:$0xff] }
 0x5e6   :  { %3406 = vmatpush3.bf16.msra.mxu0 %v3698_v9  ;;  %v1939_v3 = vsub.s32 0, %v6350_v0  ;;  %v1943_v38 = vsub.s32 1, %v6350_v0  ;;  %v1959_v45 = vsub.s32 5, %v6350_v0  ;;  %v1947_v18 = vsub.s32 2, %v6350_v0 }
 0x5e7   :  { %3407 = vmatprep.subr.bf16.mxu0 %v3700_v43  ;;  %v1951_v17 = vsub.s32 3, %v6350_v0  ;;  %v3719_v43 = vld [vmem:[%s5934_s10 + $0x130] sm:$0xff]   ;;  %v1955_v35 = vsub.s32 4, %v6350_v0 }
 0x5e8   :  { %v1940_v39 = vrot.slane %v5787_v8, %v1939_v3  ;;  %v1944_v57 = vrot.slane %v5787_v8, %v1943_v38  ;;  %v1960_v24 = vrot.slane %v5787_v8, %v1959_v45  ;;  %v1948_v21 = vrot.slane %v5787_v8, %v1947_v18  ;;  %v3730_v38 = vld [vmem:[%s5934_s10 + $0x1b8] sm:$0xff]  }
 0x5e9   :  { %v1952_v19 = vrot.slane %v5787_v8, %v1951_v17  ;;  %v3731_v45 = vld [vmem:[%s5934_s10 + $0x118] sm:$0xff]  }
 0x5ea   :  { %3408 = vmatpush3.bf16.msra.mxu0 %v3702_v41  ;;  %v3744_v17 = vld [vmem:[%s5934_s10 + $0x1d8] sm:$0xff]  }
 0x5eb   :  { %3409 = vmatprep.subr.bf16.mxu0 %v3704_v48 }
 0x5ee   :  { %3410 = vmatpush3.bf16.msra.mxu0 %v3706_v36 }
 0x5ef   :  { %3411 = vmatprep.subr.bf16.mxu0 %v3708_v30 }
 0x5f2   :  { %3412 = vmatpush3.bf16.msra.mxu0 %v3710_v40  ;;  %v1956_v40 = vrot.slane %v5787_v8, %v1955_v35  ;;  %v3749_v35 = vld [vmem:[%s5934_s10 + $0x188] sm:$0xff]  }
 0x5f3   :  { %3413 = vmatprep.subr.bf16.mxu0 %v3712_v22  ;;  %v3726_v22 = vld [vmem:[%s5934_s10 + $0x160] sm:$0xff]  }
 0x5f6   :  { %3414 = vmatpush3.bf16.msra.mxu0 %v3713_v55 }
 0x5f7   :  { %3415 = vmatprep.subr.bf16.mxu0 %v3716_v28 }
 0x5fa   :  { %3416 = vmatpush3.bf16.msra.mxu0 %v3717_v2  ;;  %v3727_v2 = vld [vmem:[%s5934_s10 + $0x120] sm:$0xff]  }
 0x5fb   :  { %3417 = vmatprep.subr.bf16.mxu0 %v3720_v46 }
 0x5fe   :  { %3418 = vmatpush3.bf16.msra.mxu0 %v3721_v20 }
 0x5ff   :  { %3419 = vmatprep.subr.bf16.mxu0 %v3724_v54  ;;  %v3729_v54 = vld [vmem:[%s5934_s10 + $0x158] sm:$0xff]  }
 0x602   :  { %3420 = vmatpush3.bf16.msra.mxu0 %v3725_v14 }
 0x603   :  { %3449 = vmatprep.subr.bf16.mxu0 %v3728_v42  ;;  %v1967_v42 = vsub.s32 7, %v6350_v0 }
 0x685   :  { %v2174_v11 = vpop.f32.mrf.mxu0  ;;  %v2256_v7 = vpop.f32.mrf.mxu1 }
 0x686   :  { %v2175_v33 = vadd.f32 %v2174_v11, %v1940_v39  ;;  %v2257_v46 = vadd.f32 %v2256_v7, %v1956_v40  ;;  %v3733_v11 = vld [vmem:[%s5934_s10 + $0x150] sm:$0xff]   ;;  %v1968_v7 = vrot.slane %v5787_v8, %v1967_v42  ;;  %v3755_v40 = vld [vmem:[%s5936_s12] sm:$0xff]  }
 0x687   :  { %v2176_v16 = vpop.f32.mrf.mxu0  ;;  %v2258_v58 = vpop.f32.mrf.mxu1 }
 0x688   :  { %v2304_v50 = vmax.f32 %v2175_v33, 0.0  ;;  %v2177_v60 = vadd.f32 %v2176_v16, %v1944_v57  ;;  %v2259_v23 = vadd.f32 %v2258_v58, %v1960_v24  ;;  %v2308_v39 = vmax.f32 %v2257_v46, 0.0  ;;  %v3732_v24 = vld [vmem:[%s5934_s10 + $0x1f0] sm:$0xff]  }
 0x689   :  { %v2178_v1 = vpop.f32.mrf.mxu0  ;;  %v2260_v44 = vpop.f32.mrf.mxu1  ;;  %v3734_v16 = vld [vmem:[%s5934_s10 + $0x1b0] sm:$0xff]  }
 0x68a   :  { %v2320_v61 = vrot.slane %v2304_v50, 6  ;;  %v2305_v63 = vmax.f32 %v2177_v60, 0.0  ;;  %v2309_v13 = vmax.f32 %v2259_v23, 0.0  ;;  %v3735_v58 = vld [vmem:[%s5934_s10 + $0x110] sm:$0xff]   ;;  %v1963_v60 = vsub.s32 6, %v6350_v0  ;;  %v3736_v1 = vld [vmem:[%s5934_s10 + $0x1e8] sm:$0xff]  }
 0x68b   :  { %v2179_v62 = vpop.f32.mrf.mxu0  ;;  %v2261_v10 = vpop.f32.mrf.mxu1  ;;  %v3737_v44 = vld [vmem:[%s5934_s10 + $0x148] sm:$0xff]  }
 0x68c   :  { %v2336_v6 = vsub.f32 %v2304_v50, %v2320_v61  ;;  %v2321_v59 = vrot.slane %v2305_v63, 6  ;;  %v2325_v51 = vrot.slane %v2309_v13, 6  ;;  %v2324_v50 = vrot.slane %v2308_v39, 6  ;;  %v3738_v0 = vld [vmem:[%s5934_s10 + $0x1a8] sm:$0xff]  }
 0x68d   :  { %v3739_v62 = vld [vmem:[%s5934_s10 + $0x108] sm:$0xff]  }
 0x68e   :  { %v2337_v5 = vsub.f32 %v2305_v63, %v2321_v59  ;;  %v2341_v34 = vsub.f32 %v2309_v13, %v2325_v51  ;;  %v2344_v29 = vpack.c.bf16 %v2336_v6, %v2336_v6  ;;  %v2340_v10 = vsub.f32 %v2308_v39, %v2324_v50  ;;  %v3740_v51 = vld [vmem:[%s5934_s10 + $0x1e0] sm:$0xff]  }
 0x68f   :  { %v1964_v6 = vrot.slane %v5787_v8, %v1963_v60  ;;  %v3743_v8 = vld [vmem:[%s5934_s10 + $0x100] sm:$0xff]  }
 0x690   :  { %v2345_v37 = vpack.c.bf16 %v2337_v5, %v2337_v5  ;;  %v2349_v32 = vpack.c.bf16 %v2341_v34, %v2341_v34  ;;  %v2495_v31 = vrot.slane %v2344_v29, 1  ;;  %v3741_v5 = vld [vmem:[%s5934_s10 + $0x140] sm:$0xff]  }
 0x691   :  { %v3742_v29 = vld [vmem:[%s5934_s10 + $0x1a0] sm:$0xff]  }
 0x692   :  { %v2496_v25 = vrot.slane %v2345_v37, 1  ;;  %v2500_v27 = vrot.slane %v2349_v32, 1  ;;  %v2348_v37 = vpack.c.bf16 %v2340_v10, %v2340_v10 }
 0x694   :  { %2927 = vmatprep.mubr.bf16.mxu1 %v2496_v25 }
 0x695   :  { %v2215_v9 = vpop.f32.mrf.mxu0  ;;  %2928 = vmatmul.mubr.bf16.vlgmr.msra.gmra.mxu1 %v2495_v31  ;;  %v2499_v31 = vrot.slane %v2348_v37, 1 }
 0x696   :  { %v2216_v53 = vadd.f32 %v2215_v9, %v1948_v21  ;;  %3428 = vmatpush3.bf16.msra.mxu1 %v3715_v49  ;;  %3007 = vmatprep.mubr.bf16.mxu1 %v2500_v27  ;;  %v3745_v49 = vld [vmem:[%s5934_s10 + $0x198] sm:$0xff]   ;;  %v6351_v27 = vmov 0.0   ;;  %v3747_v9 = vld [vmem:[%s5934_s10 + $0x190] sm:$0xff]  }
 0x697   :  { %v2217_v41 = vpop.f32.mrf.mxu0  ;;  %3429 = vmatprep.subr.bf16.mxu1 %v3718_v52 }
 0x698   :  { %v2306_v48 = vmax.f32 %v2216_v53, 0.0  ;;  %v2218_v12 = vadd.f32 %v2217_v41, %v1952_v19  ;;  %v3746_v19 = vld [vmem:[%s5934_s10 + $0x1d0] sm:$0xff]  }
 0x699   :  { %v2219_v36 = vpop.f32.mrf.mxu0 }
 0x69a   :  { %v2322_v26 = vrot.slane %v2306_v48, 6  ;;  %v2307_v30 = vmax.f32 %v2218_v12, 0.0  ;;  %3430 = vmatpush3.bf16.msra.mxu1 %v3719_v43  ;;  %v3748_v43 = vld [vmem:[%s5934_s10 + $0x1c8] sm:$0xff]  }
 0x69b   :  { %v2220_v56 = vpop.f32.mrf.mxu0  ;;  %3431 = vmatprep.subr.bf16.mxu1 %v3722_v15  ;;  %v3750_v15 = vld [vmem:[%s5934_s10 + $0x1c0] sm:$0xff]  }
 0x69c   :  { %v2338_v55 = vsub.f32 %v2306_v48, %v2322_v26  ;;  %v2323_v4 = vrot.slane %v2307_v30, 6  ;;  %v3751_v48 = vld [vmem:[%s5934_s10 + $0x180] sm:$0xff]   ;;  %v3752_v26 = vld [vmem:[%s5936_s12 + $0x18] sm:$0xff]  }
 0x69e   :  { %v2339_v28 = vsub.f32 %v2307_v30, %v2323_v4  ;;  %3432 = vmatpush3.bf16.msra.mxu1 %v3723_v47  ;;  %v2346_v20 = vpack.c.bf16 %v2338_v55, %v2338_v55  ;;  %v3753_v30 = vld [vmem:[%s5936_s12 + $0x10] sm:$0xff]   ;;  %v3754_v47 = vld [vmem:[%s5936_s12 + $0x8] sm:$0xff]  }
 0x69f   :  { %3433 = vmatprep.subr.bf16.mxu1 %v3726_v22 }
 0x6a0   :  { %v2347_v14 = vpack.c.bf16 %v2339_v28, %v2339_v28  ;;  %v2497_v57 = vrot.slane %v2346_v20, 1 }
 0x6a2   :  { %3434 = vmatpush3.bf16.msra.mxu1 %v3727_v2  ;;  %v2498_v3 = vrot.slane %v2347_v14, 1 }
 0x6a3   :  { %3435 = vmatprep.subr.bf16.mxu1 %v3729_v54 }
 0x6a4   :  { %2967 = vmatprep.mubr.bf16.mxu0 %v2498_v3 }
 0x6a5   :  { %v2297_v33 = vpop.f32.mrf.mxu0  ;;  %2968 = vmatmul.mubr.bf16.vlgmr.msra.gmra.mxu0 %v2497_v57 }
 0x6a6   :  { %3450 = vmatpush3.bf16.msra.mxu0 %v3730_v38  ;;  %3436 = vmatpush3.bf16.msra.mxu1 %v3731_v45  ;;  %v2298_v32 = vadd.f32 %v2297_v33, %v1964_v6  ;;  %v3263_v45 = vld [vmem:[%s5935_s11] ss:$0 sm:$0xff]  ;;  %s3806_s11 = smov [#allocation2]  }
 0x6a7   :  { %v2299_v23 = vpop.f32.mrf.mxu0  ;;  %3451 = vmatprep.subr.bf16.mxu0 %v3732_v24  ;;  %3437 = vmatprep.subr.bf16.mxu1 %v3733_v11 }
 0x6a8   :  { %v2300_v61 = vadd.f32 %v2299_v23, %v1968_v7  ;;  %v2310_v52 = vmax.f32 %v2298_v32, 0.0 }
 0x6a9   :  { %v2301_v63 = vpop.f32.mrf.mxu0 }
 0x6aa   :  { %v2311_v13 = vmax.f32 %v2300_v61, 0.0  ;;  %3452 = vmatpush3.bf16.msra.mxu0 %v3734_v16  ;;  %3438 = vmatpush3.bf16.msra.mxu1 %v3735_v58  ;;  %v2326_v53 = vrot.slane %v2310_v52, 6  ;;  %v3328_v61 = vld [vmem:[%s5937_s13] ss:$0 sm:$0xff]  ;;  %s3159_s13 = sshll.u32 %s3806_s11, 4  ;;  %s3160_s13 = int_to_ptr.vmem [resolvable:$true] %s3159_s13 }
 0x6ab   :  { %v2302_v59 = vpop.f32.mrf.mxu0  ;;  %3453 = vmatprep.subr.bf16.mxu0 %v3736_v1  ;;  %3439 = vmatprep.subr.bf16.mxu1 %v3737_v44  ;;  %s3778_s21 = scalar_lea.vmem %s3160_s13, 32  ;;  %p3783_p1 = scmp.lt.s32.totalorder %s3160_s13, %s3160_s13 }
 0x6ac   :  { %v2327_v34 = vrot.slane %v2311_v13, 6  ;;  %v2342_v41 = vsub.f32 %v2310_v52, %v2326_v53  ;;  %p3779_p0 = scmp.ne.s32.totalorder %s3160_s13, %s3778_s21  ;;  %p3784_p2 = scmp.lt.s32.totalorder %s3778_s21, %s3778_s21 }
 0x6ae   :  { %v2343_v18 = vsub.f32 %v2311_v13, %v2327_v34  ;;  %3454 = vmatpush3.bf16.msra.mxu0 %v3738_v0  ;;  %3440 = vmatpush3.bf16.msra.mxu1 %v3739_v62  ;;  %v2350_v12 = vpack.c.bf16 %v2342_v41, %v2342_v41  ;;  %p3785_p3 = por %p3784_p2, %p3783_p1 }
 0x6af   :  { %3455 = vmatprep.subr.bf16.mxu0 %v3740_v51  ;;  %3441 = vmatprep.subr.bf16.mxu1 %v3741_v5 }
 0x6b0   :  { %v2351_v21 = vpack.c.bf16 %v2343_v18, %v2343_v18  ;;  %v2501_v36 = vrot.slane %v2350_v12, 1  ;;  %p3786_p4 = pnand %p3785_p3, %p3779_p0 }
 0x6b2   :  { %3456 = vmatpush3.bf16.msra.mxu0 %v3742_v29  ;;  %3442 = vmatpush3.bf16.msra.mxu1 %v3743_v8  ;;  %v2502_v25 = vrot.slane %v2351_v21, 1 }
 0x6b3   :  { %3457 = vmatprep.subr.bf16.mxu0 %v3744_v17  ;;  %3578 = vmatprep.subr.bf16.mxu1 %v6351_v27 }
 0x6b4   :  { %3047 = vmatprep.mubr.bf16.mxu0 %v2502_v25 }
 0x6b5   :  { %3008 = vmatmul.mubr.bf16.vlgmr.msra.gmra.mxu1 %v2499_v31 }
 0x6b6   :  { %3458 = vmatpush3.bf16.msra.mxu0 %v3745_v49  ;;  %3586 = vmatprep.mubr.msk.bf16.mxu1 %vm6352_vm12, %v6351_v27 }
 0x6b7   :  { %3459 = vmatprep.subr.bf16.mxu0 %v3746_v19  ;;  %3579 = vmatpush3.bf16.msra.mxu1 %v3752_v26 }
 0x6b8   :  { %3580 = vmatprep.subr.bf16.mxu1 %v6351_v27 }
 0x6ba   :  { %3460 = vmatpush3.bf16.msra.mxu0 %v3747_v9 }
 0x6bb   :  { %3461 = vmatprep.subr.bf16.mxu0 %v3748_v43  ;;  %3581 = vmatpush3.bf16.msra.mxu1 %v3753_v30 }
 0x6bc   :  { %3582 = vmatprep.subr.bf16.mxu1 %v6351_v27 }
 0x6be   :  { %3462 = vmatpush3.bf16.msra.mxu0 %v3749_v35 }
 0x6bf   :  { %3463 = vmatprep.subr.bf16.mxu0 %v3750_v15  ;;  %3583 = vmatpush3.bf16.msra.mxu1 %v3754_v47 }
 0x6c0   :  { %3584 = vmatprep.subr.bf16.mxu1 %v6351_v27 }
 0x6c2   :  { %3464 = vmatpush3.bf16.msra.mxu0 %v3751_v48 }
 0x6c3   :  { %3585 = vmatpush3.bf16.msra.mxu1 %v3755_v40 }
 0x6c5   :  { %3048 = vmatmul.mubr.bf16.vlgmr.msra.gmra.mxu0 %v2501_v36 }
 0x755   :  { %v3399_v56 = vpop.f32.mrf.mxu1 }
 0x757   :  { %v3400_v22 = vpop.f32.mrf.mxu1 }
 0x758   :  { %v3401_v38 = vadd.f32 %v3400_v22, %v3399_v56 }
 0x759   :  { %v3402_v55 = vpop.f32.mrf.mxu1 }
 0x75a   :  { %v2930_v57 = vadd.f32 %v3401_v38, %v3263_v45 }
 0x75b   :  { %v3403_v4 = vpop.f32.mrf.mxu1 }
 0x765   :  { %v3421_v28 = vpop.f32.mrf.mxu0 }
 0x767   :  { %v3422_v2 = vpop.f32.mrf.mxu0 }
 0x768   :  { %v3423_v39 = vadd.f32 %v3422_v2, %v3421_v28 }
 0x769   :  { %v3424_v46 = vpop.f32.mrf.mxu0 }
 0x76a   :  { %v2970_v7 = vadd.f32 %v3423_v39, %v2930_v57 }
 0x76b   :  { %v3425_v20 = vpop.f32.mrf.mxu0 }
 0x775   :  { %v3443_v54 = vpop.f32.mrf.mxu1 }
 0x777   :  { %v3444_v14 = vpop.f32.mrf.mxu1 }
 0x778   :  { %v3445_v24 = vadd.f32 %v3444_v14, %v3443_v54 }
 0x779   :  { %v3446_v42 = vpop.f32.mrf.mxu1 }
 0x77a   :  { %v3010_v16 = vadd.f32 %v3445_v24, %v2970_v7 }
 0x77b   :  { %v3447_v3 = vpop.f32.mrf.mxu1 }
 0x785   :  { %v3465_v11 = vpop.f32.mrf.mxu0 }
 0x787   :  { %v3466_v33 = vpop.f32.mrf.mxu0 }
 0x788   :  { %v3467_v58 = vadd.f32 %v3466_v33, %v3465_v11 }
 0x789   :  { %v3468_v50 = vpop.f32.mrf.mxu0 }
 0x78a   :  { %v3050_v60 = vadd.f32 %v3467_v58, %v3010_v16 }
 0x78b   :  { %v3469_v23 = vpop.f32.mrf.mxu0 }
 0x78c   :  { %v3055_v1 = vmax.f32 %v3050_v60, 0.0 }
 0x78e   :  { %v3056_v44 = vpack.c.bf16 %v3055_v1, %v3055_v1 }
 0x790   :  { %3587 = vmatmul.mubr.msk.bf16.vlgmr.msra.gmra.mxu1 %vm1702_vm11, %v3056_v44 }
 0x850   :  { %v3133_v63 = vpop.f32.mrf.mxu1 }
 0x851   :  { %v3134_v13 = vadd.f32 %v3328_v61, %v3133_v63 }
 0x852   :  { %v3588_v0 = vpop.f32.mrf.mxu1 }
 0x853   :  { %v3139_v62 = vsel %vm6353_vm5, %v3134_v13, -inf }
 0x854   :  { %3140 = vmax.xlane.f32.xlu0 %v3139_v62  ;;  %v3136_v10 = vpop.f32.mrf.mxu1 }
 0x856   :  { %v3589_v6 = vpop.f32.mrf.mxu1 }
 0x8dd   :  { %v3141_v59 = vpop.xlane.xlu0 %3140 }
 0x8de   :  { %v3142_v51 = vsub.f32 %v3134_v13, %v3141_v59 }
 0x8e0   :  { %v3143_v5 = vmul.f32 1.442695, %v3142_v51 }
 0x8e2   :  { %3758 = vpow2.f32 %v3143_v5 }
 0x8ef   :  { %v3759_v34 = vpop.eup %3758 }
 0x8f0   :  { %v3145_v18 = vsel %vm6354_vm14, %v3759_v34, 0.0 }
 0x8f1   :  { %3146 = vadd.xlane.f32.xlu1 %v3145_v18 }
 0x97a   :  { %v3147_v29 = vpop.xlane.xlu1 %3146 }
 0x97b   :  { %3760 = vlog2.f32 %v3147_v29 }
 0x988   :  { %v3761_v8 = vpop.eup %3760 }
 0x989   :  { %v3149_v37 = vmul.f32 0.6931472, %v3761_v8 }
 0x98b   :  { %v3150_v32 = vadd.f32 %v3149_v37, %v3141_v59 }
 0x98d   :  { %v3151_v17 = vsub.f32 %v3134_v13, %v3150_v32 }
 0x98f   :  { %3152 = vst [vmem:[#allocation2] sm:$0x3] %v3151_v17 }
 0x990   :  { %3789 = shalt.err (!%p3786_p4)
}
 0x991   :  { %3162 = dma.vmem_to_hbm [thread:$0]  %s3160_s13, 32, %s5938_s14, [#allocation3]  }
 0x992   :  { %3798 = dma.done.wait [#allocation3], 32  }
 0x993   :  { %3799 = vsyncadd [#allocation3], 4294967264 }
 0x994   :  { %3166 = vsyncpa [#allocation3], 1 }

</bundles_post_ra>
